<compile_context>
chip_gen: v7x
topology: tpu7x:2x2x1
jax: 0.10.0
libtpu: 0.0.40
codegen_flags: <defaults>
</compile_context>

<pallas_src>
import functools

import jax
import jax.numpy as jnp
from jax.experimental import pallas as pl
from jax.experimental.pallas import tpu as pltpu

GN_EPS = 1e-5


def _round_up(x, m):
    return (x + m - 1) // m * m


# ---------------------------------------------------------------------------
# Fused UNetBlock kernel (one batch element per grid step)
# ---------------------------------------------------------------------------
def _unet_block_kernel(x1_ref,                       # conv1 operand (see wrapper)
                       w1_ref, b1_ref, g1_ref, be1_ref,
                       w2_ref, b2_ref, g2_ref, be2_ref,
                       wsc_ref, bsc_ref,             # shortcut weight / bias
                       gmat_ref,                     # (Cout_p, Cout_p) group matrix
                       o_ref,                        # (H, W, Cout_p)  bf16
                       hpad_ref,                     # scratch (H+2, W+2, Cout_p) bf16
                       *, H, W, eps, fused_conv1):
    HW = H * W
    cout_p = o_ref.shape[-1]

    def group_norm(y, gamma, beta):
        # Per-group mean / E[x^2] via ONE membership-matrix matmul; the
        # 1/(HW*group_size) normalization is folded into gmat.
        s1 = jnp.sum(y, axis=0, keepdims=True)                  # (1, Cout_p)
        s2 = jnp.sum(y * y, axis=0, keepdims=True)              # (1, Cout_p)
        stats = jnp.concatenate([s1, s2], axis=0)               # (2, Cout_p)
        red = jnp.dot(stats, gmat_ref[...], preferred_element_type=jnp.float32)
        mean, ex2 = red[0:1, :], red[1:2, :]
        var = jnp.maximum(ex2 - mean * mean, 0.0)               # no NaN from rsqrt
        inv = jax.lax.rsqrt(var + eps)
        return (y - mean) * (inv * gamma) + beta

    def conv3x3_taps(src_ref, src_c, w_ref, bias):
        # 3x3 conv as 9 accumulated MXU matmuls over a zero-padded bf16 buffer.
        acc = jnp.zeros((HW, cout_p), jnp.float32)
        for t in range(9):
            dy, dx = divmod(t, 3)
            tap = src_ref[dy:dy + H, dx:dx + W, :].reshape(HW, src_c)
            acc = acc + jnp.dot(tap, w_ref[t], preferred_element_type=jnp.float32)
        return acc + bias

    # ---- block1: Conv3x3 + bias -> GroupNorm -> SiLU, and residual shortcut --
    if fused_conv1:
        # Small-channel regime: one matmul for conv1, one for the shortcut,
        # both over the same im2col operand built by the wrapper.
        xcol = x1_ref[...].reshape(HW, x1_ref.shape[-1])         # bf16
        h = jnp.dot(xcol, w1_ref[...], preferred_element_type=jnp.float32) + b1_ref[...]
        sc = jnp.dot(xcol, wsc_ref[...], preferred_element_type=jnp.float32) + bsc_ref[...]
    else:
        cin_p = x1_ref.shape[-1]
        h = conv3x3_taps(x1_ref, cin_p, w1_ref, b1_ref[...])
        xs = x1_ref[1:H + 1, 1:W + 1, :].reshape(HW, cin_p)
        sc = jnp.dot(xs, wsc_ref[...], preferred_element_type=jnp.float32) + bsc_ref[...]

    h = group_norm(h, g1_ref[...], be1_ref[...])
    h = h * (1.0 / (1.0 + jnp.exp(-h)))          # exact SiLU (matches reference)

    # dropout: inference-mode identity.

    # ---- stage h (bf16) into the halo scratch for block2's conv --------------
    # Zero only the 1-pixel border each step; the interior is fully overwritten.
    zrow = jnp.zeros((1, W + 2, cout_p), hpad_ref.dtype)
    zcol = jnp.zeros((H + 2, 1, cout_p), hpad_ref.dtype)
    hpad_ref[0:1, :, :] = zrow
    hpad_ref[H + 1:H + 2, :, :] = zrow
    hpad_ref[:, 0:1, :] = zcol
    hpad_ref[:, W + 1:W + 2, :] = zcol
    hpad_ref[1:H + 1, 1:W + 1, :] = h.reshape(H, W, cout_p).astype(hpad_ref.dtype)

    # ---- block2: Conv3x3 + bias -> GroupNorm (no activation) -----------------
    h2 = conv3x3_taps(hpad_ref, cout_p, w2_ref, b2_ref[...])
    h2 = group_norm(h2, g2_ref[...], be2_ref[...])

    # ---- residual add, bf16 lane-dense writeback ------------------------------
    o_ref[...] = (h2 + sc).reshape(H, W, cout_p).astype(o_ref.dtype)


# ---------------------------------------------------------------------------
# Wrapper: layout glue (NCHW -> NHWC, channel padding / im2col) + pallas_call
# ---------------------------------------------------------------------------
def unet_block_forward(x_nchw, params, *, num_groups, eps=GN_EPS):
    n, cin, h, w = x_nchw.shape
    cout = params["w1"].shape[0]
    assert cout % num_groups == 0
    hw = h * w

    cout_p = max(128, _round_up(cout, 128))
    fused_conv1 = (9 * cin) <= 128

    x_nhwc = jnp.transpose(x_nchw, (0, 2, 3, 1))

    def vec(v):
        return jnp.pad(v.astype(jnp.float32), (0, cout_p - v.shape[0])).reshape(1, cout_p)

    def conv_w_taps(w_oihw, ci_pad):
        co, ci, kh, kw = w_oihw.shape
        wt = jnp.transpose(w_oihw, (2, 3, 1, 0)).reshape(kh * kw, ci, co)
        return jnp.pad(wt, ((0, 0), (0, ci_pad - ci), (0, cout_p - co))).astype(jnp.bfloat16)

    w2 = conv_w_taps(params["w2"], cout_p)
    b1, b2 = vec(params["b1"]), vec(params["b2"])
    g1, be1 = vec(params["gn1_g"]), vec(params["gn1_b"])
    g2, be2 = vec(params["gn2_g"]), vec(params["gn2_b"])

    if "w_sc" in params:                      # 1x1 conv shortcut (Cin != Cout)
        wsc_small = jnp.transpose(params["w_sc"][:, :, 0, 0], (1, 0))  # (cin, cout)
        bsc = vec(params["b_sc"])
    else:                                     # identity shortcut (Cin == Cout)
        assert cin == cout
        wsc_small = jnp.eye(cin, dtype=jnp.float32)
        bsc = jnp.zeros((1, cout_p), jnp.float32)

    if fused_conv1:
        # conv1 operand: im2col with K = 9*cin padded to 128 lanes (bf16).
        k1 = 9 * cin
        k1p = max(128, _round_up(k1, 128))
        xp = jnp.pad(x_nhwc, ((0, 0), (1, 1), (1, 1), (0, 0)))
        taps = [xp[:, dy:dy + h, dx:dx + w, :] for dy in range(3) for dx in range(3)]
        xcol = jnp.concatenate(taps, axis=-1)                       # (N, H, W, 9*cin)
        x1 = jnp.pad(xcol, ((0, 0), (0, 0), (0, 0), (0, k1p - k1))).astype(jnp.bfloat16)
        x1_block = (None, h, w, k1p)
        # conv1 weight: (cout, cin, 3, 3) -> (9*cin, cout) -> (k1p, cout_p)
        w1 = jnp.transpose(params["w1"], (2, 3, 1, 0)).reshape(k1, cout)
        w1 = jnp.pad(w1, ((0, k1p - k1), (0, cout_p - cout))).astype(jnp.bfloat16)
        w1_spec = pl.BlockSpec((k1p, cout_p), lambda i: (0, 0))
        # Shortcut weight embedded at the centre-tap (dy=1, dx=1) rows so it can
        # reuse the same im2col operand.
        wsc = jnp.zeros((k1p, cout_p), jnp.float32)
        wsc = wsc.at[4 * cin:5 * cin, :cout].set(wsc_small.astype(jnp.float32))
        wsc = wsc.astype(jnp.bfloat16)
        wsc_spec = pl.BlockSpec((k1p, cout_p), lambda i: (0, 0))
    else:
        # General path: spatially padded bf16 NHWC input, 9-tap accumulation.
        cin_p = max(128, _round_up(cin, 128))
        x1 = jnp.pad(x_nhwc, ((0, 0), (1, 1), (1, 1), (0, cin_p - cin))).astype(jnp.bfloat16)
        x1_block = (None, h + 2, w + 2, cin_p)
        w1 = conv_w_taps(params["w1"], cin_p)
        w1_spec = pl.BlockSpec((9, cin_p, cout_p), lambda i: (0, 0, 0))
        wsc = jnp.pad(wsc_small.astype(jnp.float32),
                      ((0, cin_p - cin), (0, cout_p - cout))).astype(jnp.bfloat16)
        wsc_spec = pl.BlockSpec((cin_p, cout_p), lambda i: (0, 0))

    # Group-membership matrix with the 1/(HW*group_size) normalization folded in.
    gs = cout // num_groups
    gid = jnp.arange(cout) // gs
    gm = (gid[:, None] == gid[None, :]).astype(jnp.float32) / float(hw * gs)
    gmat = jnp.zeros((cout_p, cout_p), jnp.float32).at[:cout, :cout].set(gm)

    kernel = functools.partial(_unet_block_kernel, H=h, W=w, eps=float(eps),
                               fused_conv1=fused_conv1)
    cvec_spec = pl.BlockSpec((1, cout_p), lambda i: (0, 0))

    out = pl.pallas_call(
        kernel,
        out_shape=jax.ShapeDtypeStruct((n, h, w, cout_p), jnp.bfloat16),
        grid_spec=pltpu.PrefetchScalarGridSpec(
            num_scalar_prefetch=0,
            grid=(n,),
            in_specs=[
                pl.BlockSpec(x1_block, lambda i: (i, 0, 0, 0)),
                w1_spec,
                cvec_spec, cvec_spec, cvec_spec,
                pl.BlockSpec((9, cout_p, cout_p), lambda i: (0, 0, 0)),
                cvec_spec, cvec_spec, cvec_spec,
                wsc_spec,
                cvec_spec,
                pl.BlockSpec((cout_p, cout_p), lambda i: (0, 0)),
            ],
            out_specs=pl.BlockSpec((None, h, w, cout_p), lambda i: (i, 0, 0, 0)),
            scratch_shapes=[
                pltpu.VMEM((h + 2, w + 2, cout_p), jnp.bfloat16),
            ],
        ),
        compiler_params=pltpu.CompilerParams(
            dimension_semantics=("parallel",),
            vmem_limit_bytes=32 * 1024 * 1024,
        ),
    )(x1, w1, b1, g1, be1, w2, b2, g2, be2, wsc, bsc, gmat)

    # NCHW epilogue kept only for PyTorch API parity; downstream consumers could
    # take the lane-dense NHWC bf16 tensor directly.
    out = out[..., :cout].astype(jnp.float32)
    return jnp.transpose(out, (0, 3, 1, 2))


# ---------------------------------------------------------------------------
# Pure-JAX reference (emulates the kernel's bf16 MXU operands / bf16 output)
# ---------------------------------------------------------------------------
def _bf16_round(x):
    return x.astype(jnp.bfloat16).astype(jnp.float32)


def unet_block_forward_ref(x_nchw, params, *, num_groups, eps=GN_EPS):
    x = jnp.transpose(x_nchw, (0, 2, 3, 1))   # NHWC
    xb = _bf16_round(x)

    def conv3x3(v, w_oihw):
        return jax.lax.conv_general_dilated(
            _bf16_round(v), _bf16_round(jnp.transpose(w_oihw, (2, 3, 1, 0))),
            window_strides=(1, 1), padding=((1, 1), (1, 1)),
            dimension_numbers=("NHWC", "HWIO", "NHWC"))

    def group_norm(v, gamma, beta):
        n_, h_, w_, c_ = v.shape
        vg = v.reshape(n_, h_, w_, num_groups, c_ // num_groups)
        mean = vg.mean(axis=(1, 2, 4), keepdims=True)
        var = vg.var(axis=(1, 2, 4), keepdims=True)
        vg = (vg - mean) / jnp.sqrt(var + eps)
        return vg.reshape(n_, h_, w_, c_) * gamma + beta

    hh = conv3x3(xb, params["w1"]) + params["b1"]
    hh = group_norm(hh, params["gn1_g"], params["gn1_b"])
    hh = hh * jax.nn.sigmoid(hh)
    hh = conv3x3(hh, params["w2"]) + params["b2"]
    hh = group_norm(hh, params["gn2_g"], params["gn2_b"])

    if "w_sc" in params:
        sc = jnp.einsum("nhwc,oc->nhwo", xb,
                        _bf16_round(params["w_sc"][:, :, 0, 0])) + params["b_sc"]
    else:
        sc = xb
    out = _bf16_round(hh + sc)                 # kernel writes back bf16
    return jnp.transpose(out, (0, 3, 1, 2))


# ---------------------------------------------------------------------------
if __name__ == "__main__":
    key = jax.random.PRNGKey(0)
    N, C_IN, C_OUT, H, W = 2, 4, 8, 16, 16
    NUM_GROUPS = 4

    ks = jax.random.split(key, 10)
    params = {
        "w1": 0.1 * jax.random.normal(ks[0], (C_OUT, C_IN, 3, 3), jnp.float32),
        "b1": 0.1 * jax.random.normal(ks[1], (C_OUT,), jnp.float32),
        "gn1_g": 1.0 + 0.1 * jax.random.normal(ks[2], (C_OUT,), jnp.float32),
        "gn1_b": 0.1 * jax.random.normal(ks[3], (C_OUT,), jnp.float32),
        "w2": 0.1 * jax.random.normal(ks[4], (C_OUT, C_OUT, 3, 3), jnp.float32),
        "b2": 0.1 * jax.random.normal(ks[5], (C_OUT,), jnp.float32),
        "gn2_g": 1.0 + 0.1 * jax.random.normal(ks[6], (C_OUT,), jnp.float32),
        "gn2_b": 0.1 * jax.random.normal(ks[7], (C_OUT,), jnp.float32),
        # in_channels != out_channels -> 1x1 conv shortcut
        "w_sc": 0.1 * jax.random.normal(ks[8], (C_OUT, C_IN, 1, 1), jnp.float32),
        "b_sc": 0.1 * jax.random.normal(ks[9], (C_OUT,), jnp.float32),
    }

    x = jax.random.normal(jax.random.PRNGKey(42), (N, C_IN, H, W), jnp.float32)

    fwd = jax.jit(functools.partial(unet_block_forward, num_groups=NUM_GROUPS))
    out = jax.block_until_ready(fwd(x, params))
    assert out.shape == (N, C_OUT, H, W), out.shape

    ref = unet_block_forward_ref(x, params, num_groups=NUM_GROUPS)
    max_err = float(jnp.max(jnp.abs(out - ref)))
    assert jnp.allclose(out, ref, rtol=2e-2, atol=2e-2), max_err

    print("KERNEL_OK")
</pallas_src>

<mosaic_0001>
module attributes {stable_mosaic.version = 11 : i64} {
  func.func @_unet_block_kernel(%arg0: i32, %arg1: memref<1x16x16x128xbf16, #tpu.memory_space<vmem>>, %arg2: memref<128x128xbf16, #tpu.memory_space<vmem>>, %arg3: memref<1x128xf32, #tpu.memory_space<vmem>>, %arg4: memref<1x128xf32, #tpu.memory_space<vmem>>, %arg5: memref<1x128xf32, #tpu.memory_space<vmem>>, %arg6: memref<9x128x128xbf16, #tpu.memory_space<vmem>>, %arg7: memref<1x128xf32, #tpu.memory_space<vmem>>, %arg8: memref<1x128xf32, #tpu.memory_space<vmem>>, %arg9: memref<1x128xf32, #tpu.memory_space<vmem>>, %arg10: memref<128x128xbf16, #tpu.memory_space<vmem>>, %arg11: memref<1x128xf32, #tpu.memory_space<vmem>>, %arg12: memref<128x128xf32, #tpu.memory_space<vmem>>, %arg13: memref<1x16x16x128xbf16, #tpu.memory_space<vmem>>, %arg14: memref<18x18x128xbf16, #tpu.memory_space<vmem>>) attributes {dimension_semantics = [#tpu.dimension_semantics<parallel>], iteration_bounds = array<i64: 2>, scalar_prefetch = 0 : i64, scratch_operands = 1 : i64, tpu.core_type = #tpu.core_type<tc>, window_params = [{transform_indices = @transform_0, window_bounds = array<i64: 1, 16, 16, 128>}, {pipeline_mode = #tpu.pipeline_mode<synchronous>, transform_indices = @transform_1, window_bounds = array<i64: 128, 128>}, {pipeline_mode = #tpu.pipeline_mode<synchronous>, transform_indices = @transform_2, window_bounds = array<i64: 1, 128>}, {pipeline_mode = #tpu.pipeline_mode<synchronous>, transform_indices = @transform_3, window_bounds = array<i64: 1, 128>}, {pipeline_mode = #tpu.pipeline_mode<synchronous>, transform_indices = @transform_4, window_bounds = array<i64: 1, 128>}, {pipeline_mode = #tpu.pipeline_mode<synchronous>, transform_indices = @transform_5, window_bounds = array<i64: 9, 128, 128>}, {pipeline_mode = #tpu.pipeline_mode<synchronous>, transform_indices = @transform_6, window_bounds = array<i64: 1, 128>}, {pipeline_mode = #tpu.pipeline_mode<synchronous>, transform_indices = @transform_7, window_bounds = array<i64: 1, 128>}, {pipeline_mode = #tpu.pipeline_mode<synchronous>, transform_indices = @transform_8, window_bounds = array<i64: 1, 128>}, {pipeline_mode = #tpu.pipeline_mode<synchronous>, transform_indices = @transform_9, window_bounds = array<i64: 128, 128>}, {pipeline_mode = #tpu.pipeline_mode<synchronous>, transform_indices = @transform_10, window_bounds = array<i64: 1, 128>}, {pipeline_mode = #tpu.pipeline_mode<synchronous>, transform_indices = @transform_11, window_bounds = array<i64: 128, 128>}, {transform_indices = @transform_12, window_bounds = array<i64: 1, 16, 16, 128>}]} {
    %c0 = arith.constant 0 : index
    %c0_0 = arith.constant 0 : index
    %c0_1 = arith.constant 0 : index
    %c0_2 = arith.constant 0 : index
    %0 = vector.load %arg1[%c0, %c0_0, %c0_1, %c0_2] : memref<1x16x16x128xbf16, #tpu.memory_space<vmem>>, vector<1x16x16x128xbf16>
    %1 = vector.shape_cast %0 : vector<1x16x16x128xbf16> to vector<16x16x128xbf16>
    %2 = vector.shape_cast %1 : vector<16x16x128xbf16> to vector<256x128xbf16>
    %c0_3 = arith.constant 0 : index
    %c0_4 = arith.constant 0 : index
    %3 = vector.load %arg2[%c0_3, %c0_4] : memref<128x128xbf16, #tpu.memory_space<vmem>>, vector<128x128xbf16>
    %cst = arith.constant dense<0.000000e+00> : vector<256x128xf32>
    %4 = tpu.matmul %2, %3, %cst {dimension_numbers = #tpu.dot_dimension_numbers<[1], [0], [0], [1], [0, 0, 1, 1], [], []>} : vector<256x128xbf16>, vector<128x128xbf16>, vector<256x128xf32> -> vector<256x128xf32>
    %c0_5 = arith.constant 0 : index
    %c0_6 = arith.constant 0 : index
    %5 = vector.load %arg3[%c0_5, %c0_6] : memref<1x128xf32, #tpu.memory_space<vmem>>, vector<1x128xf32>
    %6 = vector.broadcast %5 : vector<1x128xf32> to vector<256x128xf32>
    %7 = arith.addf %4, %6 : vector<256x128xf32>
    %c0_7 = arith.constant 0 : index
    %c0_8 = arith.constant 0 : index
    %8 = vector.load %arg10[%c0_7, %c0_8] : memref<128x128xbf16, #tpu.memory_space<vmem>>, vector<128x128xbf16>
    %cst_9 = arith.constant dense<0.000000e+00> : vector<256x128xf32>
    %9 = tpu.matmul %2, %8, %cst_9 {dimension_numbers = #tpu.dot_dimension_numbers<[1], [0], [0], [1], [0, 0, 1, 1], [], []>} : vector<256x128xbf16>, vector<128x128xbf16>, vector<256x128xf32> -> vector<256x128xf32>
    %c0_10 = arith.constant 0 : index
    %c0_11 = arith.constant 0 : index
    %10 = vector.load %arg11[%c0_10, %c0_11] : memref<1x128xf32, #tpu.memory_space<vmem>>, vector<1x128xf32>
    %11 = vector.broadcast %10 : vector<1x128xf32> to vector<256x128xf32>
    %12 = arith.addf %9, %11 : vector<256x128xf32>
    %c0_12 = arith.constant 0 : index
    %c0_13 = arith.constant 0 : index
    %13 = vector.load %arg4[%c0_12, %c0_13] : memref<1x128xf32, #tpu.memory_space<vmem>>, vector<1x128xf32>
    %c0_14 = arith.constant 0 : index
    %c0_15 = arith.constant 0 : index
    %14 = vector.load %arg5[%c0_14, %c0_15] : memref<1x128xf32, #tpu.memory_space<vmem>>, vector<1x128xf32>
    %cst_16 = arith.constant dense<0.000000e+00> : vector<128xf32>
    %15 = vector.multi_reduction <add>, %7, %cst_16 [0] : vector<256x128xf32> to vector<128xf32>
    %16 = vector.shape_cast %15 : vector<128xf32> to vector<1x128xf32>
    %17 = arith.mulf %7, %7 : vector<256x128xf32>
    %cst_17 = arith.constant dense<0.000000e+00> : vector<128xf32>
    %18 = vector.multi_reduction <add>, %17, %cst_17 [0] : vector<256x128xf32> to vector<128xf32>
    %19 = vector.shape_cast %18 : vector<128xf32> to vector<1x128xf32>
    %20 = tpu.concatenate %16, %19 in 0 : vector<1x128xf32>, vector<1x128xf32> -> vector<2x128xf32>
    %c0_18 = arith.constant 0 : index
    %c0_19 = arith.constant 0 : index
    %21 = vector.load %arg12[%c0_18, %c0_19] : memref<128x128xf32, #tpu.memory_space<vmem>>, vector<128x128xf32>
    %cst_20 = arith.constant dense<0.000000e+00> : vector<2x128xf32>
    %22 = tpu.matmul %20, %21, %cst_20 {dimension_numbers = #tpu.dot_dimension_numbers<[1], [0], [0], [1], [0, 0, 1, 1], [], []>} : vector<2x128xf32>, vector<128x128xf32>, vector<2x128xf32> -> vector<2x128xf32>
    %23 = vector.extract_strided_slice %22 {offsets = [0, 0], sizes = [1, 128], strides = [1, 1]} : vector<2x128xf32> to vector<1x128xf32>
    %24 = vector.extract_strided_slice %22 {offsets = [1, 0], sizes = [1, 128], strides = [1, 1]} : vector<2x128xf32> to vector<1x128xf32>
    %25 = arith.mulf %23, %23 : vector<1x128xf32>
    %26 = arith.subf %24, %25 : vector<1x128xf32>
    %cst_21 = arith.constant 0.000000e+00 : f32
    %27 = vector.broadcast %cst_21 : f32 to vector<1x128xf32>
    %28 = arith.maximumf %26, %27 : vector<1x128xf32>
    %cst_22 = arith.constant 9.99999974E-6 : f32
    %29 = vector.broadcast %cst_22 : f32 to vector<1x128xf32>
    %30 = arith.addf %28, %29 : vector<1x128xf32>
    %31 = math.rsqrt %30 : vector<1x128xf32>
    %32 = vector.broadcast %23 : vector<1x128xf32> to vector<256x128xf32>
    %33 = arith.subf %7, %32 : vector<256x128xf32>
    %34 = arith.mulf %31, %13 : vector<1x128xf32>
    %35 = vector.broadcast %34 : vector<1x128xf32> to vector<256x128xf32>
    %36 = arith.mulf %33, %35 : vector<256x128xf32>
    %37 = vector.broadcast %14 : vector<1x128xf32> to vector<256x128xf32>
    %38 = arith.addf %36, %37 : vector<256x128xf32>
    %cst_23 = arith.constant 0.000000e+00 : f32
    %39 = vector.broadcast %cst_23 : f32 to vector<256x128xf32>
    %40 = arith.subf %39, %38 : vector<256x128xf32>
    %41 = math.exp %40 : vector<256x128xf32>
    %cst_24 = arith.constant 1.000000e+00 : f32
    %42 = vector.broadcast %cst_24 : f32 to vector<256x128xf32>
    %43 = arith.addf %42, %41 : vector<256x128xf32>
    %cst_25 = arith.constant 1.000000e+00 : f32
    %44 = vector.broadcast %cst_25 : f32 to vector<256x128xf32>
    %45 = arith.divf %44, %43 : vector<256x128xf32>
    %46 = arith.mulf %38, %45 : vector<256x128xf32>
    %cst_26 = arith.constant 0.000000e+00 : bf16
    %47 = vector.broadcast %cst_26 : bf16 to vector<1x18x128xbf16>
    %cst_27 = arith.constant 0.000000e+00 : bf16
    %48 = vector.broadcast %cst_27 : bf16 to vector<18x1x128xbf16>
    %c0_28 = arith.constant 0 : index
    %c0_29 = arith.constant 0 : index
    %c0_30 = arith.constant 0 : index
    %49 = vector.load %arg14[%c0_28, %c0_29, %c0_30] : memref<18x18x128xbf16, #tpu.memory_space<vmem>>, vector<1x18x128xbf16>
    tpu.vector_store %arg14[%c0_28, %c0_29, %c0_30], %47 {strides = array<i32>} : memref<18x18x128xbf16, #tpu.memory_space<vmem>>, vector<1x18x128xbf16>,
    %c17 = arith.constant 17 : index
    %c0_31 = arith.constant 0 : index
    %c0_32 = arith.constant 0 : index
    %50 = vector.load %arg14[%c17, %c0_31, %c0_32] : memref<18x18x128xbf16, #tpu.memory_space<vmem>>, vector<1x18x128xbf16>
    tpu.vector_store %arg14[%c17, %c0_31, %c0_32], %47 {strides = array<i32>} : memref<18x18x128xbf16, #tpu.memory_space<vmem>>, vector<1x18x128xbf16>,
    %c0_33 = arith.constant 0 : index
    %c0_34 = arith.constant 0 : index
    %c0_35 = arith.constant 0 : index
    %51 = vector.load %arg14[%c0_33, %c0_34, %c0_35] : memref<18x18x128xbf16, #tpu.memory_space<vmem>>, vector<18x1x128xbf16>
    tpu.vector_store %arg14[%c0_33, %c0_34, %c0_35], %48 {strides = array<i32>} : memref<18x18x128xbf16, #tpu.memory_space<vmem>>, vector<18x1x128xbf16>,
    %c0_36 = arith.constant 0 : index
    %c17_37 = arith.constant 17 : index
    %c0_38 = arith.constant 0 : index
    %52 = vector.load %arg14[%c0_36, %c17_37, %c0_38] : memref<18x18x128xbf16, #tpu.memory_space<vmem>>, vector<18x1x128xbf16>
    tpu.vector_store %arg14[%c0_36, %c17_37, %c0_38], %48 {strides = array<i32>} : memref<18x18x128xbf16, #tpu.memory_space<vmem>>, vector<18x1x128xbf16>,
    %53 = vector.shape_cast %46 : vector<256x128xf32> to vector<16x16x128xf32>
    %54 = arith.truncf %53 : vector<16x16x128xf32> to vector<16x16x128xbf16>
    %c1 = arith.constant 1 : index
    %c1_39 = arith.constant 1 : index
    %c0_40 = arith.constant 0 : index
    %55 = vector.load %arg14[%c1, %c1_39, %c0_40] : memref<18x18x128xbf16, #tpu.memory_space<vmem>>, vector<16x16x128xbf16>
    tpu.vector_store %arg14[%c1, %c1_39, %c0_40], %54 {strides = array<i32>} : memref<18x18x128xbf16, #tpu.memory_space<vmem>>, vector<16x16x128xbf16>,
    %c0_41 = arith.constant 0 : index
    %c0_42 = arith.constant 0 : index
    %56 = vector.load %arg7[%c0_41, %c0_42] : memref<1x128xf32, #tpu.memory_space<vmem>>, vector<1x128xf32>
    %cst_43 = arith.constant 0.000000e+00 : f32
    %57 = vector.broadcast %cst_43 : f32 to vector<256x128xf32>
    %c0_44 = arith.constant 0 : index
    %c0_45 = arith.constant 0 : index
    %c0_46 = arith.constant 0 : index
    %58 = vector.load %arg14[%c0_44, %c0_45, %c0_46] : memref<18x18x128xbf16, #tpu.memory_space<vmem>>, vector<16x16x128xbf16>
    %59 = vector.shape_cast %58 : vector<16x16x128xbf16> to vector<256x128xbf16>
    %c0_47 = arith.constant 0 : index
    %c0_48 = arith.constant 0 : index
    %c0_49 = arith.constant 0 : index
    %60 = vector.load %arg6[%c0_47, %c0_48, %c0_49] : memref<9x128x128xbf16, #tpu.memory_space<vmem>>, vector<1x128x128xbf16>
    %61 = vector.shape_cast %60 : vector<1x128x128xbf16> to vector<128x128xbf16>
    %cst_50 = arith.constant dense<0.000000e+00> : vector<256x128xf32>
    %62 = tpu.matmul %59, %61, %cst_50 {dimension_numbers = #tpu.dot_dimension_numbers<[1], [0], [0], [1], [0, 0, 1, 1], [], []>} : vector<256x128xbf16>, vector<128x128xbf16>, vector<256x128xf32> -> vector<256x128xf32>
    %63 = arith.addf %57, %62 : vector<256x128xf32>
    %c0_51 = arith.constant 0 : index
    %c1_52 = arith.constant 1 : index
    %c0_53 = arith.constant 0 : index
    %64 = vector.load %arg14[%c0_51, %c1_52, %c0_53] : memref<18x18x128xbf16, #tpu.memory_space<vmem>>, vector<16x16x128xbf16>
    %65 = vector.shape_cast %64 : vector<16x16x128xbf16> to vector<256x128xbf16>
    %c1_54 = arith.constant 1 : index
    %c0_55 = arith.constant 0 : index
    %c0_56 = arith.constant 0 : index
    %66 = vector.load %arg6[%c1_54, %c0_55, %c0_56] : memref<9x128x128xbf16, #tpu.memory_space<vmem>>, vector<1x128x128xbf16>
    %67 = vector.shape_cast %66 : vector<1x128x128xbf16> to vector<128x128xbf16>
    %cst_57 = arith.constant dense<0.000000e+00> : vector<256x128xf32>
    %68 = tpu.matmul %65, %67, %cst_57 {dimension_numbers = #tpu.dot_dimension_numbers<[1], [0], [0], [1], [0, 0, 1, 1], [], []>} : vector<256x128xbf16>, vector<128x128xbf16>, vector<256x128xf32> -> vector<256x128xf32>
    %69 = arith.addf %63, %68 : vector<256x128xf32>
    %c0_58 = arith.constant 0 : index
    %c2 = arith.constant 2 : index
    %c0_59 = arith.constant 0 : index
    %70 = vector.load %arg14[%c0_58, %c2, %c0_59] : memref<18x18x128xbf16, #tpu.memory_space<vmem>>, vector<16x16x128xbf16>
    %71 = vector.shape_cast %70 : vector<16x16x128xbf16> to vector<256x128xbf16>
    %c2_60 = arith.constant 2 : index
    %c0_61 = arith.constant 0 : index
    %c0_62 = arith.constant 0 : index
    %72 = vector.load %arg6[%c2_60, %c0_61, %c0_62] : memref<9x128x128xbf16, #tpu.memory_space<vmem>>, vector<1x128x128xbf16>
    %73 = vector.shape_cast %72 : vector<1x128x128xbf16> to vector<128x128xbf16>
    %cst_63 = arith.constant dense<0.000000e+00> : vector<256x128xf32>
    %74 = tpu.matmul %71, %73, %cst_63 {dimension_numbers = #tpu.dot_dimension_numbers<[1], [0], [0], [1], [0, 0, 1, 1], [], []>} : vector<256x128xbf16>, vector<128x128xbf16>, vector<256x128xf32> -> vector<256x128xf32>
    %75 = arith.addf %69, %74 : vector<256x128xf32>
    %c1_64 = arith.constant 1 : index
    %c0_65 = arith.constant 0 : index
    %c0_66 = arith.constant 0 : index
    %76 = vector.load %arg14[%c1_64, %c0_65, %c0_66] : memref<18x18x128xbf16, #tpu.memory_space<vmem>>, vector<16x16x128xbf16>
    %77 = vector.shape_cast %76 : vector<16x16x128xbf16> to vector<256x128xbf16>
    %c3 = arith.constant 3 : index
    %c0_67 = arith.constant 0 : index
    %c0_68 = arith.constant 0 : index
    %78 = vector.load %arg6[%c3, %c0_67, %c0_68] : memref<9x128x128xbf16, #tpu.memory_space<vmem>>, vector<1x128x128xbf16>
    %79 = vector.shape_cast %78 : vector<1x128x128xbf16> to vector<128x128xbf16>
    %cst_69 = arith.constant dense<0.000000e+00> : vector<256x128xf32>
    %80 = tpu.matmul %77, %79, %cst_69 {dimension_numbers = #tpu.dot_dimension_numbers<[1], [0], [0], [1], [0, 0, 1, 1], [], []>} : vector<256x128xbf16>, vector<128x128xbf16>, vector<256x128xf32> -> vector<256x128xf32>
    %81 = arith.addf %75, %80 : vector<256x128xf32>
    %c1_70 = arith.constant 1 : index
    %c1_71 = arith.constant 1 : index
    %c0_72 = arith.constant 0 : index
    %82 = vector.load %arg14[%c1_70, %c1_71, %c0_72] : memref<18x18x128xbf16, #tpu.memory_space<vmem>>, vector<16x16x128xbf16>
    %83 = vector.shape_cast %82 : vector<16x16x128xbf16> to vector<256x128xbf16>
    %c4 = arith.constant 4 : index
    %c0_73 = arith.constant 0 : index
    %c0_74 = arith.constant 0 : index
    %84 = vector.load %arg6[%c4, %c0_73, %c0_74] : memref<9x128x128xbf16, #tpu.memory_space<vmem>>, vector<1x128x128xbf16>
    %85 = vector.shape_cast %84 : vector<1x128x128xbf16> to vector<128x128xbf16>
    %cst_75 = arith.constant dense<0.000000e+00> : vector<256x128xf32>
    %86 = tpu.matmul %83, %85, %cst_75 {dimension_numbers = #tpu.dot_dimension_numbers<[1], [0], [0], [1], [0, 0, 1, 1], [], []>} : vector<256x128xbf16>, vector<128x128xbf16>, vector<256x128xf32> -> vector<256x128xf32>
    %87 = arith.addf %81, %86 : vector<256x128xf32>
    %c1_76 = arith.constant 1 : index
    %c2_77 = arith.constant 2 : index
    %c0_78 = arith.constant 0 : index
    %88 = vector.load %arg14[%c1_76, %c2_77, %c0_78] : memref<18x18x128xbf16, #tpu.memory_space<vmem>>, vector<16x16x128xbf16>
    %89 = vector.shape_cast %88 : vector<16x16x128xbf16> to vector<256x128xbf16>
    %c5 = arith.constant 5 : index
    %c0_79 = arith.constant 0 : index
    %c0_80 = arith.constant 0 : index
    %90 = vector.load %arg6[%c5, %c0_79, %c0_80] : memref<9x128x128xbf16, #tpu.memory_space<vmem>>, vector<1x128x128xbf16>
    %91 = vector.shape_cast %90 : vector<1x128x128xbf16> to vector<128x128xbf16>
    %cst_81 = arith.constant dense<0.000000e+00> : vector<256x128xf32>
    %92 = tpu.matmul %89, %91, %cst_81 {dimension_numbers = #tpu.dot_dimension_numbers<[1], [0], [0], [1], [0, 0, 1, 1], [], []>} : vector<256x128xbf16>, vector<128x128xbf16>, vector<256x128xf32> -> vector<256x128xf32>
    %93 = arith.addf %87, %92 : vector<256x128xf32>
    %c2_82 = arith.constant 2 : index
    %c0_83 = arith.constant 0 : index
    %c0_84 = arith.constant 0 : index
    %94 = vector.load %arg14[%c2_82, %c0_83, %c0_84] : memref<18x18x128xbf16, #tpu.memory_space<vmem>>, vector<16x16x128xbf16>
    %95 = vector.shape_cast %94 : vector<16x16x128xbf16> to vector<256x128xbf16>
    %c6 = arith.constant 6 : index
    %c0_85 = arith.constant 0 : index
    %c0_86 = arith.constant 0 : index
    %96 = vector.load %arg6[%c6, %c0_85, %c0_86] : memref<9x128x128xbf16, #tpu.memory_space<vmem>>, vector<1x128x128xbf16>
    %97 = vector.shape_cast %96 : vector<1x128x128xbf16> to vector<128x128xbf16>
    %cst_87 = arith.constant dense<0.000000e+00> : vector<256x128xf32>
    %98 = tpu.matmul %95, %97, %cst_87 {dimension_numbers = #tpu.dot_dimension_numbers<[1], [0], [0], [1], [0, 0, 1, 1], [], []>} : vector<256x128xbf16>, vector<128x128xbf16>, vector<256x128xf32> -> vector<256x128xf32>
    %99 = arith.addf %93, %98 : vector<256x128xf32>
    %c2_88 = arith.constant 2 : index
    %c1_89 = arith.constant 1 : index
    %c0_90 = arith.constant 0 : index
    %100 = vector.load %arg14[%c2_88, %c1_89, %c0_90] : memref<18x18x128xbf16, #tpu.memory_space<vmem>>, vector<16x16x128xbf16>
    %101 = vector.shape_cast %100 : vector<16x16x128xbf16> to vector<256x128xbf16>
    %c7 = arith.constant 7 : index
    %c0_91 = arith.constant 0 : index
    %c0_92 = arith.constant 0 : index
    %102 = vector.load %arg6[%c7, %c0_91, %c0_92] : memref<9x128x128xbf16, #tpu.memory_space<vmem>>, vector<1x128x128xbf16>
    %103 = vector.shape_cast %102 : vector<1x128x128xbf16> to vector<128x128xbf16>
    %cst_93 = arith.constant dense<0.000000e+00> : vector<256x128xf32>
    %104 = tpu.matmul %101, %103, %cst_93 {dimension_numbers = #tpu.dot_dimension_numbers<[1], [0], [0], [1], [0, 0, 1, 1], [], []>} : vector<256x128xbf16>, vector<128x128xbf16>, vector<256x128xf32> -> vector<256x128xf32>
    %105 = arith.addf %99, %104 : vector<256x128xf32>
    %c2_94 = arith.constant 2 : index
    %c2_95 = arith.constant 2 : index
    %c0_96 = arith.constant 0 : index
    %106 = vector.load %arg14[%c2_94, %c2_95, %c0_96] : memref<18x18x128xbf16, #tpu.memory_space<vmem>>, vector<16x16x128xbf16>
    %107 = vector.shape_cast %106 : vector<16x16x128xbf16> to vector<256x128xbf16>
    %c8 = arith.constant 8 : index
    %c0_97 = arith.constant 0 : index
    %c0_98 = arith.constant 0 : index
    %108 = vector.load %arg6[%c8, %c0_97, %c0_98] : memref<9x128x128xbf16, #tpu.memory_space<vmem>>, vector<1x128x128xbf16>
    %109 = vector.shape_cast %108 : vector<1x128x128xbf16> to vector<128x128xbf16>
    %cst_99 = arith.constant dense<0.000000e+00> : vector<256x128xf32>
    %110 = tpu.matmul %107, %109, %cst_99 {dimension_numbers = #tpu.dot_dimension_numbers<[1], [0], [0], [1], [0, 0, 1, 1], [], []>} : vector<256x128xbf16>, vector<128x128xbf16>, vector<256x128xf32> -> vector<256x128xf32>
    %111 = arith.addf %105, %110 : vector<256x128xf32>
    %112 = vector.broadcast %56 : vector<1x128xf32> to vector<256x128xf32>
    %113 = arith.addf %111, %112 : vector<256x128xf32>
    %c0_100 = arith.constant 0 : index
    %c0_101 = arith.constant 0 : index
    %114 = vector.load %arg8[%c0_100, %c0_101] : memref<1x128xf32, #tpu.memory_space<vmem>>, vector<1x128xf32>
    %c0_102 = arith.constant 0 : index
    %c0_103 = arith.constant 0 : index
    %115 = vector.load %arg9[%c0_102, %c0_103] : memref<1x128xf32, #tpu.memory_space<vmem>>, vector<1x128xf32>
    %cst_104 = arith.constant dense<0.000000e+00> : vector<128xf32>
    %116 = vector.multi_reduction <add>, %113, %cst_104 [0] : vector<256x128xf32> to vector<128xf32>
    %117 = vector.shape_cast %116 : vector<128xf32> to vector<1x128xf32>
    %118 = arith.mulf %113, %113 : vector<256x128xf32>
    %cst_105 = arith.constant dense<0.000000e+00> : vector<128xf32>
    %119 = vector.multi_reduction <add>, %118, %cst_105 [0] : vector<256x128xf32> to vector<128xf32>
    %120 = vector.shape_cast %119 : vector<128xf32> to vector<1x128xf32>
    %121 = tpu.concatenate %117, %120 in 0 : vector<1x128xf32>, vector<1x128xf32> -> vector<2x128xf32>
    %c0_106 = arith.constant 0 : index
    %c0_107 = arith.constant 0 : index
    %122 = vector.load %arg12[%c0_106, %c0_107] : memref<128x128xf32, #tpu.memory_space<vmem>>, vector<128x128xf32>
    %cst_108 = arith.constant dense<0.000000e+00> : vector<2x128xf32>
    %123 = tpu.matmul %121, %122, %cst_108 {dimension_numbers = #tpu.dot_dimension_numbers<[1], [0], [0], [1], [0, 0, 1, 1], [], []>} : vector<2x128xf32>, vector<128x128xf32>, vector<2x128xf32> -> vector<2x128xf32>
    %124 = vector.extract_strided_slice %123 {offsets = [0, 0], sizes = [1, 128], strides = [1, 1]} : vector<2x128xf32> to vector<1x128xf32>
    %125 = vector.extract_strided_slice %123 {offsets = [1, 0], sizes = [1, 128], strides = [1, 1]} : vector<2x128xf32> to vector<1x128xf32>
    %126 = arith.mulf %124, %124 : vector<1x128xf32>
    %127 = arith.subf %125, %126 : vector<1x128xf32>
    %cst_109 = arith.constant 0.000000e+00 : f32
    %128 = vector.broadcast %cst_109 : f32 to vector<1x128xf32>
    %129 = arith.maximumf %127, %128 : vector<1x128xf32>
    %cst_110 = arith.constant 9.99999974E-6 : f32
    %130 = vector.broadcast %cst_110 : f32 to vector<1x128xf32>
    %131 = arith.addf %129, %130 : vector<1x128xf32>
    %132 = math.rsqrt %131 : vector<1x128xf32>
    %133 = vector.broadcast %124 : vector<1x128xf32> to vector<256x128xf32>
    %134 = arith.subf %113, %133 : vector<256x128xf32>
    %135 = arith.mulf %132, %114 : vector<1x128xf32>
    %136 = vector.broadcast %135 : vector<1x128xf32> to vector<256x128xf32>
    %137 = arith.mulf %134, %136 : vector<256x128xf32>
    %138 = vector.broadcast %115 : vector<1x128xf32> to vector<256x128xf32>
    %139 = arith.addf %137, %138 : vector<256x128xf32>
    %140 = arith.addf %139, %12 : vector<256x128xf32>
    %141 = vector.shape_cast %140 : vector<256x128xf32> to vector<16x16x128xf32>
    %142 = arith.truncf %141 : vector<16x16x128xf32> to vector<16x16x128xbf16>
    %c0_111 = arith.constant 0 : index
    %c0_112 = arith.constant 0 : index
    %c0_113 = arith.constant 0 : index
    %c0_114 = arith.constant 0 : index
    %143 = vector.load %arg13[%c0_111, %c0_112, %c0_113, %c0_114] : memref<1x16x16x128xbf16, #tpu.memory_space<vmem>>, vector<1x16x16x128xbf16>
    %144 = vector.shape_cast %143 : vector<1x16x16x128xbf16> to vector<16x16x128xbf16>
    %145 = vector.shape_cast %142 : vector<16x16x128xbf16> to vector<1x16x16x128xbf16>
    tpu.vector_store %arg13[%c0_111, %c0_112, %c0_113, %c0_114], %145 {strides = array<i32>} : memref<1x16x16x128xbf16, #tpu.memory_space<vmem>>, vector<1x16x16x128xbf16>,
    return
  }
  func.func @transform_0(%arg0: i32) -> (i32, i32, i32, i32) {
    %c0_i32 = arith.constant 0 : i32
    %c0_i32_0 = arith.constant 0 : i32
    %c0_i32_1 = arith.constant 0 : i32
    %c0_i32_2 = arith.constant 0 : i32
    return %arg0, %c0_i32, %c0_i32_0, %c0_i32_1 : i32, i32, i32, i32
  }
  func.func @transform_1(%arg0: i32) -> (i32, i32) {
    %c0_i32 = arith.constant 0 : i32
    %c0_i32_0 = arith.constant 0 : i32
    %c0_i32_1 = arith.constant 0 : i32
    return %c0_i32, %c0_i32_0 : i32, i32
  }
  func.func @transform_2(%arg0: i32) -> (i32, i32) {
    %c0_i32 = arith.constant 0 : i32
    %c0_i32_0 = arith.constant 0 : i32
    %c0_i32_1 = arith.constant 0 : i32
    return %c0_i32, %c0_i32_0 : i32, i32
  }
  func.func @transform_3(%arg0: i32) -> (i32, i32) {
    %c0_i32 = arith.constant 0 : i32
    %c0_i32_0 = arith.constant 0 : i32
    %c0_i32_1 = arith.constant 0 : i32
    return %c0_i32, %c0_i32_0 : i32, i32
  }
  func.func @transform_4(%arg0: i32) -> (i32, i32) {
    %c0_i32 = arith.constant 0 : i32
    %c0_i32_0 = arith.constant 0 : i32
    %c0_i32_1 = arith.constant 0 : i32
    return %c0_i32, %c0_i32_0 : i32, i32
  }
  func.func @transform_5(%arg0: i32) -> (i32, i32, i32) {
    %c0_i32 = arith.constant 0 : i32
    %c0_i32_0 = arith.constant 0 : i32
    %c0_i32_1 = arith.constant 0 : i32
    %c0_i32_2 = arith.constant 0 : i32
    return %c0_i32, %c0_i32_0, %c0_i32_1 : i32, i32, i32
  }
  func.func @transform_6(%arg0: i32) -> (i32, i32) {
    %c0_i32 = arith.constant 0 : i32
    %c0_i32_0 = arith.constant 0 : i32
    %c0_i32_1 = arith.constant 0 : i32
    return %c0_i32, %c0_i32_0 : i32, i32
  }
  func.func @transform_7(%arg0: i32) -> (i32, i32) {
    %c0_i32 = arith.constant 0 : i32
    %c0_i32_0 = arith.constant 0 : i32
    %c0_i32_1 = arith.constant 0 : i32
    return %c0_i32, %c0_i32_0 : i32, i32
  }
  func.func @transform_8(%arg0: i32) -> (i32, i32) {
    %c0_i32 = arith.constant 0 : i32
    %c0_i32_0 = arith.constant 0 : i32
    %c0_i32_1 = arith.constant 0 : i32
    return %c0_i32, %c0_i32_0 : i32, i32
  }
  func.func @transform_9(%arg0: i32) -> (i32, i32) {
    %c0_i32 = arith.constant 0 : i32
    %c0_i32_0 = arith.constant 0 : i32
    %c0_i32_1 = arith.constant 0 : i32
    return %c0_i32, %c0_i32_0 : i32, i32
  }
  func.func @transform_10(%arg0: i32) -> (i32, i32) {
    %c0_i32 = arith.constant 0 : i32
    %c0_i32_0 = arith.constant 0 : i32
    %c0_i32_1 = arith.constant 0 : i32
    return %c0_i32, %c0_i32_0 : i32, i32
  }
  func.func @transform_11(%arg0: i32) -> (i32, i32) {
    %c0_i32 = arith.constant 0 : i32
    %c0_i32_0 = arith.constant 0 : i32
    %c0_i32_1 = arith.constant 0 : i32
    return %c0_i32, %c0_i32_0 : i32, i32
  }
  func.func @transform_12(%arg0: i32) -> (i32, i32, i32, i32) {
    %c0_i32 = arith.constant 0 : i32
    %c0_i32_0 = arith.constant 0 : i32
    %c0_i32_1 = arith.constant 0 : i32
    %c0_i32_2 = arith.constant 0 : i32
    return %arg0, %c0_i32, %c0_i32_0, %c0_i32_1 : i32, i32, i32, i32
  }
}

</mosaic_0001>

<bundles_post_ra>
// kernel: unet_block_forward.1
= control target key start
LH: loop header
LB: loop body
LE: loop exit
PB: predicated region body
PF: predicated region fallthrough
CT: control target
= control target key end

     0   :  { %s9904_s21 = smov 0   ;;  %s13219_s0 = inlined_call_operand.vmem [shape: bf16[2,16,16,128], index: 0, kind: input, shape index: {}]   ;;  %s13220_s1 = inlined_call_operand.vmem [shape: bf16[128,128], index: 1, kind: input, shape index: {}]   ;;  %s13221_s2 = inlined_call_operand.vmem [shape: f32[1,128], index: 2, kind: input, shape index: {}]   ;;  %s13222_s3 = inlined_call_operand.vmem [shape: f32[1,128], index: 3, kind: input, shape index: {}]   ;;  %s13223_s4 = inlined_call_operand.vmem [shape: f32[1,128], index: 4, kind: input, shape index: {}]   ;;  %s13224_s5 = inlined_call_operand.vmem [shape: bf16[9,128,128], index: 5, kind: input, shape index: {}]   ;;  %s13225_s6 = inlined_call_operand.vmem [shape: f32[1,128], index: 6, kind: input, shape index: {}]   ;;  %s13226_s7 = inlined_call_operand.vmem [shape: f32[1,128], index: 7, kind: input, shape index: {}]   ;;  %s13227_s8 = inlined_call_operand.vmem [shape: f32[1,128], index: 8, kind: input, shape index: {}]   ;;  %s13228_s9 = inlined_call_operand.vmem [shape: bf16[128,128], index: 9, kind: input, shape index: {}]   ;;  %s13229_s10 = inlined_call_operand.vmem [shape: f32[1,128], index: 10, kind: input, shape index: {}]   ;;  %s13230_s11 = inlined_call_operand.vmem [shape: f32[128,128], index: 11, kind: input, shape index: {}]   ;;  %s13231_s12 = inlined_call_operand.vmem [shape: bf16[2,16,16,128], index: 12, kind: output, shape index: {}]  }
   0x1 LB: > { %s7619_s22 = sadd.s32 4294967295, %s9833_s21   ;;  %p7623_p0 = scmp.ge.s32.totalorder %s9833_s21, 1  ;;  %s9833_s21 = sphi %s9904_s21, %s22_s21  }
   0x2   : > { %p362_p1 = scmp.lt.s32.totalorder %s9833_s21, 3 }
   0x4   : > { %p363_p2 = pnand %p7623_p0, %p362_p1 }
   0x6   : > { %366 = sbr.rel (%p363_p2) target bundleno = 1653 (0x675), region = 68 }
   0xd   : > { %v9498_v0 = vld [vmem:[%s13220_s1] sm:$0xff]   ;;  %p404_p3 = scmp.lt.s32.totalorder %s7619_s22, 1  ;;  %v9499_v1 = vld [vmem:[%s13220_s1 + $0x8] sm:$0xff]   ;;  %v9500_v2 = vld [vmem:[%s13220_s1 + $0x10] sm:$0xff]   ;;  %v13233_v32 = vmov 0.0|0.0   ;;  %vm9836_vm0 = vmmov 0  }
   0xe   : > { %8584 = vmatprep.subr.bf16.mxu0 %v9498_v0  ;;  %v9501_v3 = vld [vmem:[%s13220_s1 + $0x18] sm:$0xff]   ;;  %v9502_v5 = vld [vmem:[%s13220_s1 + $0x20] sm:$0xff]   ;;  %v9503_v6 = vld [vmem:[%s13220_s1 + $0x28] sm:$0xff]   ;;  %v13232_v56 = vmov 0.0   ;;  %vm1115_vm1 = vcmask 1040384   ;;  %vm2091_vm11 = vcmask 1043456  }
   0xf   : > { %s13547_s22 = smov (!%p404_p3, %s7619_s22), 1  ;;  %8585 = vmatpush3.bf16.msra.mxu0 %v9498_v0  ;;  %v9504_v7 = vld [vmem:[%s13220_s1 + $0x30] sm:$0xff]   ;;  %v9505_v8 = vld [vmem:[%s13220_s1 + $0x38] sm:$0xff]   ;;  %v9522_v10 = vld [vmem:[%s13228_s9] sm:$0xff]   ;;  %vm1560_vm2 = vsmask.f32 256 }
  0x10   : > { %8586 = vmatprep.subr.bf16.mxu0 %v9499_v1  ;;  %s8125_s29 = sshll.u32 %s13547_s22, 7  ;;  %v9523_v12 = vld [vmem:[%s13228_s9 + $0x8] sm:$0xff]   ;;  %v9524_v13 = vld [vmem:[%s13228_s9 + $0x10] sm:$0xff]   ;;  %v9525_v16 = vld [vmem:[%s13228_s9 + $0x18] sm:$0xff]   ;;  %vm1616_vm3 = vsmask.f32 7938 }
  0x11   : > { %s9929_s14 = scalar_lea.vmem %s13219_s0, %s8125_s29  ;;  %v9526_v17 = vld [vmem:[%s13228_s9 + $0x20] sm:$0xff]   ;;  %v9527_v20 = vld [vmem:[%s13228_s9 + $0x28] sm:$0xff]   ;;  %v9528_v30 = vld [vmem:[%s13228_s9 + $0x30] sm:$0xff]   ;;  %vm2270_vm6 = vsmask.f32 3328  ;;  %vm3300_vm13 = vcmask 1042432   ;;  %s13194_s15 = scalar_lea.vmem %s13231_s12, %s8125_s29 }
  0x12   : > { %v9935_v4 = vld [vmem:[%s9929_s14] sm:$0xff]   ;;  %v9507_v9 = vld [vmem:[%s9929_s14 + $0x8] sm:$0xff]   ;;  %v9508_v11 = vld [vmem:[%s9929_s14 + $0x10] sm:$0xff]   ;;  %vm2271_vm7 = vsmask.f32 7440  ;;  %vm3301_vm14 = vcmask 1046532  }
  0x13   : > { %8587 = vmatpush3.bf16.msra.mxu0 %v9499_v1  ;;  %8600 = vmatprep.mubr.bf16.mxu0 %v9935_v4  ;;  %v9509_v14 = vld [vmem:[%s9929_s14 + $0x18] sm:$0xff]   ;;  %v9510_v15 = vld [vmem:[%s9929_s14 + $0x20] sm:$0xff]   ;;  %v9511_v18 = vld [vmem:[%s9929_s14 + $0x28] sm:$0xff]   ;;  %vm1768_vm9 = vsmask.f32 4368 }
  0x14   : > { %8588 = vmatprep.subr.bf16.mxu0 %v9500_v2  ;;  %v9512_v19 = vld [vmem:[%s9929_s14 + $0x30] sm:$0xff]   ;;  %v9513_v21 = vld [vmem:[%s9929_s14 + $0x38] sm:$0xff]   ;;  %v9514_v22 = vld [vmem:[%s9929_s14 + $0x40] sm:$0xff]  }
  0x15   : > { %v9515_v23 = vld [vmem:[%s9929_s14 + $0x48] sm:$0xff]   ;;  %v9516_v24 = vld [vmem:[%s9929_s14 + $0x50] sm:$0xff]   ;;  %v9517_v25 = vld [vmem:[%s9929_s14 + $0x58] sm:$0xff]  }
  0x16   : > { %v9518_v26 = vld [vmem:[%s9929_s14 + $0x60] sm:$0xff]   ;;  %v9519_v27 = vld [vmem:[%s9929_s14 + $0x68] sm:$0xff]   ;;  %v9520_v28 = vld [vmem:[%s9929_s14 + $0x70] sm:$0xff]  }
  0x17   : > { %8589 = vmatpush3.bf16.msra.mxu0 %v9500_v2  ;;  %v9521_v29 = vld [vmem:[%s9929_s14 + $0x78] sm:$0xff]   ;;  %v1117_v33 = vld [vmem:[%s13230_s11] sm:$0xff]  ;;  %v1118_v34 = vld [vmem:[%s13230_s11 + $0x8] sm:$0xff] }
  0x18   : > { %8590 = vmatprep.subr.bf16.mxu0 %v9501_v3  ;;  %v9529_v31 = vld [vmem:[%s13228_s9 + $0x38] sm:$0xff]   ;;  %v9183_v35 = vpack.c.bf16 %v1118_v34, %v1117_v33  ;;  %v1119_v36 = vld [vmem:[%s13230_s11 + $0x10] sm:$0xff]  ;;  %v1121_v39 = vld [vmem:[%s13230_s11 + $0x20] sm:$0xff] }
  0x19   : > { %v1120_v37 = vld [vmem:[%s13230_s11 + $0x18] sm:$0xff]  ;;  %v1122_v40 = vld [vmem:[%s13230_s11 + $0x28] sm:$0xff]  ;;  %v1123_v42 = vld [vmem:[%s13230_s11 + $0x30] sm:$0xff] }
  0x1a   : > { %v9186_v38 = vpack.c.bf16 %v1120_v37, %v1119_v36  ;;  %v9189_v41 = vpack.c.bf16 %v1122_v40, %v1121_v39  ;;  %v1124_v43 = vld [vmem:[%s13230_s11 + $0x38] sm:$0xff]  ;;  %v1125_v45 = vld [vmem:[%s13230_s11 + $0x40] sm:$0xff]  ;;  %v1126_v46 = vld [vmem:[%s13230_s11 + $0x48] sm:$0xff] }
  0x1b   : > { %8591 = vmatpush3.bf16.msra.mxu0 %v9501_v3  ;;  %v9192_v44 = vpack.c.bf16 %v1124_v43, %v1123_v42  ;;  %v9195_v47 = vpack.c.bf16 %v1126_v46, %v1125_v45  ;;  %v1127_v48 = vld [vmem:[%s13230_s11 + $0x50] sm:$0xff]  ;;  %v1128_v49 = vld [vmem:[%s13230_s11 + $0x58] sm:$0xff]  ;;  %v1129_v51 = vld [vmem:[%s13230_s11 + $0x60] sm:$0xff] }
  0x1c   : > { %8592 = vmatprep.subr.bf16.mxu0 %v9502_v5  ;;  %v9198_v50 = vpack.c.bf16 %v1128_v49, %v1127_v48  ;;  %v1130_v52 = vld [vmem:[%s13230_s11 + $0x68] sm:$0xff]  ;;  %v1131_v54 = vld [vmem:[%s13230_s11 + $0x70] sm:$0xff]  ;;  %v1132_v55 = vld [vmem:[%s13230_s11 + $0x78] sm:$0xff] }
  0x1d   : > { %v9201_v53 = vpack.c.bf16 %v1130_v52, %v1129_v51  ;;  %v9204_v57 = vpack.c.bf16 %v1132_v55, %v1131_v54  ;;  %v10051_v58 = vld [vmem:[%s13221_s2] ss:$0 sm:$0xff]  ;;  %vm10598_vm4 = vmand %vm1115_vm1, %vm1560_vm2 }
  0x1e   : > { %vm10608_vm5 = vmand %vm1115_vm1, %vm1616_vm3 }
  0x1f   : > { %8593 = vmatpush3.bf16.msra.mxu0 %v9502_v5  ;;  %vm10745_vm8 = vmor %vm2270_vm6, %vm2271_vm7 }
  0x20   : > { %8594 = vmatprep.subr.bf16.mxu0 %v9503_v6  ;;  %vm10848_vm10 = vmor %vm1560_vm2, %vm1768_vm9 }
  0x21   : > { %vm11089_vm12 = vmand %vm2091_vm11, %vm1616_vm3 }
  0x22   : > { %vm11696_vm15 = vmor %vm3300_vm13, %vm3301_vm14 }
  0x23   : > { %8595 = vmatpush3.bf16.msra.mxu0 %v9503_v6 }
  0x24   : > { %8596 = vmatprep.subr.bf16.mxu0 %v9504_v7 }
  0x27   : > { %8597 = vmatpush3.bf16.msra.mxu0 %v9504_v7 }
  0x28   : > { %8598 = vmatprep.subr.bf16.mxu0 %v9505_v8 }
  0x2b   : > { %8599 = vmatpush3.bf16.msra.mxu0 %v9505_v8 }
  0x2c   : > { %8632 = vmatprep.subr.bf16.mxu0 %v9522_v10 }
  0x2e   : > { %8601 = vmatmul.mubr.bf16.vlgmr.msra.gmra.mrb[0].mxu0 %v9507_v9 }
  0x2f   : > { %8604 = vmatprep.mubr.bf16.mxu0 %v9508_v11  ;;  %8633 = vmatpush3.bf16.msra.mxu0 %v9522_v10 }
  0x30   : > { %8634 = vmatprep.subr.bf16.mxu0 %v9523_v12 }
  0x33   : > { %8635 = vmatpush3.bf16.msra.mxu0 %v9523_v12 }
  0x34   : > { %8636 = vmatprep.subr.bf16.mxu0 %v9524_v13 }
  0x36   : > { %8605 = vmatmul.mubr.bf16.gmra.mrb[4].mxu0 %v9509_v14 }
  0x37   : > { %8608 = vmatprep.mubr.bf16.mxu0 %v9510_v15  ;;  %8637 = vmatpush3.bf16.msra.mxu0 %v9524_v13 }
  0x38   : > { %8638 = vmatprep.subr.bf16.mxu0 %v9525_v16 }
  0x3b   : > { %8639 = vmatpush3.bf16.msra.mxu0 %v9525_v16 }
  0x3c   : > { %8640 = vmatprep.subr.bf16.mxu0 %v9526_v17 }
  0x3e   : > { %8609 = vmatmul.mubr.bf16.gmra.mrb[8].mxu0 %v9511_v18 }
  0x3f   : > { %8612 = vmatprep.mubr.bf16.mxu0 %v9512_v19  ;;  %8641 = vmatpush3.bf16.msra.mxu0 %v9526_v17 }
  0x40   : > { %8642 = vmatprep.subr.bf16.mxu0 %v9527_v20 }
  0x43   : > { %8643 = vmatpush3.bf16.msra.mxu0 %v9527_v20 }
  0x44   : > { %8644 = vmatprep.subr.bf16.mxu0 %v9528_v30 }
  0x46   : > { %8613 = vmatmul.mubr.bf16.gmra.mrb[12].mxu0 %v9513_v21 }
  0x47   : > { %8616 = vmatprep.mubr.bf16.mxu0 %v9514_v22  ;;  %8645 = vmatpush3.bf16.msra.mxu0 %v9528_v30 }
  0x48   : > { %8646 = vmatprep.subr.bf16.mxu0 %v9529_v31 }
  0x4b   : > { %8647 = vmatpush3.bf16.msra.mxu0 %v9529_v31 }
  0x4c   : > { %9182 = vmatprep.subr.bf16.mxu0 %v13233_v32 }
  0x4e   : > { %8617 = vmatmul.mubr.bf16.gmra.mrb[16].mxu0 %v9515_v23 }
  0x4f   : > { %8620 = vmatprep.mubr.bf16.mxu0 %v9516_v24 }
  0x56   : > { %8621 = vmatmul.mubr.bf16.gmra.mrb[20].mxu0 %v9517_v25 }
  0x57   : > { %8624 = vmatprep.mubr.bf16.mxu0 %v9518_v26 }
  0x5e   : > { %8625 = vmatmul.mubr.bf16.gmra.mrb[24].mxu0 %v9519_v27 }
  0x5f   : > { %8628 = vmatprep.mubr.bf16.mxu0 %v9520_v28 }
  0x66   : > { %8629 = vmatmul.mubr.bf16.gmra.mrb[28].mxu0 %v9521_v29 }
  0x67   : > { %8648 = vmatprep.mubr.bf16.mxu0 %v9935_v4 }
  0x6e   : > { %8649 = vmatmul.mubr.bf16.vlgmr.msra.gmra.mrb[32].mxu0 %v9507_v9 }
  0x6f   : > { %8652 = vmatprep.mubr.bf16.mxu0 %v9508_v11  ;;  %9184 = vmatpush3.bf16.msra.mxu0 %v9183_v35 }
  0x70   : > { %9185 = vmatprep.subr.bf16.mxu0 %v13233_v32 }
  0x73   : > { %9187 = vmatpush3.bf16.msra.mxu0 %v9186_v38 }
  0x74   : > { %9188 = vmatprep.subr.bf16.mxu0 %v13233_v32 }
  0x76   : > { %8653 = vmatmul.mubr.bf16.gmra.mrb[36].mxu0 %v9509_v14 }
  0x77   : > { %8656 = vmatprep.mubr.bf16.mxu0 %v9510_v15  ;;  %9190 = vmatpush3.bf16.msra.mxu0 %v9189_v41 }
  0x78   : > { %9191 = vmatprep.subr.bf16.mxu0 %v13233_v32 }
  0x7b   : > { %9193 = vmatpush3.bf16.msra.mxu0 %v9192_v44 }
  0x7c   : > { %9194 = vmatprep.subr.bf16.mxu0 %v13233_v32 }
  0x7e   : > { %8657 = vmatmul.mubr.bf16.gmra.mrb[40].mxu0 %v9511_v18 }
  0x7f   : > { %8660 = vmatprep.mubr.bf16.mxu0 %v9512_v19  ;;  %9196 = vmatpush3.bf16.msra.mxu0 %v9195_v47 }
  0x80   : > { %9197 = vmatprep.subr.bf16.mxu0 %v13233_v32 }
  0x83   : > { %9199 = vmatpush3.bf16.msra.mxu0 %v9198_v50 }
  0x84   : > { %9200 = vmatprep.subr.bf16.mxu0 %v13233_v32 }
  0x86   : > { %8661 = vmatmul.mubr.bf16.gmra.mrb[44].mxu0 %v9513_v21 }
  0x87   : > { %8664 = vmatprep.mubr.bf16.mxu0 %v9514_v22  ;;  %9202 = vmatpush3.bf16.msra.mxu0 %v9201_v53 }
  0x88   : > { %9203 = vmatprep.subr.bf16.mxu0 %v13233_v32 }
  0x8b   : > { %9205 = vmatpush3.bf16.msra.mxu0 %v9204_v57 }
  0x8e   : > { %8665 = vmatmul.mubr.bf16.gmra.mrb[48].mxu0 %v9515_v23 }
  0x8f   : > { %8668 = vmatprep.mubr.bf16.mxu0 %v9516_v24 }
  0x96   : > { %8669 = vmatmul.mubr.bf16.gmra.mrb[52].mxu0 %v9517_v25 }
  0x97   : > { %8672 = vmatprep.mubr.bf16.mxu0 %v9518_v26 }
  0x9e   : > { %8673 = vmatmul.mubr.bf16.gmra.mrb[56].mxu0 %v9519_v27 }
  0x9f   : > { %8676 = vmatprep.mubr.bf16.mxu0 %v9520_v28 }
  0xa6   : > { %8677 = vmatmul.mubr.bf16.gmra.mrb[60].mxu0 %v9521_v29 }
  0xa7   : > { %8712 = vmatprep.mubr.msk.f32.mxu0 %vm9836_vm0, %v13232_v56 }
 0x101   : > { %v8602_v59 = vpop.f32.mrb[0].mxu0 }
 0x102   : > { %v648_v60 = vpop.f32.mrb[1].mxu0  ;;  %v10057_v0 = vadd.f32 %v8602_v59, %v10051_v58 }
 0x103   : > { %v10054_v61 = vadd.f32 %v10051_v58, %v648_v60  ;;  %v8603_v62 = vpop.f32.mrb[2].mxu0 }
 0x104   : > { %v651_v63 = vpop.f32.mrb[3].mxu0  ;;  %v10065_v3 = vadd.f32 %v8603_v62, %v10051_v58  ;;  %v1048_v6 = vmul.f32 %v10057_v0, %v10057_v0 }
 0x105   : > { %v10060_v1 = vadd.f32 %v10051_v58, %v651_v63  ;;  %v1046_v2 = vmul.f32 %v10054_v61, %v10054_v61 }
 0x106   : > { %v1049_v11 = vmul.f32 %v10065_v3, %v10065_v3 }
 0x107   : > { %v1009_v4 = vadd.f32 %v10060_v1, %v10054_v61  ;;  %v1047_v5 = vmul.f32 %v10060_v1, %v10060_v1 }
 0x109   : > { %v1010_v7 = vadd.f32 %v1009_v4, %v10057_v0  ;;  %v1078_v8 = vadd.f32 %v1047_v5, %v1046_v2  ;;  %v8606_v9 = vpop.f32.mrb[4].mxu0 }
 0x10a   : > { %v664_v10 = vpop.f32.mrb[5].mxu0  ;;  %v10081_v16 = vadd.f32 %v8606_v9, %v10051_v58 }
 0x10b   : > { %v1079_v12 = vadd.f32 %v1078_v8, %v1048_v6  ;;  %v10077_v13 = vadd.f32 %v10051_v58, %v664_v10  ;;  %v1011_v14 = vadd.f32 %v1010_v7, %v10065_v3  ;;  %v8607_v15 = vpop.f32.mrb[6].mxu0 }
 0x10c   : > { %v667_v17 = vpop.f32.mrb[7].mxu0  ;;  %v10090_v23 = vadd.f32 %v8607_v15, %v10051_v58  ;;  %v1052_v26 = vmul.f32 %v10081_v16, %v10081_v16 }
 0x10d   : > { %v1012_v18 = vadd.f32 %v1011_v14, %v10077_v13  ;;  %v1050_v19 = vmul.f32 %v10077_v13, %v10077_v13  ;;  %v1080_v20 = vadd.f32 %v1079_v12, %v1049_v11  ;;  %v10087_v21 = vadd.f32 %v10051_v58, %v667_v17 }
 0x10e   : > { %v1053_v31 = vmul.f32 %v10090_v23, %v10090_v23 }
 0x10f   : > { %v1081_v22 = vadd.f32 %v1080_v20, %v1050_v19  ;;  %v1013_v24 = vadd.f32 %v1012_v18, %v10087_v21  ;;  %v1051_v25 = vmul.f32 %v10087_v21, %v10087_v21 }
 0x111   : > { %v1014_v27 = vadd.f32 %v1013_v24, %v10081_v16  ;;  %v1082_v28 = vadd.f32 %v1081_v22, %v1051_v25  ;;  %v8610_v29 = vpop.f32.mrb[8].mxu0 }
 0x112   : > { %v680_v30 = vpop.f32.mrb[9].mxu0  ;;  %v10105_v37 = vadd.f32 %v8610_v29, %v10051_v58 }
 0x113   : > { %v1083_v33 = vadd.f32 %v1082_v28, %v1052_v26  ;;  %v10101_v34 = vadd.f32 %v10051_v58, %v680_v30  ;;  %v1015_v35 = vadd.f32 %v1014_v27, %v10090_v23  ;;  %v8611_v36 = vpop.f32.mrb[10].mxu0 }
 0x114   : > { %v683_v38 = vpop.f32.mrb[11].mxu0  ;;  %v10114_v44 = vadd.f32 %v8611_v36, %v10051_v58  ;;  %v1056_v47 = vmul.f32 %v10105_v37, %v10105_v37 }
 0x115   : > { %v1016_v39 = vadd.f32 %v1015_v35, %v10101_v34  ;;  %v1054_v40 = vmul.f32 %v10101_v34, %v10101_v34  ;;  %v1084_v41 = vadd.f32 %v1083_v33, %v1053_v31  ;;  %v10111_v42 = vadd.f32 %v10051_v58, %v683_v38 }
 0x116   : > { %v1057_v52 = vmul.f32 %v10114_v44, %v10114_v44 }
 0x117   : > { %v1085_v43 = vadd.f32 %v1084_v41, %v1054_v40  ;;  %v1017_v45 = vadd.f32 %v1016_v39, %v10111_v42  ;;  %v1055_v46 = vmul.f32 %v10111_v42, %v10111_v42 }
 0x119   : > { %v1018_v48 = vadd.f32 %v1017_v45, %v10105_v37  ;;  %v1086_v49 = vadd.f32 %v1085_v43, %v1055_v46  ;;  %v8614_v50 = vpop.f32.mrb[12].mxu0 }
 0x11a   : > { %v696_v51 = vpop.f32.mrb[13].mxu0  ;;  %v10129_v59 = vadd.f32 %v8614_v50, %v10051_v58 }
 0x11b   : > { %v1087_v53 = vadd.f32 %v1086_v49, %v1056_v47  ;;  %v10125_v54 = vadd.f32 %v10051_v58, %v696_v51  ;;  %v1019_v55 = vadd.f32 %v1018_v48, %v10114_v44  ;;  %v8615_v57 = vpop.f32.mrb[14].mxu0 }
 0x11c   : > { %v699_v60 = vpop.f32.mrb[15].mxu0  ;;  %v10138_v6 = vadd.f32 %v8615_v57, %v10051_v58  ;;  %v1060_v9 = vmul.f32 %v10129_v59, %v10129_v59 }
 0x11d   : > { %v1020_v62 = vadd.f32 %v1019_v55, %v10125_v54  ;;  %v1058_v63 = vmul.f32 %v10125_v54, %v10125_v54  ;;  %v1088_v2 = vadd.f32 %v1087_v53, %v1057_v52  ;;  %v10135_v4 = vadd.f32 %v10051_v58, %v699_v60 }
 0x11e   : > { %v1061_v15 = vmul.f32 %v10138_v6, %v10138_v6 }
 0x11f   : > { %v1089_v5 = vadd.f32 %v1088_v2, %v1058_v63  ;;  %v1021_v7 = vadd.f32 %v1020_v62, %v10135_v4  ;;  %v1059_v8 = vmul.f32 %v10135_v4, %v10135_v4 }
 0x121   : > { %v1022_v10 = vadd.f32 %v1021_v7, %v10129_v59  ;;  %v1090_v11 = vadd.f32 %v1089_v5, %v1059_v8  ;;  %v8618_v12 = vpop.f32.mrb[16].mxu0 }
 0x122   : > { %v712_v14 = vpop.f32.mrb[17].mxu0  ;;  %v10153_v22 = vadd.f32 %v8618_v12, %v10051_v58 }
 0x123   : > { %v1091_v17 = vadd.f32 %v1090_v11, %v1060_v9  ;;  %v10149_v18 = vadd.f32 %v10051_v58, %v712_v14  ;;  %v1023_v19 = vadd.f32 %v1022_v10, %v10138_v6  ;;  %v8619_v20 = vpop.f32.mrb[18].mxu0 }
 0x124   : > { %v715_v24 = vpop.f32.mrb[19].mxu0  ;;  %v10162_v30 = vadd.f32 %v8619_v20, %v10051_v58  ;;  %v1064_v35 = vmul.f32 %v10153_v22, %v10153_v22 }
 0x125   : > { %v1024_v25 = vadd.f32 %v1023_v19, %v10149_v18  ;;  %v1062_v26 = vmul.f32 %v10149_v18, %v10149_v18  ;;  %v1092_v27 = vadd.f32 %v1091_v17, %v1061_v15  ;;  %v10159_v28 = vadd.f32 %v10051_v58, %v715_v24 }
 0x126   : > { %v1065_v41 = vmul.f32 %v10162_v30, %v10162_v30 }
 0x127   : > { %v1093_v29 = vadd.f32 %v1092_v27, %v1062_v26  ;;  %v1025_v31 = vadd.f32 %v1024_v25, %v10159_v28  ;;  %v1063_v33 = vmul.f32 %v10159_v28, %v10159_v28 }
 0x129   : > { %v1026_v36 = vadd.f32 %v1025_v31, %v10153_v22  ;;  %v1094_v38 = vadd.f32 %v1093_v29, %v1063_v33  ;;  %v8622_v39 = vpop.f32.mrb[20].mxu0 }
 0x12a   : > { %v728_v40 = vpop.f32.mrb[21].mxu0  ;;  %v10177_v48 = vadd.f32 %v8622_v39, %v10051_v58 }
 0x12b   : > { %v1095_v43 = vadd.f32 %v1094_v38, %v1064_v35  ;;  %v10173_v45 = vadd.f32 %v10051_v58, %v728_v40  ;;  %v1027_v46 = vadd.f32 %v1026_v36, %v10162_v30  ;;  %v8623_v47 = vpop.f32.mrb[22].mxu0 }
 0x12c   : > { %v731_v49 = vpop.f32.mrb[23].mxu0  ;;  %v10186_v57 = vadd.f32 %v8623_v47, %v10051_v58  ;;  %v1068_v63 = vmul.f32 %v10177_v48, %v10177_v48 }
 0x12d   : > { %v1028_v50 = vadd.f32 %v1027_v46, %v10173_v45  ;;  %v1066_v51 = vmul.f32 %v10173_v45, %v10173_v45  ;;  %v1096_v52 = vadd.f32 %v1095_v43, %v1065_v41  ;;  %v10183_v53 = vadd.f32 %v10051_v58, %v731_v49 }
 0x12e   : > { %v1069_v9 = vmul.f32 %v10186_v57, %v10186_v57 }
 0x12f   : > { %v1097_v55 = vadd.f32 %v1096_v52, %v1066_v51  ;;  %v1029_v60 = vadd.f32 %v1028_v50, %v10183_v53  ;;  %v1067_v62 = vmul.f32 %v10183_v53, %v10183_v53 }
 0x131   : > { %v1030_v2 = vadd.f32 %v1029_v60, %v10177_v48  ;;  %v1098_v5 = vadd.f32 %v1097_v55, %v1067_v62  ;;  %v8626_v7 = vpop.f32.mrb[24].mxu0 }
 0x132   : > { %v744_v8 = vpop.f32.mrb[25].mxu0  ;;  %v10201_v15 = vadd.f32 %v8626_v7, %v10051_v58 }
 0x133   : > { %v1099_v10 = vadd.f32 %v1098_v5, %v1068_v63  ;;  %v10197_v11 = vadd.f32 %v10051_v58, %v744_v8  ;;  %v1031_v12 = vadd.f32 %v1030_v2, %v10186_v57  ;;  %v8627_v14 = vpop.f32.mrb[26].mxu0 }
 0x134   : > { %v747_v17 = vpop.f32.mrb[27].mxu0  ;;  %v10210_v27 = vadd.f32 %v8627_v14, %v10051_v58  ;;  %v1072_v33 = vmul.f32 %v10201_v15, %v10201_v15 }
 0x135   : > { %v1032_v19 = vadd.f32 %v1031_v12, %v10197_v11  ;;  %v1070_v20 = vmul.f32 %v10197_v11, %v10197_v11  ;;  %v1100_v24 = vadd.f32 %v1099_v10, %v1069_v9  ;;  %v10207_v25 = vadd.f32 %v10051_v58, %v747_v17 }
 0x136   : > { %v1073_v40 = vmul.f32 %v10210_v27, %v10210_v27 }
 0x137   : > { %v1101_v26 = vadd.f32 %v1100_v24, %v1070_v20  ;;  %v1033_v29 = vadd.f32 %v1032_v19, %v10207_v25  ;;  %v1071_v31 = vmul.f32 %v10207_v25, %v10207_v25 }
 0x139   : > { %v1034_v35 = vadd.f32 %v1033_v29, %v10201_v15  ;;  %v1102_v36 = vadd.f32 %v1101_v26, %v1071_v31  ;;  %v8630_v38 = vpop.f32.mrb[28].mxu0 }
 0x13a   : > { %v760_v39 = vpop.f32.mrb[29].mxu0  ;;  %v10225_v49 = vadd.f32 %v8630_v38, %v10051_v58 }
 0x13b   : > { %v1103_v41 = vadd.f32 %v1102_v36, %v1072_v33  ;;  %v10221_v43 = vadd.f32 %v10051_v58, %v760_v39  ;;  %v1035_v46 = vadd.f32 %v1034_v35, %v10210_v27  ;;  %v8631_v47 = vpop.f32.mrb[30].mxu0 }
 0x13c   : > { %v763_v50 = vpop.f32.mrb[31].mxu0  ;;  %v10234_v63 = vadd.f32 %v8631_v47, %v10051_v58  ;;  %v1076_v7 = vmul.f32 %v10225_v49, %v10225_v49 }
 0x13d   : > { %v1036_v51 = vadd.f32 %v1035_v46, %v10221_v43  ;;  %v1074_v52 = vmul.f32 %v10221_v43, %v10221_v43  ;;  %v1104_v55 = vadd.f32 %v1103_v41, %v1073_v40  ;;  %v10231_v60 = vadd.f32 %v10051_v58, %v763_v50 }
 0x13e   : > { %v1077_v10 = vmul.f32 %v10234_v63, %v10234_v63 }
 0x13f   : > { %v1105_v62 = vadd.f32 %v1104_v55, %v1074_v52  ;;  %v1037_v2 = vadd.f32 %v1036_v51, %v10231_v60  ;;  %v1075_v5 = vmul.f32 %v10231_v60, %v10231_v60 }
 0x141   : > { %v1038_v8 = vadd.f32 %v1037_v2, %v10225_v49  ;;  %v1106_v9 = vadd.f32 %v1105_v62, %v1075_v5  ;;  %v10246_v41 = vpop.f32.mrb[32].mxu0 }
 0x142   : > { %13284 = vst [vmem:[#allocation3_spill] sm:$0xff] %v10246_v41  ;;  %v10248_v46 = vpop.f32.mrb[33].mxu0 }
 0x143   : > { %v1039_v12 = vadd.f32 %v1038_v8, %v10234_v63  ;;  %v1107_v14 = vadd.f32 %v1106_v9, %v1076_v7  ;;  %13285 = vst [vmem:[#allocation4_spill] sm:$0xff] %v10248_v46  ;;  %v10250_v47 = vpop.f32.mrb[34].mxu0 }
 0x144   : > { %13286 = vst [vmem:[#allocation5_spill] sm:$0xff] %v10250_v47  ;;  %v10252_v50 = vpop.f32.mrb[35].mxu0 }
 0x145   : > { %v1040_v17 = vrot.slane %v1039_v12, 4  ;;  %v1108_v58 = vadd.f32 %v1107_v14, %v1077_v10  ;;  %13287 = vst [vmem:[#allocation6_spill] sm:$0xff] %v10252_v50 }
 0x147   : > { %v1041_v19 = vadd.f32 %v1040_v17, %v1039_v12  ;;  %v1109_v20 = vrot.slane %v1108_v58, 4 }
 0x149   : > { %v1042_v24 = vrot.slane %v1041_v19, 2  ;;  %v1110_v26 = vadd.f32 %v1109_v20, %v1108_v58  ;;  %v10254_v51 = vpop.f32.mrb[36].mxu0 }
 0x14a   : > { %13288 = vst [vmem:[#allocation7_spill] sm:$0xff] %v10254_v51  ;;  %v10256_v52 = vpop.f32.mrb[37].mxu0 }
 0x14b   : > { %v1043_v29 = vadd.f32 %v1042_v24, %v1041_v19  ;;  %v1111_v31 = vrot.slane %v1110_v26, 2  ;;  %13289 = vst [vmem:[#allocation8_spill] sm:$0xff] %v10256_v52  ;;  %v10258_v55 = vpop.f32.mrb[38].mxu0  ;;  %v1630_v52 = vld [vmem:[#allocation2 + $0x38] sm:$0x1] }
 0x14c   : > { %13290 = vst [vmem:[#allocation9_spill] sm:$0xff] %v10258_v55  ;;  %v10260_v62 = vpop.f32.mrb[39].mxu0 }
 0x14d   : > { %v1044_v33 = vrot.slane %v1043_v29, 1  ;;  %v1112_v35 = vadd.f32 %v1111_v31, %v1110_v26  ;;  %13291 = vst [vmem:[#allocation10_spill] sm:$0xff] %v10260_v62 }
 0x14f   : > { %v1113_v36 = vrot.slane %v1112_v35, 1  ;;  %v1045_v38 = vadd.f32 %v1044_v33, %v1043_v29 }
 0x151   : > { %v1114_v39 = vadd.f32 %v1113_v36, %v1112_v35  ;;  %v10262_v2 = vpop.f32.mrb[40].mxu0 }
 0x152   : > { %13292 = vst [vmem:[#allocation11_spill] sm:$0xff] %v10262_v2  ;;  %v10264_v5 = vpop.f32.mrb[41].mxu0 }
 0x153   : > { %v1116_v40 = vsel %vm1115_vm1, %v1045_v38, %v1114_v39  ;;  %13293 = vst [vmem:[#allocation12_spill] sm:$0xff] %v10264_v5  ;;  %v10266_v7 = vpop.f32.mrb[42].mxu0 }
 0x154   : > { %8713 = vmatmul.mubr.f32.vlgmr.msra.gmra.mrb[64].mxu0 %v1116_v40  ;;  %13294 = vst [vmem:[#allocation13_spill] sm:$0xff] %v10266_v7  ;;  %v10268_v8 = vpop.f32.mrb[43].mxu0 }
 0x155   : > { %13295 = vst [vmem:[#allocation14_spill] sm:$0xff] %v10268_v8 }
 0x159   : > { %v10270_v9 = vpop.f32.mrb[44].mxu0 }
 0x15a   : > { %13296 = vst [vmem:[#allocation15_spill] sm:$0xff] %v10270_v9  ;;  %v10272_v10 = vpop.f32.mrb[45].mxu0 }
 0x15b   : > { %13297 = vst [vmem:[#allocation16_spill] sm:$0xff] %v10272_v10  ;;  %v10274_v12 = vpop.f32.mrb[46].mxu0 }
 0x15c   : > { %13298 = vst [vmem:[#allocation17_spill] sm:$0xff] %v10274_v12  ;;  %v10276_v14 = vpop.f32.mrb[47].mxu0 }
 0x15d   : > { %13299 = vst [vmem:[#allocation18_spill] sm:$0xff] %v10276_v14 }
 0x161   : > { %v10278_v17 = vpop.f32.mrb[48].mxu0 }
 0x162   : > { %13300 = vst [vmem:[#allocation19_spill] sm:$0xff] %v10278_v17  ;;  %v10280_v58 = vpop.f32.mrb[49].mxu0 }
 0x163   : > { %13301 = vst [vmem:[#allocation20_spill] sm:$0xff] %v10280_v58  ;;  %v10282_v19 = vpop.f32.mrb[50].mxu0 }
 0x164   : > { %13302 = vst [vmem:[#allocation21_spill] sm:$0xff] %v10282_v19  ;;  %v10284_v20 = vpop.f32.mrb[51].mxu0 }
 0x165   : > { %13303 = vst [vmem:[#allocation22_spill] sm:$0xff] %v10284_v20 }
 0x169   : > { %v10286_v24 = vpop.f32.mrb[52].mxu0 }
 0x16a   : > { %13304 = vst [vmem:[#allocation23_spill] sm:$0xff] %v10286_v24  ;;  %v10288_v26 = vpop.f32.mrb[53].mxu0 }
 0x16b   : > { %13305 = vst [vmem:[#allocation24_spill] sm:$0xff] %v10288_v26  ;;  %v10290_v29 = vpop.f32.mrb[54].mxu0 }
 0x16c   : > { %13306 = vst [vmem:[#allocation25_spill] sm:$0xff] %v10290_v29  ;;  %v10292_v31 = vpop.f32.mrb[55].mxu0  ;;  %v1211_v29 = vlaneseq }
 0x16d   : > { %13307 = vst [vmem:[#allocation26_spill] sm:$0xff] %v10292_v31  ;;  %v9530_v31 = vld [vmem:[%s13224_s5 + $0xc0] sm:$0xff]  }
 0x16e   : > { %8859 = vmatprep.subr.bf16.mxu1 %v9530_v31  ;;  %v10319_v26 = vshrl.u32 %v1211_v29, 7 }
 0x16f   : > { %8860 = vmatpush3.bf16.msra.mxu1 %v9530_v31 }
 0x170   : > { %13316 = vst [vmem:[#allocation35_spill] sm:$0xff] %v10319_v26  ;;  %v13236_v24 = vsub.s32 0, %v10319_v26 }
 0x171   : > { %v10294_v33 = vpop.f32.mrb[56].mxu0 }
 0x172   : > { %13308 = vst [vmem:[#allocation27_spill] sm:$0xff] %v10294_v33  ;;  %v10296_v35 = vpop.f32.mrb[57].mxu0 }
 0x173   : > { %13309 = vst [vmem:[#allocation28_spill] sm:$0xff] %v10296_v35  ;;  %v10298_v36 = vpop.f32.mrb[58].mxu0 }
 0x174   : > { %13310 = vst [vmem:[#allocation29_spill] sm:$0xff] %v10298_v36  ;;  %v10300_v38 = vpop.f32.mrb[59].mxu0  ;;  %v9531_v36 = vld [vmem:[%s13224_s5 + $0xc8] sm:$0xff]  }
 0x175   : > { %13311 = vst [vmem:[#allocation30_spill] sm:$0xff] %v10300_v38  ;;  %8861 = vmatprep.subr.bf16.mxu1 %v9531_v36 }
 0x176   : > { %8862 = vmatpush3.bf16.msra.mxu1 %v9531_v36 }
 0x179   : > { %v10302_v39 = vpop.f32.mrb[60].mxu0 }
 0x17a   : > { %13312 = vst [vmem:[#allocation31_spill] sm:$0xff] %v10302_v39  ;;  %v10304_v40 = vpop.f32.mrb[61].mxu0 }
 0x17b   : > { %13313 = vst [vmem:[#allocation32_spill] sm:$0xff] %v10304_v40  ;;  %v10306_v56 = vpop.f32.mrb[62].mxu0  ;;  %v9532_v40 = vld [vmem:[%s13224_s5 + $0xd0] sm:$0xff]  }
 0x17c   : > { %13314 = vst [vmem:[#allocation33_spill] sm:$0xff] %v10306_v56  ;;  %v10308_v32 = vpop.f32.mrb[63].mxu0  ;;  %8863 = vmatprep.subr.bf16.mxu1 %v9532_v40 }
 0x17d   : > { %13315 = vst [vmem:[#allocation34_spill] sm:$0xff] %v10308_v32  ;;  %8864 = vmatpush3.bf16.msra.mxu1 %v9532_v40  ;;  %v7662_v40 = vld [vmem:[%s13222_s3] ss:$0 sm:$0xff] }
 0x227   : > { %v1199_v56 = vpop.f32.mrb[64].mxu0 }
 0x228   : > { %v1203_v32 = vmul.f32 %v1199_v56, %v1199_v56  ;;  %v8714_v39 = vpop.f32.mrb[65].mxu0  ;;  %v10324_v36 = vrot.slane %v1199_v56, %v13236_v24 }
 0x22a   : > { %v1205_v38 = vrot.slane %v1203_v32, 7  ;;  %v13235_v32 = vsub.s32 1, %v10319_v26  ;;  %v1216_v29 = vsub.f32 %v10060_v1, %v10324_v36  ;;  %v1218_v39 = vsub.f32 %v10065_v3, %v10324_v36 }
 0x22b   : > { %v1222_v1 = vsub.f32 %v10090_v23, %v10324_v36  ;;  %v1225_v3 = vsub.f32 %v10105_v37, %v10324_v36  ;;  %v1229_v23 = vsub.f32 %v10129_v59, %v10324_v36  ;;  %v9535_v59 = vld [vmem:[%s13224_s5 + $0x48] sm:$0xff]  }
 0x22c   : > { %v1207_v35 = vsub.f32 %v1199_v56, %v1205_v38  ;;  %v9533_v56 = vld [vmem:[%s13224_s5 + $0x40] sm:$0xff]  }
 0x22d   : > { %8715 = vmatprep.subr.bf16.mxu0 %v9533_v56 }
 0x22e   : > { %v1208_v33 = vmax.f32 %v1207_v35, 0.0  ;;  %v1217_v35 = vsub.f32 %v10057_v0, %v10324_v36  ;;  %v1223_v0 = vsub.f32 %v10101_v34, %v10324_v36  ;;  %8716 = vmatpush3.bf16.msra.mxu0 %v9533_v56  ;;  %v9534_v34 = vld [vmem:[%s13224_s5 + $0xd8] sm:$0xff]   ;;  %v1235_v56 = vsub.f32 %v10173_v45, %v10324_v36 }
 0x22f   : > { %8865 = vmatprep.subr.bf16.mxu1 %v9534_v34  ;;  %8717 = vmatprep.subr.bf16.mxu0 %v9535_v59  ;;  %v1242_v45 = vsub.f32 %v10210_v27, %v10324_v36 }
 0x230   : > { %v1209_v31 = vadd.f32 1e-05, %v1208_v33  ;;  %v1215_v33 = vsub.f32 %v10054_v61, %v10324_v36  ;;  %v1221_v61 = vsub.f32 %v10081_v16, %v10324_v36  ;;  %v1228_v16 = vsub.f32 %v10135_v4, %v10324_v36  ;;  %8866 = vmatpush3.bf16.msra.mxu1 %v9534_v34 }
 0x231   : > { %v1233_v4 = vsub.f32 %v10153_v22, %v10324_v36  ;;  %v1240_v22 = vsub.f32 %v10207_v25, %v10324_v36 }
 0x232   : > { %9650 = vrsqrt.f32 %v1209_v31  ;;  %v1219_v31 = vsub.f32 %v10077_v13, %v10324_v36  ;;  %v1226_v13 = vsub.f32 %v10114_v44, %v10324_v36  ;;  %v1231_v44 = vsub.f32 %v10149_v18, %v10324_v36  ;;  %8718 = vmatpush3.bf16.msra.mxu0 %v9535_v59 }
 0x233   : > { %v1237_v18 = vsub.f32 %v10177_v48, %v10324_v36  ;;  %v1244_v48 = vsub.f32 %v10231_v60, %v10324_v36 }
 0x23c   : > { %v9651_v20 = vpop.eup %9650 }
 0x23d   : > { %v1253_v38 = vmul.f32 %v9651_v20, %v7662_v40  ;;  %v1220_v20 = vsub.f32 %v10087_v21, %v10324_v36  ;;  %v1224_v40 = vsub.f32 %v10111_v42, %v10324_v36  ;;  %v1227_v21 = vsub.f32 %v10125_v54, %v10324_v36 }
 0x23e   : > { %v1230_v42 = vsub.f32 %v10138_v6, %v10324_v36  ;;  %v1232_v54 = vsub.f32 %v10159_v28, %v10324_v36  ;;  %v1236_v6 = vsub.f32 %v10183_v53, %v10324_v36  ;;  %v1238_v28 = vsub.f32 %v10186_v57, %v10324_v36  ;;  %v9536_v57 = vld [vmem:[%s13224_s5 + $0xe0] sm:$0xff]  }
 0x23f   : > { %v10368_v37 = vrot.slane %v1253_v38, %v13235_v32  ;;  %v1234_v38 = vsub.f32 %v10162_v30, %v10324_v36  ;;  %v1239_v32 = vsub.f32 %v10197_v11, %v10324_v36  ;;  %v1241_v30 = vsub.f32 %v10201_v15, %v10324_v36  ;;  %8867 = vmatprep.subr.bf16.mxu1 %v9536_v57 }
 0x240   : > { %v1243_v53 = vsub.f32 %v10221_v43, %v10324_v36  ;;  %v1245_v11 = vsub.f32 %v10225_v49, %v10324_v36  ;;  %v1246_v15 = vsub.f32 %v10234_v63, %v10324_v36  ;;  %v9537_v43 = vld [vmem:[%s13224_s5 + $0x50] sm:$0xff]   ;;  %8868 = vmatpush3.bf16.msra.mxu1 %v9536_v57 }
 0x241   : > { %v1258_v25 = vmul.f32 %v10368_v37, %v1215_v33  ;;  %v1259_v27 = vmul.f32 %v10368_v37, %v1216_v29  ;;  %v1260_v60 = vmul.f32 %v10368_v37, %v1217_v35  ;;  %v1261_v34 = vmul.f32 %v10368_v37, %v1218_v39  ;;  %8719 = vmatprep.subr.bf16.mxu0 %v9537_v43 }
 0x242   : > { %v1262_v24 = vmul.f32 %v10368_v37, %v1219_v31  ;;  %v1263_v49 = vmul.f32 %v10368_v37, %v1220_v20  ;;  %v1264_v63 = vmul.f32 %v10368_v37, %v1221_v61  ;;  %v1265_v36 = vmul.f32 %v10368_v37, %v1222_v1  ;;  %v9538_v20 = vld [vmem:[%s13224_s5 + $0xe8] sm:$0xff]   ;;  %8720 = vmatpush3.bf16.msra.mxu0 %v9537_v43 }
 0x243   : > { %v1266_v33 = vmul.f32 %v10368_v37, %v1223_v0  ;;  %v1267_v29 = vmul.f32 %v10368_v37, %v1224_v40  ;;  %v1268_v59 = vmul.f32 %v10368_v37, %v1225_v3  ;;  %v1269_v35 = vmul.f32 %v10368_v37, %v1226_v13  ;;  %v9539_v3 = vld [vmem:[%s13224_s5 + $0x58] sm:$0xff]   ;;  %v10440_v13 = vld [vmem:[%s13223_s4] ss:$0 sm:$0xff]  ;;  %8869 = vmatprep.subr.bf16.mxu1 %v9538_v20 }
 0x244   : > { %v1270_v39 = vmul.f32 %v10368_v37, %v1227_v21  ;;  %v1271_v31 = vmul.f32 %v10368_v37, %v1228_v16  ;;  %v1272_v61 = vmul.f32 %v10368_v37, %v1229_v23  ;;  %v1273_v1 = vmul.f32 %v10368_v37, %v1230_v42  ;;  %8721 = vmatprep.subr.bf16.mxu0 %v9539_v3 }
 0x245   : > { %v1274_v0 = vmul.f32 %v10368_v37, %v1231_v44  ;;  %v1275_v40 = vmul.f32 %v10368_v37, %v1232_v54  ;;  %v1276_v21 = vmul.f32 %v10368_v37, %v1233_v4  ;;  %v1277_v16 = vmul.f32 %v10368_v37, %v1234_v38  ;;  %v9540_v4 = vld [vmem:[%s13224_s5 + $0xf0] sm:$0xff]   ;;  %v9541_v38 = vld [vmem:[%s13224_s5 + $0x60] sm:$0xff]   ;;  %8870 = vmatpush3.bf16.msra.mxu1 %v9538_v20 }
 0x246   : > { %v1278_v23 = vmul.f32 %v10368_v37, %v1235_v56  ;;  %v1279_v42 = vmul.f32 %v10368_v37, %v1236_v6  ;;  %v1280_v44 = vmul.f32 %v10368_v37, %v1237_v18  ;;  %v1281_v54 = vmul.f32 %v10368_v37, %v1238_v28  ;;  %8722 = vmatpush3.bf16.msra.mxu0 %v9539_v3 }
 0x247   : > { %v1282_v57 = vmul.f32 %v10368_v37, %v1239_v32  ;;  %v1283_v43 = vmul.f32 %v10368_v37, %v1240_v22  ;;  %v1284_v56 = vmul.f32 %v10368_v37, %v1241_v30  ;;  %v1285_v6 = vmul.f32 %v10368_v37, %v1242_v45  ;;  %v9542_v30 = vld [vmem:[%s13224_s5 + $0xf8] sm:$0xff]   ;;  %8871 = vmatprep.subr.bf16.mxu1 %v9540_v4 }
 0x248   : > { %v1286_v18 = vmul.f32 %v10368_v37, %v1243_v53  ;;  %v1287_v28 = vmul.f32 %v10368_v37, %v1244_v48  ;;  %v1288_v32 = vmul.f32 %v10368_v37, %v1245_v11  ;;  %v1289_v22 = vmul.f32 %v10368_v37, %v1246_v15  ;;  %v9543_v11 = vld [vmem:[%s13224_s5 + $0x68] sm:$0xff]   ;;  %8723 = vmatprep.subr.bf16.mxu0 %v9541_v38 }
 0x249   : > { %v10463_v19 = vadd.f32 %v10440_v13, %v1258_v25  ;;  %v10466_v26 = vadd.f32 %v10440_v13, %v1259_v27  ;;  %v10472_v45 = vadd.f32 %v10440_v13, %v1260_v60  ;;  %v10475_v53 = vadd.f32 %v10440_v13, %v1261_v34  ;;  %8872 = vmatpush3.bf16.msra.mxu1 %v9540_v4 }
 0x24a   : > { %v10478_v48 = vadd.f32 %v10440_v13, %v1262_v24  ;;  %v10481_v37 = vadd.f32 %v10440_v13, %v1263_v49  ;;  %v10487_v15 = vadd.f32 %v10440_v13, %v1264_v63  ;;  %v10490_v25 = vadd.f32 %v10440_v13, %v1265_v36  ;;  %8724 = vmatpush3.bf16.msra.mxu0 %v9541_v38 }
 0x24b   : > { %v10493_v27 = vadd.f32 %v10440_v13, %v1266_v33  ;;  %v10496_v24 = vadd.f32 %v10440_v13, %v1267_v29  ;;  %v10499_v60 = vadd.f32 %v10440_v13, %v1268_v59  ;;  %v10502_v34 = vadd.f32 %v10440_v13, %v1269_v35  ;;  %8873 = vmatprep.subr.bf16.mxu1 %v9542_v30  ;;  %v9545_v59 = vld [vmem:[%s13224_s5 + $0x100] sm:$0xff]  }
 0x24c   : > { %v10505_v49 = vadd.f32 %v10440_v13, %v1270_v39  ;;  %v10508_v63 = vadd.f32 %v10440_v13, %v1271_v31  ;;  %v10511_v36 = vadd.f32 %v10440_v13, %v1272_v61  ;;  %v10514_v33 = vadd.f32 %v10440_v13, %v1273_v1  ;;  %8725 = vmatprep.subr.bf16.mxu0 %v9543_v11  ;;  %v9546_v61 = vld [vmem:[%s13224_s5 + $0x70] sm:$0xff]  }
 0x24d   : > { %v10517_v29 = vadd.f32 %v10440_v13, %v1274_v0  ;;  %v10523_v35 = vadd.f32 %v10440_v13, %v1275_v40  ;;  %v10526_v39 = vadd.f32 %v10440_v13, %v1276_v21  ;;  %v10529_v31 = vadd.f32 %v10440_v13, %v1277_v16  ;;  %8874 = vmatpush3.bf16.msra.mxu1 %v9542_v30 }
 0x24e   : > { %v10532_v20 = vadd.f32 %v10440_v13, %v1278_v23  ;;  %v10538_v1 = vadd.f32 %v10440_v13, %v1279_v42  ;;  %v10541_v0 = vadd.f32 %v10440_v13, %v1280_v44  ;;  %v10544_v40 = vadd.f32 %v10440_v13, %v1281_v54  ;;  %8726 = vmatpush3.bf16.msra.mxu0 %v9543_v11 }
 0x24f   : > { %v10547_v3 = vadd.f32 %v10440_v13, %v1282_v57  ;;  %v10550_v21 = vadd.f32 %v10440_v13, %v1283_v43  ;;  %v1328_v16 = vsub.f32 0.0, %v10463_v19  ;;  %v1329_v23 = vsub.f32 0.0, %v10466_v26  ;;  %8907 = vmatprep.subr.bf16.mxu1 %v9545_v59  ;;  %8727 = vmatprep.subr.bf16.mxu0 %v9546_v61 }
 0x250   : > { %13317 = vst [vmem:[#allocation36_spill] sm:$0xff] %v10544_v40  ;;  %v1330_v42 = vsub.f32 0.0, %v10472_v45  ;;  %v10556_v44 = vadd.f32 %v10440_v13, %v1284_v56  ;;  %v10559_v54 = vadd.f32 %v10440_v13, %v1285_v6  ;;  %v10562_v57 = vadd.f32 %v10440_v13, %v1286_v18  ;;  %v9549_v6 = vld [vmem:[%s13224_s5 + $0x78] sm:$0xff]  }
 0x251   : > { %13318 = vst [vmem:[#allocation37_spill] sm:$0xff] %v10547_v3  ;;  %13319 = vst [vmem:[#allocation38_spill] sm:$0xff] %v10550_v21  ;;  %v1331_v4 = vsub.f32 0.0, %v10475_v53  ;;  %v10566_v43 = vadd.f32 %v10440_v13, %v1287_v28  ;;  %v10569_v38 = vadd.f32 %v10440_v13, %v1288_v32  ;;  %v1332_v56 = vsub.f32 0.0, %v10478_v48 }
 0x252   : > { %13320 = vst [vmem:[#allocation39_spill] sm:$0xff] %v10556_v44  ;;  %13321 = vst [vmem:[#allocation40_spill] sm:$0xff] %v10559_v54  ;;  %v1333_v30 = vsub.f32 0.0, %v10481_v37  ;;  %v1334_v18 = vsub.f32 0.0, %v10487_v15  ;;  %v1335_v11 = vsub.f32 0.0, %v10490_v25  ;;  %v1336_v59 = vsub.f32 0.0, %v10493_v27  ;;  %8728 = vmatpush3.bf16.msra.mxu0 %v9546_v61 }
 0x253   : > { %13322 = vst [vmem:[#allocation41_spill] sm:$0xff] %v10562_v57  ;;  %13323 = vst [vmem:[#allocation42_spill] sm:$0xff] %v10566_v43  ;;  %v1337_v28 = vsub.f32 0.0, %v10496_v24  ;;  %v10581_v32 = vadd.f32 %v10440_v13, %v1289_v22  ;;  %v1360_v58 = vmul.f32 1.442695, %v1328_v16  ;;  %v1338_v12 = vsub.f32 0.0, %v10499_v60  ;;  %8729 = vmatprep.subr.bf16.mxu0 %v9549_v6 }
 0x254   : > { %13324 = vst [vmem:[#allocation43_spill] sm:$0xff] %v10569_v38  ;;  %v1362_v17 = vmul.f32 1.442695, %v1329_v23  ;;  %v1364_v14 = vmul.f32 1.442695, %v1330_v42  ;;  %v1339_v10 = vsub.f32 0.0, %v10502_v34 }
 0x255   : > { %13325 = vst [vmem:[#allocation44_spill] sm:$0xff] %v10581_v32  ;;  %v1340_v9 = vsub.f32 0.0, %v10505_v49  ;;  %v1366_v8 = vmul.f32 1.442695, %v1331_v4  ;;  %v1341_v7 = vsub.f32 0.0, %v10508_v63  ;;  %v1342_v5 = vsub.f32 0.0, %v10511_v36 }
 0x256   : > { %v1368_v2 = vmul.f32 1.442695, %v1332_v56  ;;  %9652 = vpow2.f32 %v1360_v58  ;;  %v1343_v13 = vsub.f32 0.0, %v10514_v33  ;;  %v1370_v16 = vmul.f32 1.442695, %v1333_v30  ;;  %8730 = vmatpush3.bf16.msra.mxu0 %v9549_v6 }
 0x257   : > { %9654 = vpow2.f32 %v1362_v17  ;;  %v1372_v62 = vmul.f32 1.442695, %v1334_v18  ;;  %v1374_v55 = vmul.f32 1.442695, %v1335_v11  ;;  %v1565_v58 = vld [vmem:[#allocation2 + $0xc] sm:$0x1] }
 0x258   : > { %9656 = vpow2.f32 %v1364_v14  ;;  %v1376_v30 = vmul.f32 1.442695, %v1336_v59  ;;  %v1568_v17 = vld [vmem:[#allocation2 + $0x18] sm:$0x1]  ;;  %v1571_v23 = vld [vmem:[#allocation2 + $0x24] sm:$0x1] }
 0x259   : > { %9658 = vpow2.f32 %v1366_v8  ;;  %v1378_v11 = vmul.f32 1.442695, %v1337_v28  ;;  %v1621_v6 = vld [vmem:[#allocation2 + $0x14] sm:$0x1]  ;;  %v1574_v22 = vld [vmem:[#allocation2 + $0x30] sm:$0x1] }
 0x25a   : > { %9660 = vpow2.f32 %v1368_v2  ;;  %v1380_v2 = vmul.f32 1.442695, %v1338_v12  ;;  %v1624_v4 = vld [vmem:[#allocation2 + $0x20] sm:$0x1]  ;;  %v1577_v8 = vld [vmem:[#allocation2 + $0x3c] sm:$0x1] }
 0x25b   : > { %9662 = vpow2.f32 %v1370_v16  ;;  %v1382_v16 = vmul.f32 1.442695, %v1339_v10  ;;  %v1627_v56 = vld [vmem:[#allocation2 + $0x2c] sm:$0x1]  ;;  %v1384_v42 = vmul.f32 1.442695, %v1340_v9 }
 0x25c   : > { %9664 = vpow2.f32 %v1372_v62  ;;  %v1386_v59 = vmul.f32 1.442695, %v1341_v7  ;;  %v1566_v62 = vsel %vm10598_vm4, 0, %v1565_v58  ;;  %v1580_v12 = vld [vmem:[#allocation2 + $0x48] sm:$0x1]  ;;  %v1569_v51 = vsel %vm10598_vm4, 0, %v1568_v17 }
 0x25d   : > { %9666 = vpow2.f32 %v1374_v55  ;;  %1567 = vst [vmem:[#allocation2 + $0xc] sm:$0x1] %v1566_v62  ;;  %v1572_v28 = vsel %vm10598_vm4, 0, %v1571_v23  ;;  %v1583_v10 = vld [vmem:[#allocation2 + $0x54] sm:$0x1]  ;;  %v9838_v58 = vmov 0  }
 0x25e   : > { %9668 = vpow2.f32 %v1376_v30  ;;  %v1633_v55 = vld [vmem:[#allocation2 + $0x44] sm:$0x1]  ;;  %v1388_v9 = vmul.f32 1.442695, %v1342_v5  ;;  %v1390_v7 = vmul.f32 1.442695, %v1343_v13 }
 0x25f   : > { %9670 = vpow2.f32 %v1378_v11  ;;  %1570 = vst [vmem:[#allocation2 + $0x18] sm:$0x1] %v1569_v51  ;;  %1573 = vst [vmem:[#allocation2 + $0x24] sm:$0x1] %v1572_v28  ;;  %v1622_v30 = vsel %vm10608_vm5, 0, %v1621_v6  ;;  %v13330_v11 = vsub.f32 0.0, %v10517_v29 }
 0x260   : > { %v10620_v18 = vpop.eup %9652  ;;  %9672 = vpow2.f32 %v1380_v2  ;;  %1552 = vst [vmem:[#allocation2] sm:$0xf] %v9838_v58  ;;  %1553 = vst [vmem:[#allocation2 + $0x4] sm:$0xf] %v9838_v58  ;;  %v1586_v23 = vld [vmem:[#allocation2 + $0x60] sm:$0x1] }
 0x261   : > { %1554 = vst [vmem:[#allocation2 + $0x8] sm:$0x1] %v9838_v58  ;;  %1556 = vst [vmem:[#allocation2 + $0xcc] sm:$0xf] %v9838_v58  ;;  %v10624_v17 = vpop.eup %9654  ;;  %v1392_v5 = vmul.f32 1.442695, %v13330_v11  ;;  %9674 = vpow2.f32 %v1382_v16 }
 0x262   : > { %1557 = vst [vmem:[#allocation2 + $0xd0] sm:$0xf] %v9838_v58  ;;  %1558 = vst [vmem:[#allocation2 + $0xd4] sm:$0x1] %v9838_v58  ;;  %v1575_v51 = vsel %vm10598_vm4, 0, %v1574_v22  ;;  %v1625_v13 = vsel %vm10608_vm5, 0, %v1624_v4  ;;  %v10632_v28 = vpop.eup %9656  ;;  %9676 = vpow2.f32 %v1384_v42 }
 0x263   : > { %1623 = vst [vmem:[#allocation2 + $0x14] sm:$0x1] %v1622_v30  ;;  %v1636_v2 = vld [vmem:[#allocation2 + $0x50] sm:$0x1]  ;;  %v13331_v62 = vsub.f32 0.0, %v10523_v35  ;;  %v1578_v58 = vsel %vm10598_vm4, 0, %v1577_v8  ;;  %v10640_v22 = vpop.eup %9658  ;;  %9678 = vpow2.f32 %v1386_v59 }
 0x264   : > { %1576 = vst [vmem:[#allocation2 + $0x30] sm:$0x1] %v1575_v51  ;;  %1626 = vst [vmem:[#allocation2 + $0x20] sm:$0x1] %v1625_v13  ;;  %v1628_v16 = vsel %vm10608_vm5, 0, %v1627_v56  ;;  %v13332_v4 = vsub.f32 0.0, %v10526_v39  ;;  %v10648_v8 = vpop.eup %9660  ;;  %9680 = vpow2.f32 %v1388_v9 }
 0x265   : > { %v1394_v6 = vmul.f32 1.442695, %v13331_v62  ;;  %v1589_v30 = vld [vmem:[#allocation2 + $0x6c] sm:$0x1]  ;;  %1579 = vst [vmem:[#allocation2 + $0x3c] sm:$0x1] %v1578_v58  ;;  %9682 = vpow2.f32 %v1390_v7 }
 0x266   : > { %v1396_v11 = vmul.f32 1.442695, %v13332_v4  ;;  %1629 = vst [vmem:[#allocation2 + $0x2c] sm:$0x1] %v1628_v16  ;;  %v1581_v42 = vsel %vm10598_vm4, 0, %v1580_v12  ;;  %v1631_v51 = vsel %vm10608_vm5, 0, %v1630_v52  ;;  %v10656_v12 = vpop.eup %9662  ;;  %9684 = vpow2.f32 %v1392_v5 }
 0x267   : > { %v1639_v13 = vld [vmem:[#allocation2 + $0x5c] sm:$0x1]  ;;  %v13333_v56 = vsub.f32 0.0, %v10529_v31  ;;  %1582 = vst [vmem:[#allocation2 + $0x48] sm:$0x1] %v1581_v42  ;;  %v1584_v59 = vsel %vm10598_vm4, 0, %v1583_v10  ;;  %v10664_v10 = vpop.eup %9664  ;;  %9686 = vpow2.f32 %v1394_v6 }
 0x268   : > { %1632 = vst [vmem:[#allocation2 + $0x38] sm:$0x1] %v1631_v51  ;;  %v1634_v58 = vsel %vm10608_vm5, 0, %v1633_v55  ;;  %v1592_v16 = vld [vmem:[#allocation2 + $0x78] sm:$0x1]  ;;  %v13334_v52 = vsub.f32 0.0, %v10532_v20  ;;  %9688 = vpow2.f32 %v1396_v11 }
 0x269   : > { %v1398_v62 = vmul.f32 1.442695, %v13333_v56  ;;  %1585 = vst [vmem:[#allocation2 + $0x54] sm:$0x1] %v1584_v59  ;;  %1635 = vst [vmem:[#allocation2 + $0x44] sm:$0x1] %v1634_v58  ;;  %v10672_v58 = vpop.eup %9666 }
 0x26a   : > { %v1400_v4 = vmul.f32 1.442695, %v13334_v52  ;;  %v1587_v9 = vsel %vm10598_vm4, 0, %v1586_v23  ;;  %v1637_v42 = vsel %vm10608_vm5, 0, %v1636_v2  ;;  %v1642_v51 = vld [vmem:[#allocation2 + $0x68] sm:$0x1] }
 0x26b   : > { %v13335_v55 = vsub.f32 0.0, %v10538_v1  ;;  %1588 = vst [vmem:[#allocation2 + $0x60] sm:$0x1] %v1587_v9  ;;  %1638 = vst [vmem:[#allocation2 + $0x50] sm:$0x1] %v1637_v42  ;;  %v1590_v7 = vsel %vm10598_vm4, 0, %v1589_v30  ;;  %v10679_v42 = vpop.eup %9668  ;;  %9690 = vpow2.f32 %v1398_v62 }
 0x26c   : > { %v1640_v59 = vsel %vm10608_vm5, 0, %v1639_v13  ;;  %v1357_v23 = vsub.f32 0.0, %v10566_v43  ;;  %v13336_v2 = vsub.f32 0.0, %v10541_v0  ;;  %1591 = vst [vmem:[#allocation2 + $0x6c] sm:$0x1] %v1590_v7  ;;  %v1593_v5 = vsel %vm10598_vm4, 0, %v1592_v16  ;;  %v10684_v47 = vpop.eup %9670 }
 0x26d   : > { %v1402_v56 = vmul.f32 1.442695, %v13335_v55  ;;  %1641 = vst [vmem:[#allocation2 + $0x5c] sm:$0x1] %v1640_v59  ;;  %v1595_v9 = vld [vmem:[#allocation2 + $0x84] sm:$0x1]  ;;  %v10692_v11 = vpop.eup %9672  ;;  %9692 = vpow2.f32 %v1400_v4 }
 0x26e   : > { %v1404_v52 = vmul.f32 1.442695, %v13336_v2  ;;  %v1358_v30 = vsub.f32 0.0, %v10569_v38  ;;  %v1562_v13 = vld [vmem:[#allocation2] sm:$0x1]  ;;  %v1643_v50 = vsel %vm10608_vm5, 0, %v1642_v51  ;;  %v10696_v62 = vpop.eup %9674 }
 0x26f   : > { %v1618_v55 = vld [vmem:[#allocation2 + $0x8] sm:$0x1]  ;;  %1594 = vst [vmem:[#allocation2 + $0x78] sm:$0x1] %v1593_v5  ;;  %v13337_v6 = vsub.f32 0.0, %v10544_v40  ;;  %v1563_v16 = vsel %vm10598_vm4, 0, %v1562_v13  ;;  %9694 = vpow2.f32 %v1402_v56 }
 0x270   : > { %v1619_v59 = vsel %vm10608_vm5, 0, %v1618_v55  ;;  %v2207_v2 = vld [vmem:[#allocation2 + $0x4] sm:$0xf]  ;;  %1644 = vst [vmem:[#allocation2 + $0x68] sm:$0x1] %v1643_v50  ;;  %v13338_v5 = vsub.f32 0.0, %v10547_v3  ;;  %v10703_v3 = vpop.eup %9676  ;;  %9696 = vpow2.f32 %v1404_v52 }
 0x271   : > { %v1406_v7 = vmul.f32 1.442695, %v13337_v6  ;;  %1564 = vst [vmem:[#allocation2] sm:$0x1] %v1563_v16  ;;  %1620 = vst [vmem:[#allocation2 + $0x8] sm:$0x1] %v1619_v59 }
 0x272   : > { %v1408_v46 = vmul.f32 1.442695, %v13338_v5  ;;  %v2283_v51 = vshll.u32 %v2207_v2, 16  ;;  %v2287_v41 = vshrl.u32 %v2207_v2, 16  ;;  %v1645_v6 = vld [vmem:[#allocation2 + $0x74] sm:$0x1] }
 0x273   : > { %v1359_v13 = vsub.f32 0.0, %v10581_v32  ;;  %v13339_v38 = vsub.f32 0.0, %v10550_v21  ;;  %v1596_v50 = vsel %vm10598_vm4, 0, %v1595_v9  ;;  %v1598_v43 = vld [vmem:[#allocation2 + $0x90] sm:$0x1]  ;;  %v13340_v4 = vsub.f32 0.0, %v10556_v44  ;;  %v10709_v32 = vpop.eup %9678 }
 0x274   : > { %v10707_v59 = vrot.slane %v2283_v51, 5  ;;  %v2289_v2 = vrot.slane %v2287_v41, 4  ;;  %1597 = vst [vmem:[#allocation2 + $0x84] sm:$0x1] %v1596_v50  ;;  %v1648_v5 = vld [vmem:[#allocation2 + $0x80] sm:$0x1]  ;;  %9698 = vpow2.f32 %v1406_v7  ;;  %v10715_v21 = vpop.eup %9680 }
 0x275   : > { %v1410_v55 = vmul.f32 1.442695, %v13339_v38  ;;  %v1412_v16 = vmul.f32 1.442695, %v13340_v4  ;;  %v13341_v38 = vsub.f32 0.0, %v10559_v54  ;;  %v1646_v9 = vsel %vm10608_vm5, 0, %v1645_v6  ;;  %v10721_v51 = vpop.eup %9682 }
 0x276   : > { %v13342_v44 = vsub.f32 0.0, %v10562_v57  ;;  %v1418_v52 = vmul.f32 1.442695, %v1357_v23  ;;  %9700 = vpow2.f32 %v1408_v46  ;;  %1647 = vst [vmem:[#allocation2 + $0x74] sm:$0x1] %v1646_v9  ;;  %v1599_v41 = vsel %vm10598_vm4, 0, %v1598_v43  ;;  %v10725_v6 = vpop.eup %9684 }
 0x277   : > { %v1414_v56 = vmul.f32 1.442695, %v13341_v38  ;;  %v1420_v50 = vmul.f32 1.442695, %v1358_v30  ;;  %v1422_v54 = vmul.f32 1.442695, %v1359_v13  ;;  %9702 = vpow2.f32 %v1410_v55 }
 0x278   : > { %v1416_v4 = vmul.f32 1.442695, %v13342_v44  ;;  %1600 = vst [vmem:[#allocation2 + $0x90] sm:$0x1] %v1599_v41  ;;  %v1649_v7 = vsel %vm10608_vm5, 0, %v1648_v5  ;;  %9704 = vpow2.f32 %v1412_v16  ;;  %v2290_v46 = vor.u32 %v2289_v2, %v10707_v59  ;;  %v10728_v44 = vpop.eup %9686 }
 0x279   : > { %1650 = vst [vmem:[#allocation2 + $0x80] sm:$0x1] %v1649_v7  ;;  %9706 = vpow2.f32 %v1414_v56  ;;  %v1424_v43 = vadd.f32 1.0, %v10620_v18  ;;  %v2206_v23 = vld [vmem:[#allocation2] sm:$0xf]  ;;  %v10731_v13 = vpop.eup %9688  ;;  %v1425_v55 = vadd.f32 1.0, %v10624_v17 }
 0x27a   : > { %v2254_v30 = vld [vmem:[#allocation2 + $0x8] sm:$0x1]  ;;  %9708 = vpow2.f32 %v1416_v4  ;;  %v2274_v5 = vshrl.u32 %v2206_v23, 16  ;;  %v2277_v38 = vshll.u32 %v2206_v23, 16  ;;  %v1601_v16 = vld [vmem:[#allocation2 + $0x9c] sm:$0x1]  ;;  %v10734_v9 = vpop.eup %9690 }
 0x27b   : > { %9710 = vpow2.f32 %v1418_v52  ;;  %v1426_v2 = vadd.f32 1.0, %v10632_v28  ;;  %v1427_v41 = vadd.f32 1.0, %v10640_v22  ;;  %v2293_v56 = vshll.u32 %v2254_v30, 16  ;;  %v10738_v7 = vpop.eup %9692 }
 0x27c   : > { %9712 = vpow2.f32 %v1420_v50  ;;  %v2276_v18 = vrot.slane %v2274_v5, 4  ;;  %v2279_v57 = vrot.slane %v2277_v38, 5  ;;  %v2291_v40 = vrot.slane %v2290_v46, 4  ;;  %v10740_v4 = vpop.eup %9694 }
 0x27d   : > { %9714 = vpow2.f32 %v1422_v54  ;;  %v1428_v17 = vadd.f32 1.0, %v10648_v8  ;;  %v2295_v28 = vrot.slane %v2293_v56, 5  ;;  %v1602_v22 = vsel %vm10598_vm4, 0, %v1601_v16  ;;  %v10751_v23 = vpop.eup %9696  ;;  %v1651_v8 = vld [vmem:[#allocation2 + $0x8c] sm:$0x1]  ;;  %v9563_v16 = vld [vmem:[%s13224_s5] sm:$0xff]  }
 0x27e   : > { %v1429_v50 = vadd.f32 1.0, %v10656_v12  ;;  %v1430_v46 = vadd.f32 1.0, %v10664_v10  ;;  %9716 = vrcp.f32 %v1424_v43  ;;  %v2280_v54 = vor.u32 %v2279_v57, %v2276_v18  ;;  %1603 = vst [vmem:[#allocation2 + $0x9c] sm:$0x1] %v1602_v22  ;;  %v10755_v30 = vpop.eup %9698  ;;  %v1654_v18 = vld [vmem:[#allocation2 + $0x98] sm:$0x1]  ;;  %8763 = vmatprep.subr.bf16.mxu0 %v9563_v16 }
 0x27f   : > { %v1431_v5 = vadd.f32 1.0, %v10672_v58  ;;  %v1432_v38 = vadd.f32 1.0, %v10679_v42  ;;  %9718 = vrcp.f32 %v1425_v55  ;;  %v1652_v12 = vsel %vm10608_vm5, 0, %v1651_v8  ;;  %v1604_v58 = vld [vmem:[#allocation2 + $0xa8] sm:$0x1] }
 0x280   : > { %v9701_v56 = vpop.eup %9700  ;;  %v1433_v10 = vadd.f32 1.0, %v10684_v47  ;;  %9720 = vrcp.f32 %v1426_v2  ;;  %v2281_v57 = vrot.slane %v2280_v54, 4  ;;  %v2296_v43 = vsel %vm10745_vm8, %v2291_v40, %v2295_v28  ;;  %1653 = vst [vmem:[#allocation2 + $0x8c] sm:$0x1] %v1652_v12  ;;  %v1607_v47 = vld [vmem:[#allocation2 + $0xb4] sm:$0x1] }
 0x281   : > { %v9703_v42 = vpop.eup %9702  ;;  %v1434_v55 = vadd.f32 1.0, %v10692_v11  ;;  %9722 = vrcp.f32 %v1427_v41  ;;  %v1605_v22 = vsel %vm10598_vm4, 0, %v1604_v58  ;;  %v1655_v8 = vsel %vm10608_vm5, 0, %v1654_v18  ;;  %v1657_v41 = vld [vmem:[#allocation2 + $0xa4] sm:$0x1] }
 0x282   : > { %v9705_v2 = vpop.eup %9704  ;;  %v1435_v54 = vadd.f32 1.0, %v10696_v62  ;;  %9724 = vrcp.f32 %v1428_v17  ;;  %v2286_v40 = vsel %vm10745_vm8, %v2281_v57, %v10707_v59  ;;  %1606 = vst [vmem:[#allocation2 + $0xa8] sm:$0x1] %v1605_v22  ;;  %1656 = vst [vmem:[#allocation2 + $0x98] sm:$0x1] %v1655_v8  ;;  %v1608_v11 = vsel %vm10598_vm4, 0, %v1607_v47 }
 0x283   : > { %v1610_v28 = vld [vmem:[#allocation2 + $0xc0] sm:$0x1]  ;;  %v9707_v16 = vpop.eup %9706  ;;  %v1436_v12 = vadd.f32 1.0, %v10703_v3  ;;  %9726 = vrcp.f32 %v1429_v50  ;;  %v7712_v58 = vcombine.low %v2286_v40, %v2296_v43  ;;  %1609 = vst [vmem:[#allocation2 + $0xb4] sm:$0x1] %v1608_v11  ;;  %v1658_v62 = vsel %vm10608_vm5, 0, %v1657_v41 }
 0x284   : > { %v1660_v17 = vld [vmem:[#allocation2 + $0xb0] sm:$0x1]  ;;  %v9709_v18 = vpop.eup %9708  ;;  %v1437_v59 = vadd.f32 1.0, %v10709_v32  ;;  %9728 = vrcp.f32 %v1430_v46  ;;  %1659 = vst [vmem:[#allocation2 + $0xa4] sm:$0x1] %v1658_v62  ;;  %v1611_v57 = vsel %vm10598_vm4, 0, %v1610_v28 }
 0x285   : > { %v1661_v22 = vsel %vm10608_vm5, 0, %v1660_v17  ;;  %v1663_v8 = vld [vmem:[#allocation2 + $0xbc] sm:$0x1]  ;;  %v9711_v3 = vpop.eup %9710  ;;  %v1438_v50 = vadd.f32 1.0, %v10715_v21  ;;  %v1439_v43 = vadd.f32 1.0, %v10721_v51  ;;  %9730 = vrcp.f32 %v1431_v5  ;;  %8731 = vmatprep.mubr.bf16.mxu0 %v7712_v58 }
 0x286   : > { %1612 = vst [vmem:[#allocation2 + $0xc0] sm:$0x1] %v1611_v57  ;;  %1662 = vst [vmem:[#allocation2 + $0xb0] sm:$0x1] %v1661_v22  ;;  %v1664_v32 = vsel %vm10608_vm5, 0, %v1663_v8  ;;  %v9713_v46 = vpop.eup %9712  ;;  %v1440_v47 = vadd.f32 1.0, %v10725_v6  ;;  %9732 = vrcp.f32 %v1432_v38 }
 0x287   : > { %v1441_v40 = vadd.f32 1.0, %v10728_v44  ;;  %v1442_v11 = vadd.f32 1.0, %v10731_v13  ;;  %1665 = vst [vmem:[#allocation2 + $0xbc] sm:$0x1] %v1664_v32  ;;  %v9715_v41 = vpop.eup %9714  ;;  %v1443_v21 = vadd.f32 1.0, %v10734_v9  ;;  %v1444_v51 = vadd.f32 1.0, %v10738_v7 }
 0x288   : > { %v1445_v5 = vadd.f32 1.0, %v10740_v4  ;;  %9734 = vrcp.f32 %v1433_v10  ;;  %v9717_v28 = vpop.eup %9716  ;;  %v1446_v58 = vadd.f32 1.0, %v10751_v23  ;;  %v10798_v62 = vadd.f32 1.0, %v10755_v30 }
 0x289   : > { %v10800_v6 = vadd.f32 1.0, %v9701_v56  ;;  %9736 = vrcp.f32 %v1434_v55  ;;  %v9719_v44 = vpop.eup %9718  ;;  %v10802_v13 = vadd.f32 1.0, %v9703_v42  ;;  %v10804_v38 = vadd.f32 1.0, %v9705_v2 }
 0x28a   : > { %9738 = vrcp.f32 %v1435_v54  ;;  %v1520_v9 = vmul.f32 %v9717_v28, %v10463_v19  ;;  %v9721_v7 = vpop.eup %9720  ;;  %v10807_v4 = vadd.f32 1.0, %v9707_v16  ;;  %v10809_v10 = vadd.f32 1.0, %v9709_v18 }
 0x28b   : > { %9740 = vrcp.f32 %v1436_v12  ;;  %v1521_v23 = vmul.f32 %v9719_v44, %v10466_v26  ;;  %v9723_v30 = vpop.eup %9722  ;;  %v10812_v56 = vadd.f32 1.0, %v9711_v3  ;;  %v1522_v42 = vmul.f32 %v9721_v7, %v10472_v45 }
 0x28c   : > { %9742 = vrcp.f32 %v1437_v59  ;;  %v8127_v55 = vpack.c.bf16 %v1520_v9, %v1520_v9  ;;  %v9725_v2 = vpop.eup %9724  ;;  %v10815_v54 = vadd.f32 1.0, %v9713_v46  ;;  %v1523_v19 = vmul.f32 %v9723_v30, %v10475_v53 }
 0x28d   : > { %9744 = vrcp.f32 %v1438_v50  ;;  %v8128_v16 = vpack.c.bf16 %v1521_v23, %v1521_v23  ;;  %v9727_v17 = vpop.eup %9726  ;;  %v10818_v18 = vadd.f32 1.0, %v9715_v41  ;;  %v1524_v26 = vmul.f32 %v9725_v2, %v10478_v48 }
 0x28e   : > { %9746 = vrcp.f32 %v1439_v43  ;;  %v1771_v12 = vshrl.u32 %v8127_v55, 16  ;;  %v9729_v57 = vpop.eup %9728  ;;  %v1525_v59 = vmul.f32 %v9727_v17, %v10481_v37  ;;  %v10822_v45 = vpack.c.bf16 %v1522_v42, %v1522_v42 }
 0x28f   : > { %9748 = vrcp.f32 %v1440_v47  ;;  %v10824_v22 = vpack.c.bf16 %v1523_v19, %v1523_v19  ;;  %v9731_v8 = vpop.eup %9730  ;;  %v1526_v53 = vmul.f32 %v9729_v57, %v10487_v15  ;;  %v1774_v50 = vshll.u32 %v8127_v55, 16 }
 0x290   : > { %9750 = vrcp.f32 %v1441_v40  ;;  %v1773_v3 = vrot.slane %v1771_v12, 7  ;;  %v9733_v32 = vpop.eup %9732  ;;  %v1527_v43 = vmul.f32 %v9731_v8, %v10490_v25  ;;  %v10828_v48 = vpack.c.bf16 %v1524_v26, %v1524_v26 }
 0x291   : > { %9752 = vrcp.f32 %v1442_v11  ;;  %v1779_v46 = vshrl.u32 %v8128_v16, 16  ;;  %v1528_v37 = vmul.f32 %v9733_v32, %v10493_v27  ;;  %v10831_v41 = vpack.c.bf16 %v1525_v59, %v1525_v59 }
 0x292   : > { %v9735_v47 = vpop.eup %9734  ;;  %9754 = vrcp.f32 %v1443_v21  ;;  %v10833_v28 = vpack.c.bf16 %v1526_v53, %v1526_v53  ;;  %v10836_v44 = vpack.c.bf16 %v1527_v43, %v1527_v43  ;;  %v10838_v11 = vor.u32 %v1774_v50, %v1773_v3 }
 0x293   : > { %v9737_v40 = vpop.eup %9736  ;;  %9756 = vrcp.f32 %v1444_v51  ;;  %v1529_v15 = vmul.f32 %v9735_v47, %v10496_v24  ;;  %v1777_v7 = vrot.slane %v1773_v3, 4  ;;  %v10841_v21 = vrot.slane %v1779_v46, 7 }
 0x294   : > { %v9739_v25 = vpop.eup %9738  ;;  %9758 = vrcp.f32 %v1445_v5  ;;  %v1530_v9 = vmul.f32 %v9737_v40, %v10499_v60  ;;  %v10844_v30 = vpack.c.bf16 %v1528_v37, %v1528_v37  ;;  %v1782_v51 = vshll.u32 %v8128_v16, 16 }
 0x295   : > { %v9741_v27 = vpop.eup %9740  ;;  %9760 = vrcp.f32 %v1446_v58  ;;  %v1531_v23 = vmul.f32 %v9739_v25, %v10502_v34  ;;  %v10854_v5 = vpack.c.bf16 %v1529_v15, %v1529_v15  ;;  %v1786_v19 = vrot.slane %v10841_v21, 4 }
 0x296   : > { %v9743_v42 = vpop.eup %9742  ;;  %9762 = vrcp.f32 %v10798_v62  ;;  %v1532_v60 = vmul.f32 %v9741_v27, %v10505_v49  ;;  %v10856_v55 = vpack.c.bf16 %v1530_v9, %v1530_v9  ;;  %v1784_v2 = vor.u32 %v1782_v51, %v10841_v21  ;;  %v13347_v27 = vld [vmem:[#allocation36_spill] sm:$0xff] }
 0x297   : > { %v9745_v58 = vpop.eup %9744  ;;  %9764 = vrcp.f32 %v10800_v6  ;;  %v1533_v34 = vmul.f32 %v9743_v42, %v10508_v63  ;;  %v10864_v17 = vpack.c.bf16 %v1531_v23, %v1531_v23  ;;  %v1788_v49 = vshrl.u32 %v10822_v45, 16 }
 0x298   : > { %v9747_v16 = vpop.eup %9746  ;;  %9766 = vrcp.f32 %v10802_v13  ;;  %v1534_v62 = vmul.f32 %v9745_v58, %v10511_v36  ;;  %v10869_v12 = vpack.c.bf16 %v1532_v60, %v1532_v60  ;;  %v1785_v63 = vsel %vm10848_vm10, %v1777_v7, %v1784_v2  ;;  %v13348_v58 = vld [vmem:[#allocation37_spill] sm:$0xff] }
 0x299   : > { %v9749_v26 = vpop.eup %9748  ;;  %9768 = vrcp.f32 %v10804_v38  ;;  %v1535_v6 = vmul.f32 %v9747_v16, %v10514_v33  ;;  %v10875_v36 = vpack.c.bf16 %v1533_v34, %v1533_v34  ;;  %v1790_v59 = vrot.slane %v1788_v49, 7  ;;  %2096 = vst [vmem:[#allocation2 + $0x10] sm:$0xf] %v1785_v63  ;;  %v13349_v49 = vld [vmem:[#allocation38_spill] sm:$0xff] }
 0x29a   : > { %v9751_v57 = vpop.eup %9750  ;;  %9770 = vrcp.f32 %v10807_v4  ;;  %v1536_v13 = vmul.f32 %v9749_v26, %v10517_v29  ;;  %v10879_v33 = vpack.c.bf16 %v1534_v62, %v1534_v62  ;;  %v1791_v29 = vshll.u32 %v10822_v45, 16 }
 0x29b   : > { %v9753_v8 = vpop.eup %9752  ;;  %9772 = vrcp.f32 %v10809_v10  ;;  %v1537_v38 = vmul.f32 %v9751_v57, %v10523_v35  ;;  %v10881_v53 = vpack.c.bf16 %v1535_v6, %v1535_v6  ;;  %v1794_v35 = vrot.slane %v1790_v59, 4  ;;  %v13350_v57 = vld [vmem:[#allocation39_spill] sm:$0xff] }
 0x29c   : > { %v9755_v3 = vpop.eup %9754  ;;  %9774 = vrcp.f32 %v10812_v56  ;;  %v1538_v4 = vmul.f32 %v9753_v8, %v10526_v39  ;;  %v10885_v50 = vpack.c.bf16 %v1536_v13, %v1536_v13  ;;  %v10894_v56 = vor.u32 %v1791_v29, %v1790_v59 }
 0x29d   : > { %v9757_v32 = vpop.eup %9756  ;;  %9776 = vrcp.f32 %v10815_v54  ;;  %v1539_v10 = vmul.f32 %v9755_v3, %v10529_v31  ;;  %v10890_v43 = vpack.c.bf16 %v1537_v38, %v1537_v38  ;;  %v1796_v39 = vshrl.u32 %v10824_v22, 16 }
 0x29e   : > { %v9759_v46 = vpop.eup %9758  ;;  %9778 = vrcp.f32 %v10818_v18  ;;  %v1540_v47 = vmul.f32 %v9757_v32, %v10532_v20  ;;  %v10898_v40 = vpack.c.bf16 %v1538_v4, %v1538_v4  ;;  %v1805_v31 = vshrl.u32 %v10828_v48, 16  ;;  %v13351_v4 = vld [vmem:[#allocation40_spill] sm:$0xff] }
 0x29f   : > { %v9761_v37 = vpop.eup %9760  ;;  %v1541_v45 = vmul.f32 %v9759_v46, %v10538_v1  ;;  %v10900_v54 = vpack.c.bf16 %v1539_v10, %v1539_v10  ;;  %v10906_v18 = vrot.slane %v1796_v39, 7  ;;  %v1799_v20 = vshll.u32 %v10824_v22, 16  ;;  %v13352_v39 = vld [vmem:[#allocation41_spill] sm:$0xff] }
 0x2a0   : > { %v9763_v15 = vpop.eup %9762  ;;  %v1542_v25 = vmul.f32 %v9761_v37, %v10541_v0  ;;  %v10904_v9 = vpack.c.bf16 %v1540_v47, %v1540_v47  ;;  %v1807_v51 = vrot.slane %v1805_v31, 7  ;;  %v1808_v1 = vshll.u32 %v10828_v48, 16 }
 0x2a1   : > { %v9765_v7 = vpop.eup %9764  ;;  %v1543_v23 = vmul.f32 %v9763_v15, %v13347_v27  ;;  %v1813_v42 = vshrl.u32 %v10831_v41, 16  ;;  %v10913_v2 = vpack.c.bf16 %v1541_v45, %v1541_v45  ;;  %v1801_v16 = vor.u32 %v1799_v20, %v10906_v18 }
 0x2a2   : > { %v9767_v60 = vpop.eup %9766  ;;  %v1544_v34 = vmul.f32 %v9765_v7, %v13348_v58  ;;  %v10915_v0 = vpack.c.bf16 %v1542_v25, %v1542_v25  ;;  %v1803_v6 = vrot.slane %v10906_v18, 4  ;;  %v10922_v63 = vor.u32 %v1808_v1, %v1807_v51  ;;  %v13353_v25 = vld [vmem:[#allocation42_spill] sm:$0xff] }
 0x2a3   : > { %v9769_v62 = vpop.eup %9768  ;;  %v1545_v22 = vmul.f32 %v9767_v60, %v13349_v49  ;;  %v10919_v26 = vpack.c.bf16 %v1543_v23, %v1543_v23  ;;  %v1802_v59 = vsel %vm10848_vm10, %v1794_v35, %v1801_v16  ;;  %v1811_v8 = vrot.slane %v1807_v51, 4  ;;  %v13354_v51 = vld [vmem:[#allocation43_spill] sm:$0xff] }
 0x2a4   : > { %v9771_v48 = vpop.eup %9770  ;;  %v1546_v13 = vmul.f32 %v9769_v62, %v13350_v57  ;;  %v10927_v38 = vrot.slane %v1813_v42, 7  ;;  %v10930_v32 = vpack.c.bf16 %v1544_v34, %v1544_v34  ;;  %v1816_v10 = vshll.u32 %v10831_v41, 16  ;;  %2103 = vst [vmem:[#allocation2 + $0x1c] sm:$0xf] %v1802_v59  ;;  %v13355_v34 = vld [vmem:[#allocation44_spill] sm:$0xff] }
 0x2a5   : > { %v9773_v3 = vpop.eup %9772  ;;  %v1547_v29 = vmul.f32 %v9771_v48, %v13351_v4  ;;  %v1822_v46 = vshrl.u32 %v10833_v28, 16  ;;  %v10935_v45 = vpack.c.bf16 %v1545_v22, %v1545_v22  ;;  %v1825_v41 = vshll.u32 %v10833_v28, 16 }
 0x2a6   : > { %v9775_v47 = vpop.eup %9774  ;;  %v1548_v37 = vmul.f32 %v9773_v3, %v13352_v39  ;;  %v10937_v31 = vpack.c.bf16 %v1546_v13, %v1546_v13  ;;  %v1820_v35 = vrot.slane %v10927_v38, 4  ;;  %v1818_v7 = vor.u32 %v1816_v10, %v10927_v38 }
 0x2a7   : > { %v9777_v15 = vpop.eup %9776  ;;  %v1549_v20 = vmul.f32 %v9775_v47, %v13353_v25  ;;  %v1824_v27 = vrot.slane %v1822_v46, 7  ;;  %v10944_v42 = vpack.c.bf16 %v1547_v29, %v1547_v29  ;;  %v1830_v58 = vshrl.u32 %v10836_v44, 16 }
 0x2a8   : > { %v9779_v23 = vpop.eup %9778  ;;  %v1550_v1 = vmul.f32 %v9777_v15, %v13354_v51  ;;  %v10946_v60 = vpack.c.bf16 %v1548_v37, %v1548_v37  ;;  %v1819_v49 = vsel %vm10848_vm10, %v1811_v8, %v1818_v7  ;;  %v1833_v22 = vshll.u32 %v10836_v44, 16 }
 0x2a9   : > { %v1551_v16 = vmul.f32 %v9779_v23, %v13355_v34  ;;  %v10950_v62 = vpack.c.bf16 %v1549_v20, %v1549_v20  ;;  %v10955_v48 = vor.u32 %v1825_v41, %v1824_v27  ;;  %v1828_v28 = vrot.slane %v1824_v27, 4  ;;  %2110 = vst [vmem:[#allocation2 + $0x28] sm:$0xf] %v1819_v49 }
 0x2aa   : > { %v10957_v57 = vrot.slane %v1830_v58, 7  ;;  %v1839_v13 = vshrl.u32 %v10844_v30, 16  ;;  %v10960_v59 = vpack.c.bf16 %v1550_v1, %v1550_v1  ;;  %v1842_v4 = vshll.u32 %v10844_v30, 16 }
 0x2ab   : > { %v10962_v3 = vpack.c.bf16 %v1551_v16, %v1551_v16  ;;  %v1847_v29 = vshrl.u32 %v10854_v5, 16  ;;  %v1850_v44 = vshll.u32 %v10854_v5, 16  ;;  %v1856_v46 = vshrl.u32 %v10856_v55, 16 }
 0x2ac   : > { %v1835_v8 = vor.u32 %v1833_v22, %v10957_v57  ;;  %v1841_v10 = vrot.slane %v1839_v13, 7  ;;  %v1837_v47 = vrot.slane %v10957_v57, 4  ;;  %v1859_v37 = vshll.u32 %v10856_v55, 16 }
 0x2ad   : > { %v10970_v39 = vrot.slane %v1847_v29, 7  ;;  %v1864_v15 = vshrl.u32 %v10864_v17, 16  ;;  %v1858_v20 = vrot.slane %v1856_v46, 7  ;;  %v1867_v7 = vshll.u32 %v10864_v17, 16 }
 0x2ae   : > { %v1836_v30 = vsel %vm10848_vm10, %v1828_v28, %v1835_v8  ;;  %v1845_v25 = vrot.slane %v1841_v10, 4  ;;  %v10977_v27 = vor.u32 %v1842_v4, %v1841_v10  ;;  %v1873_v23 = vshrl.u32 %v10869_v12, 16 }
 0x2af   : > { %v1852_v5 = vor.u32 %v1850_v44, %v10970_v39  ;;  %v10980_v41 = vrot.slane %v1864_v15, 7  ;;  %2117 = vst [vmem:[#allocation2 + $0x34] sm:$0xf] %v1836_v30  ;;  %v10984_v51 = vor.u32 %v1859_v37, %v1858_v20  ;;  %v1862_v1 = vrot.slane %v1858_v20, 4 }
 0x2b0   : > { %v1881_v58 = vshrl.u32 %v10875_v36, 16  ;;  %v1875_v16 = vrot.slane %v1873_v23, 7  ;;  %v1876_v49 = vshll.u32 %v10869_v12, 16  ;;  %v1884_v13 = vshll.u32 %v10875_v36, 16 }
 0x2b1   : > { %v1853_v34 = vsel %vm10848_vm10, %v1845_v25, %v1852_v5  ;;  %v1869_v17 = vor.u32 %v1867_v7, %v10980_v41  ;;  %v1890_v4 = vshrl.u32 %v10879_v33, 16  ;;  %v1893_v10 = vshll.u32 %v10879_v33, 16 }
 0x2b2   : > { %v10992_v28 = vrot.slane %v1881_v58, 7  ;;  %2124 = vst [vmem:[#allocation2 + $0x40] sm:$0xf] %v1853_v34  ;;  %v1879_v8 = vrot.slane %v1875_v16, 4  ;;  %v1898_v44 = vshrl.u32 %v10881_v53, 16  ;;  %v11000_v46 = vor.u32 %v1876_v49, %v1875_v16 }
 0x2b3   : > { %v1870_v29 = vsel %vm10848_vm10, %v1862_v1, %v1869_v17  ;;  %v1892_v15 = vrot.slane %v1890_v4, 7  ;;  %v1901_v30 = vshll.u32 %v10881_v53, 16  ;;  %v1907_v25 = vshrl.u32 %v10885_v50, 16  ;;  %v2104_v53 = vld [vmem:[#allocation2 + $0x20] sm:$0x1] }
 0x2b4   : > { %v1886_v12 = vor.u32 %v1884_v13, %v10992_v28  ;;  %2131 = vst [vmem:[#allocation2 + $0x4c] sm:$0xf] %v1870_v29  ;;  %v11004_v36 = vrot.slane %v1898_v44, 7  ;;  %v1915_v20 = vshrl.u32 %v10890_v43, 16  ;;  %v1910_v23 = vshll.u32 %v10885_v50, 16 }
 0x2b5   : > { %v11011_v7 = vor.u32 %v1893_v10, %v1892_v15  ;;  %v1896_v5 = vrot.slane %v1892_v15, 4  ;;  %v1909_v58 = vrot.slane %v1907_v25, 7  ;;  %v1918_v17 = vshll.u32 %v10890_v43, 16  ;;  %v2114_v15 = vld [vmem:[#allocation2 + $0x30] sm:$0xf] }
 0x2b6   : > { %v1887_v33 = vsel %vm10848_vm10, %v1879_v8, %v1886_v12  ;;  %v1903_v1 = vor.u32 %v1901_v30, %v11004_v36  ;;  %v11015_v34 = vrot.slane %v1915_v20, 7  ;;  %v1924_v16 = vshrl.u32 %v10898_v40, 16 }
 0x2b7   : > { %2138 = vst [vmem:[#allocation2 + $0x58] sm:$0xf] %v1887_v33  ;;  %v1927_v49 = vshll.u32 %v10898_v40, 16  ;;  %v1932_v13 = vshrl.u32 %v10900_v54, 16  ;;  %v1913_v50 = vrot.slane %v1909_v58, 4  ;;  %v1935_v8 = vshll.u32 %v10900_v54, 16 }
 0x2b8   : > { %v1904_v4 = vsel %vm10848_vm10, %v1896_v5, %v1903_v1  ;;  %v1920_v29 = vor.u32 %v1918_v17, %v11015_v34  ;;  %v11026_v10 = vor.u32 %v1910_v23, %v1909_v58  ;;  %v1926_v43 = vrot.slane %v1924_v16, 7 }
 0x2b9   : > { %v11028_v44 = vrot.slane %v1932_v13, 7  ;;  %v1941_v12 = vshrl.u32 %v10904_v9, 16  ;;  %2145 = vst [vmem:[#allocation2 + $0x64] sm:$0xf] %v1904_v4  ;;  %v1944_v30 = vshll.u32 %v10904_v9, 16  ;;  %v1949_v25 = vshrl.u32 %v10913_v2, 16 }
 0x2ba   : > { %v1921_v40 = vsel %vm10848_vm10, %v1913_v50, %v1920_v29  ;;  %v11036_v20 = vor.u32 %v1927_v49, %v1926_v43  ;;  %v1930_v54 = vrot.slane %v1926_v43, 4  ;;  %v1952_v5 = vshll.u32 %v10913_v2, 16 }
 0x2bb   : > { %v1937_v33 = vor.u32 %v1935_v8, %v11028_v44  ;;  %2152 = vst [vmem:[#allocation2 + $0x70] sm:$0xf] %v1921_v40  ;;  %v1943_v1 = vrot.slane %v1941_v12, 7  ;;  %v11041_v58 = vrot.slane %v1949_v25, 7  ;;  %v1958_v17 = vshrl.u32 %v10915_v0, 16 }
 0x2bc   : > { %v1961_v16 = vshll.u32 %v10915_v0, 16  ;;  %v1966_v49 = vshrl.u32 %v10919_v26, 16  ;;  %v1975_v13 = vshrl.u32 %v10930_v32, 16  ;;  %v1969_v29 = vshll.u32 %v10919_v26, 16 }
 0x2bd   : > { %v1938_v9 = vsel %vm10848_vm10, %v1930_v54, %v1937_v33  ;;  %v11049_v4 = vor.u32 %v1944_v30, %v1943_v1  ;;  %v1947_v2 = vrot.slane %v1943_v1, 4  ;;  %v1954_v50 = vor.u32 %v1952_v5, %v11041_v58 }
 0x2be   : > { %2159 = vst [vmem:[#allocation2 + $0x7c] sm:$0xf] %v1938_v9  ;;  %v1960_v43 = vrot.slane %v1958_v17, 7  ;;  %v11054_v12 = vrot.slane %v1966_v49, 7  ;;  %v1977_v40 = vrot.slane %v1975_v13, 7  ;;  %v1978_v25 = vshll.u32 %v10930_v32, 16 }
 0x2bf   : > { %v1955_v0 = vsel %vm10848_vm10, %v1947_v2, %v1954_v50  ;;  %v1983_v30 = vshrl.u32 %v10935_v45, 16  ;;  %v1992_v54 = vshrl.u32 %v10937_v31, 16  ;;  %v1986_v1 = vshll.u32 %v10935_v45, 16  ;;  %v2107_v45 = vld [vmem:[#allocation2 + $0x24] sm:$0xf] }
 0x2c0   : > { %v11061_v33 = vor.u32 %v1961_v16, %v1960_v43  ;;  %v1964_v5 = vrot.slane %v1960_v43, 4  ;;  %v1971_v26 = vor.u32 %v1969_v29, %v11054_v12  ;;  %2166 = vst [vmem:[#allocation2 + $0x88] sm:$0xf] %v1955_v0  ;;  %v1981_v9 = vrot.slane %v1977_v40, 4 }
 0x2c1   : > { %v11066_v49 = vrot.slane %v1983_v30, 7  ;;  %v1994_v13 = vrot.slane %v1992_v54, 7  ;;  %v11070_v2 = vor.u32 %v1978_v25, %v1977_v40  ;;  %v1995_v16 = vshll.u32 %v10937_v31, 16  ;;  %v2093_v25 = vld [vmem:[#allocation2 + $0xc] sm:$0xf] }
 0x2c2   : > { %v1972_v32 = vsel %vm10848_vm10, %v1964_v5, %v1971_v26  ;;  %v2000_v50 = vshrl.u32 %v10944_v42, 16  ;;  %v2003_v43 = vshll.u32 %v10944_v42, 16  ;;  %v2009_v0 = vshrl.u32 %v10946_v60, 16  ;;  %v2100_v42 = vld [vmem:[#allocation2 + $0x18] sm:$0xf] }
 0x2c3   : > { %v1988_v29 = vor.u32 %v1986_v1, %v11066_v49  ;;  %2173 = vst [vmem:[#allocation2 + $0x94] sm:$0xf] %v1972_v32  ;;  %v11078_v30 = vor.u32 %v1995_v16, %v1994_v13  ;;  %v1998_v54 = vrot.slane %v1994_v13, 4  ;;  %v2017_v40 = vshrl.u32 %v10950_v62, 16 }
 0x2c4   : > { %v11080_v17 = vrot.slane %v2000_v50, 7  ;;  %v2011_v5 = vrot.slane %v2009_v0, 7  ;;  %v2012_v26 = vshll.u32 %v10946_v60, 16  ;;  %v2026_v1 = vshrl.u32 %v10960_v59, 16  ;;  %v2097_v60 = vld [vmem:[#allocation2 + $0x14] sm:$0x1] }
 0x2c5   : > { %v1989_v31 = vsel %vm10848_vm10, %v1981_v9, %v1988_v29  ;;  %v11095_v50 = vrot.slane %v2017_v40, 7  ;;  %v2020_v9 = vshll.u32 %v10950_v62, 16  ;;  %v2029_v8 = vshll.u32 %v10960_v59, 16  ;;  %v11106_v62 = vld [vmem:[#allocation2 + $0x10] sm:$0xf] }
 0x2c6   : > { %v2005_v13 = vor.u32 %v2003_v43, %v11080_v17  ;;  %2180 = vst [vmem:[#allocation2 + $0xa0] sm:$0xf] %v1989_v31  ;;  %v2015_v29 = vrot.slane %v2011_v5, 4  ;;  %v2028_v0 = vrot.slane %v2026_v1, 7  ;;  %v2034_v23 = vshrl.u32 %v10962_v3, 16 }
 0x2c7   : > { %v11102_v43 = vor.u32 %v2012_v26, %v2011_v5  ;;  %v2022_v40 = vor.u32 %v2020_v9, %v11095_v50  ;;  %v2024_v16 = vrot.slane %v11095_v50, 4  ;;  %v2121_v31 = vld [vmem:[#allocation2 + $0x3c] sm:$0xf]  ;;  %v2037_v59 = vshll.u32 %v10962_v3, 16  ;;  %v2111_v5 = vld [vmem:[#allocation2 + $0x2c] sm:$0x1] }
 0x2c8   : > { %v2006_v37 = vsel %vm10848_vm10, %v1998_v54, %v2005_v13  ;;  %v2032_v22 = vrot.slane %v2028_v0, 4  ;;  %v11108_v1 = vrot.slane %v2034_v23, 7  ;;  %v2094_v55 = vsel %vm11089_vm12, %v10838_v11, %v2093_v25  ;;  %v2211_v54 = vld [vmem:[#allocation2 + $0x1c] sm:$0xf]  ;;  %v2128_v11 = vld [vmem:[#allocation2 + $0x48] sm:$0xf] }
 0x2c9   : > { %2187 = vst [vmem:[#allocation2 + $0xac] sm:$0xf] %v2006_v37  ;;  %v2023_v26 = vsel %vm10848_vm10, %v2015_v29, %v2022_v40  ;;  %2095 = vst [vmem:[#allocation2 + $0xc] sm:$0xf] %v2094_v55  ;;  %v2101_v13 = vsel %vm11089_vm12, %v10894_v56, %v2100_v42  ;;  %v2108_v23 = vsel %vm11089_vm12, %v10922_v63, %v2107_v45  ;;  %v2118_v37 = vld [vmem:[#allocation2 + $0x38] sm:$0x1] }
 0x2ca   : > { %v2098_v3 = vsel %vm10598_vm4, %v1786_v19, %v2097_v60  ;;  %v11126_v25 = vor.u32 %v2029_v8, %v2028_v0  ;;  %v2039_v9 = vor.u32 %v2037_v59, %v11108_v1  ;;  %2194 = vst [vmem:[#allocation2 + $0xb8] sm:$0xf] %v2023_v26  ;;  %2102 = vst [vmem:[#allocation2 + $0x18] sm:$0xf] %v2101_v13  ;;  %v2307_v56 = vshll.u32 %v11106_v62, 16 }
 0x2cb   : > { %2109 = vst [vmem:[#allocation2 + $0x24] sm:$0xf] %v2108_v23  ;;  %2099 = vst [vmem:[#allocation2 + $0x14] sm:$0x1] %v2098_v3  ;;  %v2311_v55 = vshrl.u32 %v11106_v62, 16  ;;  %v2115_v21 = vsel %vm11089_vm12, %v10955_v48, %v2114_v15  ;;  %v2105_v19 = vsel %vm10598_vm4, %v1803_v6, %v2104_v53  ;;  %v2331_v8 = vshll.u32 %v2211_v54, 16 }
 0x2cc   : > { %v11131_v63 = vld [vmem:[#allocation2 + $0x28] sm:$0xf]  ;;  %v2335_v45 = vshrl.u32 %v2211_v54, 16  ;;  %v2135_v42 = vld [vmem:[#allocation2 + $0x54] sm:$0xf]  ;;  %v2040_v0 = vsel %vm10848_vm10, %v2032_v22, %v2039_v9  ;;  %v11142_v40 = vrot.slane %v2307_v56, 5  ;;  %v2122_v18 = vsel %vm11089_vm12, %v10977_v27, %v2121_v31 }
 0x2cd   : > { %v2125_v60 = vld [vmem:[#allocation2 + $0x44] sm:$0x1]  ;;  %v2142_v29 = vld [vmem:[#allocation2 + $0x60] sm:$0xf]  ;;  %v2313_v59 = vrot.slane %v2311_v55, 4  ;;  %v11149_v54 = vrot.slane %v2331_v8, 5  ;;  %v2112_v24 = vsel %vm10598_vm4, %v1820_v35, %v2111_v5  ;;  %v2129_v9 = vsel %vm11089_vm12, %v10984_v51, %v2128_v11 }
 0x2ce   : > { %2116 = vst [vmem:[#allocation2 + $0x30] sm:$0xf] %v2115_v21  ;;  %2106 = vst [vmem:[#allocation2 + $0x20] sm:$0x1] %v2105_v19  ;;  %v11147_v48 = vld [vmem:[#allocation2 + $0x34] sm:$0xf]  ;;  %v2119_v38 = vsel %vm10598_vm4, %v1837_v47, %v2118_v37  ;;  %v2136_v37 = vsel %vm11089_vm12, %v11000_v46, %v2135_v42 }
 0x2cf   : > { %v2132_v6 = vld [vmem:[#allocation2 + $0x50] sm:$0x1]  ;;  %v2149_v53 = vld [vmem:[#allocation2 + $0x6c] sm:$0xf]  ;;  %v2139_v15 = vld [vmem:[#allocation2 + $0x5c] sm:$0x1]  ;;  %v2314_v3 = vor.u32 %v2313_v59, %v11142_v40 }
 0x2d0   : > { %2201 = vst [vmem:[#allocation2 + $0xc4] sm:$0xf] %v2040_v0  ;;  %v2337_v26 = vrot.slane %v2335_v45, 4  ;;  %2123 = vst [vmem:[#allocation2 + $0x3c] sm:$0xf] %v2122_v18  ;;  %v2355_v22 = vshll.u32 %v11131_v63, 16 }
 0x2d1   : > { %v2156_v13 = vld [vmem:[#allocation2 + $0x78] sm:$0xf]  ;;  %v2146_v23 = vld [vmem:[#allocation2 + $0x68] sm:$0x1]  ;;  %v2163_v27 = vld [vmem:[#allocation2 + $0x84] sm:$0xf] }
 0x2d2   : > { %2113 = vst [vmem:[#allocation2 + $0x2c] sm:$0x1] %v2112_v24  ;;  %v2153_v35 = vld [vmem:[#allocation2 + $0x74] sm:$0x1]  ;;  %v11168_v5 = vld [vmem:[%s13224_s5 + $0x108] sm:$0xff]   ;;  %v2338_v56 = vor.u32 %v2337_v26, %v11149_v54  ;;  %v11171_v55 = vrot.slane %v2355_v22, 5 }
 0x2d3   : > { %v2359_v21 = vshrl.u32 %v11131_v63, 16  ;;  %2130 = vst [vmem:[#allocation2 + $0x48] sm:$0xf] %v2129_v9  ;;  %2120 = vst [vmem:[#allocation2 + $0x38] sm:$0x1] %v2119_v38  ;;  %v2379_v51 = vshll.u32 %v11147_v48, 16  ;;  %v2143_v63 = vsel %vm11089_vm12, %v11011_v7, %v2142_v29 }
 0x2d4   : > { %v9544_v57 = vld [vmem:[#allocation2 + $0xc] sm:$0xff]   ;;  %v2383_v47 = vshrl.u32 %v11147_v48, 16  ;;  %v13358_v19 = vrot.slane %v10970_v39, 4  ;;  %v9547_v0 = vld [vmem:[#allocation2 + $0x18] sm:$0xff]   ;;  %2137 = vst [vmem:[#allocation2 + $0x54] sm:$0xf] %v2136_v37  ;;  %v2150_v39 = vsel %vm11089_vm12, %v11026_v10, %v2149_v53 }
 0x2d5   : > { %v11175_v11 = vld [vmem:[#allocation2 + $0xc] sm:$0xf]  ;;  %v2170_v45 = vld [vmem:[#allocation2 + $0x90] sm:$0xf]  ;;  %2144 = vst [vmem:[#allocation2 + $0x60] sm:$0xf] %v2143_v63  ;;  %8875 = vmatprep.mubr.bf16.mxu1 %v9544_v57 }
 0x2d6   : > { %v2126_v8 = vsel %vm10598_vm4, %v13358_v19, %v2125_v60  ;;  %v2298_v59 = vshrl.u32 %v11175_v11, 16  ;;  %v13359_v18 = vrot.slane %v10980_v41, 4  ;;  %v13360_v42 = vrot.slane %v10992_v28, 4  ;;  %v2160_v60 = vld [vmem:[#allocation2 + $0x80] sm:$0x1]  ;;  %v9548_v29 = vld [vmem:[#allocation2 + $0x24] sm:$0xff]   ;;  %8876 = vmatmul.mubr.bf16.vlgmr.msra.gmra.mrb[0].mxu1 %v9547_v0 }
 0x2d7   : > { %2127 = vst [vmem:[#allocation2 + $0x44] sm:$0x1] %v2126_v8  ;;  %v2255_v26 = vld [vmem:[#allocation2 + $0x14] sm:$0x1]  ;;  %v2301_v24 = vshll.u32 %v11175_v11, 16  ;;  %v2157_v41 = vsel %vm11089_vm12, %v11036_v20, %v2156_v13  ;;  %v13361_v28 = vrot.slane %v11004_v36, 4  ;;  %8879 = vmatprep.mubr.bf16.mxu1 %v9548_v29  ;;  %v2171_v19 = vsel %vm11089_vm12, %v11061_v33, %v2170_v45 }
 0x2d8   : > { %v2133_v46 = vsel %vm10598_vm4, %v13359_v18, %v2132_v6  ;;  %v2140_v7 = vsel %vm10598_vm4, %v13360_v42, %v2139_v15  ;;  %v11201_v22 = vld [vmem:[#allocation2 + $0x18] sm:$0xf]  ;;  %2151 = vst [vmem:[#allocation2 + $0x6c] sm:$0xf] %v2150_v39  ;;  %v2164_v6 = vsel %vm11089_vm12, %v11049_v4, %v2163_v27  ;;  %v2300_v53 = vrot.slane %v2298_v59, 4  ;;  %v9782_v36 = vld [vmem:[%s13224_s5 + $0x100] sm:$0xff]  }
 0x2d9   : > { %2134 = vst [vmem:[#allocation2 + $0x50] sm:$0x1] %v2133_v46  ;;  %2141 = vst [vmem:[#allocation2 + $0x5c] sm:$0x1] %v2140_v7  ;;  %v2147_v10 = vsel %vm10598_vm4, %v13361_v28, %v2146_v23  ;;  %v2315_v15 = vrot.slane %v2314_v3, 4  ;;  %v2317_v9 = vshll.u32 %v2255_v26, 16  ;;  %8908 = vmatpush3.bf16.msra.mxu1 %v9782_v36 }
 0x2da   : > { %2158 = vst [vmem:[#allocation2 + $0x78] sm:$0xf] %v2157_v41  ;;  %2148 = vst [vmem:[#allocation2 + $0x68] sm:$0x1] %v2147_v10  ;;  %v13362_v38 = vrot.slane %v11015_v34, 4  ;;  %v2303_v13 = vrot.slane %v2301_v24, 5  ;;  %8909 = vmatprep.subr.bf16.mxu1 %v11168_v5 }
 0x2db   : > { %2165 = vst [vmem:[#allocation2 + $0x84] sm:$0xf] %v2164_v6  ;;  %v2256_v4 = vld [vmem:[#allocation2 + $0x20] sm:$0x1]  ;;  %v2322_v23 = vshrl.u32 %v11201_v22, 16  ;;  %v2325_v27 = vshll.u32 %v11201_v22, 16 }
 0x2dc   : > { %v2154_v20 = vsel %vm10598_vm4, %v13362_v38, %v2153_v35  ;;  %v2339_v3 = vrot.slane %v2338_v56, 4  ;;  %v2319_v34 = vrot.slane %v2317_v9, 5  ;;  %v2341_v57 = vshll.u32 %v2256_v4, 16  ;;  %v9553_v35 = vld [vmem:[%s13224_s5 + $0x110] sm:$0xff]   ;;  %v11229_v59 = vld [vmem:[#allocation2 + $0x24] sm:$0xf] }
 0x2dd   : > { %2155 = vst [vmem:[#allocation2 + $0x74] sm:$0x1] %v2154_v20  ;;  %v2361_v37 = vrot.slane %v2359_v21, 4  ;;  %v2304_v8 = vor.u32 %v2303_v13, %v2300_v53  ;;  %v2324_v63 = vrot.slane %v2322_v23, 4  ;;  %v2327_v0 = vrot.slane %v2325_v27, 5  ;;  %8910 = vmatpush3.bf16.msra.mxu1 %v11168_v5  ;;  %v9551_v24 = vld [vmem:[#allocation2 + $0x30] sm:$0xff]  }
 0x2de   : > { %v2257_v56 = vld [vmem:[#allocation2 + $0x2c] sm:$0x1]  ;;  %2172 = vst [vmem:[#allocation2 + $0x90] sm:$0xf] %v2171_v19  ;;  %v13363_v18 = vrot.slane %v11028_v44, 4  ;;  %v2320_v39 = vsel %vm10745_vm8, %v2315_v15, %v2319_v34  ;;  %v2343_v21 = vrot.slane %v2341_v57, 5  ;;  %8911 = vmatprep.subr.bf16.mxu1 %v9553_v35  ;;  %8880 = vmatmul.mubr.bf16.gmra.mrb[4].mxu1 %v9551_v24 }
 0x2df   : > { %v2346_v42 = vshrl.u32 %v11229_v59, 16  ;;  %v2349_v33 = vshll.u32 %v11229_v59, 16  ;;  %v2305_v45 = vrot.slane %v2304_v8, 4  ;;  %v2328_v7 = vor.u32 %v2327_v0, %v2324_v63  ;;  %v2214_v44 = vld [vmem:[#allocation2 + $0x30] sm:$0xf]  ;;  %v9566_v5 = vld [vmem:[%s13224_s5 + $0x8] sm:$0xff]  }
 0x2e0   : > { %v2161_v46 = vsel %vm10598_vm4, %v13363_v18, %v2160_v60  ;;  %v2362_v29 = vor.u32 %v2361_v37, %v11171_v55  ;;  %v2365_v26 = vshll.u32 %v2257_v56, 16  ;;  %v9556_v60 = vld [vmem:[%s13224_s5 + $0x118] sm:$0xff]   ;;  %v2344_v41 = vsel %vm10745_vm8, %v2339_v3, %v2343_v21  ;;  %v2217_v53 = vld [vmem:[#allocation2 + $0x40] sm:$0xf]  ;;  %v11596_v31 = vld [vmem:[#allocation2 + $0x64] sm:$0xf] }
 0x2e1   : > { %2162 = vst [vmem:[#allocation2 + $0x80] sm:$0x1] %v2161_v46  ;;  %v2348_v28 = vrot.slane %v2346_v42, 4  ;;  %v2351_v10 = vrot.slane %v2349_v33, 5  ;;  %v2370_v6 = vshrl.u32 %v2214_v44, 16  ;;  %v2310_v15 = vsel %vm10745_vm8, %v2305_v45, %v11142_v40  ;;  %v9552_v38 = vld [vmem:[#allocation2 + $0x3c] sm:$0xff]   ;;  %8912 = vmatpush3.bf16.msra.mxu1 %v9553_v35 }
 0x2e2   : > { %v2329_v9 = vrot.slane %v2328_v7, 4  ;;  %v2363_v20 = vrot.slane %v2362_v29, 4  ;;  %v2367_v36 = vrot.slane %v2365_v26, 5  ;;  %v2258_v13 = vld [vmem:[#allocation2 + $0x38] sm:$0x1]  ;;  %v7713_v4 = vcombine.low %v2310_v15, %v2320_v39  ;;  %8883 = vmatprep.mubr.bf16.mxu1 %v9552_v38  ;;  %8913 = vmatprep.subr.bf16.mxu1 %v9556_v60  ;;  %v9783_v48 = vld [vmem:[%s13224_s5] sm:$0xff]  }
 0x2e3   : > { %v2352_v23 = vor.u32 %v2351_v10, %v2348_v28  ;;  %v2372_v27 = vrot.slane %v2370_v6, 4  ;;  %v2373_v3 = vshll.u32 %v2214_v44, 16  ;;  %v2216_v34 = vld [vmem:[#allocation2 + $0x3c] sm:$0xf]  ;;  %v2381_v40 = vrot.slane %v2379_v51, 5  ;;  %v9568_v51 = vld [vmem:[%s13224_s5 + $0x10] sm:$0xff]  }
 0x2e4   : > { %v2334_v57 = vsel %vm10745_vm8, %v2329_v9, %v11149_v54  ;;  %v2368_v37 = vsel %vm10745_vm8, %v2363_v20, %v2367_v36  ;;  %v2385_v19 = vrot.slane %v2383_v47, 4  ;;  %8732 = vmatmul.mubr.bf16.vlgmr.msra.gmra.mrb[68].mxu0 %v7713_v4  ;;  %v2389_v56 = vshll.u32 %v2258_v13, 16  ;;  %v9559_v54 = vld [vmem:[%s13224_s5 + $0x120] sm:$0xff]   ;;  %v2218_v7 = vld [vmem:[#allocation2 + $0x48] sm:$0xf]  ;;  %v9555_v15 = vld [vmem:[#allocation2 + $0x54] sm:$0xff]  }
 0x2e5   : > { %v7714_v8 = vcombine.low %v2334_v57, %v2344_v41  ;;  %v2353_v63 = vrot.slane %v2352_v23, 4  ;;  %v2375_v0 = vrot.slane %v2373_v3, 5  ;;  %v2259_v46 = vld [vmem:[#allocation2 + $0x44] sm:$0x1]  ;;  %v2394_v39 = vshrl.u32 %v2216_v34, 16  ;;  %8764 = vmatpush3.bf16.msra.mxu0 %v9783_v48  ;;  %8914 = vmatpush3.bf16.msra.mxu1 %v9556_v60  ;;  %v9562_v28 = vld [vmem:[%s13224_s5 + $0x128] sm:$0xff]  }
 0x2e6   : > { %v2386_v18 = vor.u32 %v2385_v19, %v2381_v40  ;;  %v2397_v35 = vshll.u32 %v2216_v34, 16  ;;  %v2403_v21 = vshll.u32 %v2217_v53, 16  ;;  %v2391_v33 = vrot.slane %v2389_v56, 5  ;;  %8765 = vmatprep.subr.bf16.mxu0 %v9566_v5  ;;  %v2219_v41 = vld [vmem:[#allocation2 + $0x4c] sm:$0xf]  ;;  %8915 = vmatprep.subr.bf16.mxu1 %v9559_v54  ;;  %13369 = vst [vmem:[#allocation37_spill] sm:$0xff] %v11596_v31 }
 0x2e7   : > { %8735 = vmatprep.mubr.bf16.mxu0 %v7714_v8  ;;  %v2358_v47 = vsel %vm10745_vm8, %v2353_v63, %v11171_v55  ;;  %v2376_v42 = vor.u32 %v2375_v0, %v2372_v27  ;;  %v2407_v45 = vshrl.u32 %v2217_v53, 16  ;;  %v2396_v44 = vrot.slane %v2394_v39, 4  ;;  %v9554_v10 = vld [vmem:[#allocation2 + $0x48] sm:$0xff]   ;;  %v9571_v53 = vld [vmem:[%s13224_s5 + $0x18] sm:$0xff]   ;;  %v2260_v36 = vld [vmem:[#allocation2 + $0x50] sm:$0x1] }
 0x2e8   : > { %v7715_v29 = vcombine.low %v2358_v47, %v2368_v37  ;;  %v2387_v26 = vrot.slane %v2386_v18, 4  ;;  %v2399_v24 = vrot.slane %v2397_v35, 5  ;;  %v2405_v9 = vrot.slane %v2403_v21, 5  ;;  %8884 = vmatmul.mubr.bf16.gmra.mrb[8].mxu1 %v9554_v10  ;;  %v2220_v57 = vld [vmem:[#allocation2 + $0x54] sm:$0xf] }
 0x2e9   : > { %v2377_v6 = vrot.slane %v2376_v42, 4  ;;  %v2409_v55 = vrot.slane %v2407_v45, 4  ;;  %v2413_v38 = vshll.u32 %v2259_v46, 16  ;;  %v2418_v13 = vshrl.u32 %v2218_v7, 16  ;;  %8766 = vmatpush3.bf16.msra.mxu0 %v9566_v5  ;;  %8887 = vmatprep.mubr.bf16.mxu1 %v9555_v15  ;;  %v2221_v0 = vld [vmem:[#allocation2 + $0x58] sm:$0xf] }
 0x2ea   : > { %v2392_v20 = vsel %vm10745_vm8, %v2387_v26, %v2391_v33  ;;  %v2400_v60 = vor.u32 %v2399_v24, %v2396_v44  ;;  %v2421_v4 = vshll.u32 %v2218_v7, 16  ;;  %v2427_v34 = vshll.u32 %v2219_v41, 16  ;;  %8767 = vmatprep.subr.bf16.mxu0 %v9568_v51  ;;  %8916 = vmatpush3.bf16.msra.mxu1 %v9559_v54  ;;  %v2261_v21 = vld [vmem:[#allocation2 + $0x5c] sm:$0x1]  ;;  %v2222_v42 = vld [vmem:[#allocation2 + $0x60] sm:$0xf] }
 0x2eb   : > { %v2382_v23 = vsel %vm10745_vm8, %v2377_v6, %v2381_v40  ;;  %v2410_v27 = vor.u32 %v2409_v55, %v2405_v9  ;;  %v2415_v3 = vrot.slane %v2413_v38, 5  ;;  %v2420_v8 = vrot.slane %v2418_v13, 4  ;;  %8917 = vmatprep.subr.bf16.mxu1 %v9562_v28  ;;  %v9567_v40 = vld [vmem:[%s13224_s5 + $0x130] sm:$0xff]   ;;  %v2223_v54 = vld [vmem:[#allocation2 + $0x64] sm:$0xf]  ;;  %v9572_v38 = vld [vmem:[%s13224_s5 + $0x138] sm:$0xff]  }
 0x2ec   : > { %v7716_v37 = vcombine.low %v2382_v23, %v2392_v20  ;;  %v2401_v19 = vrot.slane %v2400_v60, 4  ;;  %v2423_v63 = vrot.slane %v2421_v4, 5  ;;  %8736 = vmatmul.mubr.bf16.gmra.mrb[72].mxu0 %v7715_v29  ;;  %v2429_v18 = vrot.slane %v2427_v34, 5  ;;  %v9573_v26 = vld [vmem:[%s13224_s5 + $0x20] sm:$0xff]   ;;  %v9558_v60 = vld [vmem:[#allocation2 + $0x6c] sm:$0xff]  }
 0x2ed   : > { %v2411_v56 = vrot.slane %v2410_v27, 4  ;;  %v2431_v5 = vshrl.u32 %v2219_v41, 16  ;;  %v2437_v46 = vshll.u32 %v2260_v36, 16  ;;  %v2442_v48 = vshrl.u32 %v2220_v57, 16  ;;  %8768 = vmatpush3.bf16.msra.mxu0 %v9568_v51  ;;  %v9557_v6 = vld [vmem:[#allocation2 + $0x60] sm:$0xff]  }
 0x2ee   : > { %8739 = vmatprep.mubr.bf16.mxu0 %v7716_v37  ;;  %v2406_v39 = vsel %vm10745_vm8, %v2401_v19, %v2405_v9  ;;  %v2424_v35 = vor.u32 %v2423_v63, %v2420_v8  ;;  %v2445_v47 = vshll.u32 %v2220_v57, 16  ;;  %v2451_v29 = vshll.u32 %v2221_v0, 16  ;;  %8769 = vmatprep.subr.bf16.mxu0 %v9571_v53  ;;  %v2262_v13 = vld [vmem:[#allocation2 + $0x68] sm:$0x1] }
 0x2ef   : > { %v2416_v33 = vsel %vm10745_vm8, %v2411_v56, %v2415_v3  ;;  %v2433_v45 = vrot.slane %v2431_v5, 4  ;;  %v2439_v7 = vrot.slane %v2437_v46, 5  ;;  %v2444_v41 = vrot.slane %v2442_v48, 4  ;;  %8918 = vmatpush3.bf16.msra.mxu1 %v9562_v28  ;;  %v9575_v57 = vld [vmem:[%s13224_s5 + $0x28] sm:$0xff]   ;;  %v2225_v46 = vld [vmem:[#allocation2 + $0x70] sm:$0xf] }
 0x2f0   : > { %v7717_v44 = vcombine.low %v2406_v39, %v2416_v33  ;;  %v2425_v24 = vrot.slane %v2424_v35, 4  ;;  %v2447_v10 = vrot.slane %v2445_v47, 5  ;;  %v2453_v9 = vrot.slane %v2451_v29, 5  ;;  %8919 = vmatprep.subr.bf16.mxu1 %v9567_v40  ;;  %8888 = vmatmul.mubr.bf16.gmra.mrb[12].mxu1 %v9557_v6  ;;  %v11306_v39 = vld [vmem:[%s13224_s5 + $0x140] sm:$0xff]   ;;  %v2263_v47 = vld [vmem:[#allocation2 + $0x74] sm:$0x1] }
 0x2f1   : > { %v2434_v15 = vor.u32 %v2433_v45, %v2429_v18  ;;  %v2455_v51 = vshrl.u32 %v2221_v0, 16  ;;  %v2461_v55 = vshll.u32 %v2261_v21, 16  ;;  %v2466_v4 = vshrl.u32 %v2222_v42, 16  ;;  %8770 = vmatpush3.bf16.msra.mxu0 %v9571_v53  ;;  %8891 = vmatprep.mubr.bf16.mxu1 %v9558_v60  ;;  %v2224_v0 = vld [vmem:[#allocation2 + $0x6c] sm:$0xf] }
 0x2f2   : > { %v2430_v20 = vsel %vm10745_vm8, %v2425_v24, %v2429_v18  ;;  %v2448_v36 = vor.u32 %v2447_v10, %v2444_v41  ;;  %v2469_v23 = vshll.u32 %v2222_v42, 16  ;;  %v2475_v34 = vshll.u32 %v2223_v54, 16  ;;  %8771 = vmatprep.subr.bf16.mxu0 %v9573_v26  ;;  %v2226_v10 = vld [vmem:[#allocation2 + $0x78] sm:$0xf] }
 0x2f3   : > { %v2435_v28 = vrot.slane %v2434_v15, 4  ;;  %v2457_v27 = vrot.slane %v2455_v51, 4  ;;  %v2463_v3 = vrot.slane %v2461_v55, 5  ;;  %v2468_v19 = vrot.slane %v2466_v4, 4  ;;  %8920 = vmatpush3.bf16.msra.mxu1 %v9567_v40  ;;  %v2227_v55 = vld [vmem:[#allocation2 + $0x7c] sm:$0xf] }
 0x2f4   : > { %v2449_v37 = vrot.slane %v2448_v36, 4  ;;  %v2471_v8 = vrot.slane %v2469_v23, 5  ;;  %v2479_v63 = vshrl.u32 %v2223_v54, 16  ;;  %8740 = vmatmul.mubr.bf16.gmra.mrb[76].mxu0 %v7717_v44  ;;  %v2477_v18 = vrot.slane %v2475_v34, 5  ;;  %8921 = vmatprep.subr.bf16.mxu1 %v9572_v38  ;;  %v2177_v23 = vld [vmem:[#allocation2 + $0x9c] sm:$0xf] }
 0x2f5   : > { %v2440_v53 = vsel %vm10745_vm8, %v2435_v28, %v2439_v7  ;;  %v2458_v56 = vor.u32 %v2457_v27, %v2453_v9  ;;  %v2485_v5 = vshll.u32 %v2262_v13, 16  ;;  %8772 = vmatpush3.bf16.msra.mxu0 %v9573_v26  ;;  %v2490_v33 = vshrl.u32 %v2224_v0, 16  ;;  %v9577_v7 = vld [vmem:[%s13224_s5 + $0x30] sm:$0xff]   ;;  %v9560_v26 = vld [vmem:[#allocation2 + $0x78] sm:$0xff]   ;;  %v9561_v13 = vld [vmem:[#allocation2 + $0x84] sm:$0xff]  }
 0x2f6   : > { %v7718_v35 = vcombine.low %v2430_v20, %v2440_v53  ;;  %v2454_v21 = vsel %vm10745_vm8, %v2449_v37, %v2453_v9  ;;  %v2472_v48 = vor.u32 %v2471_v8, %v2468_v19  ;;  %v2481_v40 = vrot.slane %v2479_v63, 4  ;;  %8773 = vmatprep.subr.bf16.mxu0 %v9575_v57  ;;  %v9578_v37 = vld [vmem:[%s13224_s5 + $0x38] sm:$0xff]   ;;  %v2167_v53 = vld [vmem:[#allocation2 + $0x8c] sm:$0x1] }
 0x2f7   : > { %v2459_v42 = vrot.slane %v2458_v56, 4  ;;  %v2487_v54 = vrot.slane %v2485_v5, 5  ;;  %v2493_v45 = vshll.u32 %v2224_v0, 16  ;;  %v2499_v24 = vshll.u32 %v2225_v46, 16  ;;  %8922 = vmatpush3.bf16.msra.mxu1 %v9572_v38 }
 0x2f8   : > { %8743 = vmatprep.mubr.bf16.mxu0 %v7718_v35  ;;  %v2473_v29 = vrot.slane %v2472_v48, 4  ;;  %v2482_v44 = vor.u32 %v2481_v40, %v2477_v18  ;;  %v2503_v41 = vshrl.u32 %v2225_v46, 16  ;;  %v2492_v15 = vrot.slane %v2490_v33, 4  ;;  %8955 = vmatprep.subr.bf16.mxu1 %v11306_v39  ;;  %v2228_v46 = vld [vmem:[#allocation2 + $0x84] sm:$0xf] }
 0x2f9   : > { %v2464_v6 = vsel %vm10745_vm8, %v2459_v42, %v2463_v3  ;;  %v2495_v9 = vrot.slane %v2493_v45, 5  ;;  %v2509_v51 = vshll.u32 %v2263_v47, 16  ;;  %v2501_v4 = vrot.slane %v2499_v24, 5  ;;  %8774 = vmatpush3.bf16.msra.mxu0 %v9575_v57  ;;  %8892 = vmatmul.mubr.bf16.gmra.mrb[16].mxu1 %v9560_v26  ;;  %v2264_v3 = vld [vmem:[#allocation2 + $0x80] sm:$0x1] }
 0x2fa   : > { %v7719_v20 = vcombine.low %v2454_v21, %v2464_v6  ;;  %v2478_v60 = vsel %vm10745_vm8, %v2473_v29, %v2477_v18  ;;  %v2483_v36 = vrot.slane %v2482_v44, 4  ;;  %v2505_v28 = vrot.slane %v2503_v41, 4  ;;  %8775 = vmatprep.subr.bf16.mxu0 %v9577_v7  ;;  %8895 = vmatprep.mubr.bf16.mxu1 %v9561_v13  ;;  %v2229_v47 = vld [vmem:[#allocation2 + $0x88] sm:$0xf]  ;;  %v11335_v44 = vld [vmem:[%s13224_s5 + $0x80] sm:$0xff]  }
 0x2fb   : > { %v2496_v38 = vor.u32 %v2495_v9, %v2492_v15  ;;  %v2511_v27 = vrot.slane %v2509_v51, 5  ;;  %v2514_v34 = vshrl.u32 %v2226_v10, 16  ;;  %v2517_v8 = vshll.u32 %v2226_v10, 16  ;;  %v2184_v6 = vld [vmem:[#allocation2 + $0xa8] sm:$0xf] }
 0x2fc   : > { %v2488_v19 = vsel %vm10745_vm8, %v2483_v36, %v2487_v54  ;;  %v2523_v63 = vshll.u32 %v2227_v55, 16  ;;  %v2527_v0 = vshrl.u32 %v2227_v55, 16  ;;  %8744 = vmatmul.mubr.bf16.gmra.mrb[80].mxu0 %v7719_v20  ;;  %v2506_v18 = vor.u32 %v2505_v28, %v2501_v4  ;;  %v2174_v26 = vld [vmem:[#allocation2 + $0x98] sm:$0x1]  ;;  %v2230_v55 = vld [vmem:[#allocation2 + $0x90] sm:$0xf] }
 0x2fd   : > { %v7720_v57 = vcombine.low %v2478_v60, %v2488_v19  ;;  %v2497_v56 = vrot.slane %v2496_v38, 4  ;;  %v2516_v5 = vrot.slane %v2514_v34, 4  ;;  %v2519_v35 = vrot.slane %v2517_v8, 5  ;;  %8776 = vmatpush3.bf16.msra.mxu0 %v9577_v7  ;;  %v2191_v20 = vld [vmem:[#allocation2 + $0xb4] sm:$0xf] }
 0x2fe   : > { %v2525_v21 = vrot.slane %v2523_v63, 5  ;;  %v2529_v48 = vrot.slane %v2527_v0, 4  ;;  %v2533_v40 = vshll.u32 %v2264_v3, 16  ;;  %v2507_v54 = vrot.slane %v2506_v18, 4  ;;  %8777 = vmatprep.subr.bf16.mxu0 %v9578_v37  ;;  %v11342_v34 = vld [vmem:[#allocation2 + $0x94] sm:$0xf] }
 0x2ff   : > { %8747 = vmatprep.mubr.bf16.mxu0 %v7720_v57  ;;  %v2502_v42 = vsel %vm10745_vm8, %v2497_v56, %v2501_v4  ;;  %v2178_v33 = vsel %vm11089_vm12, %v11070_v2, %v2177_v23  ;;  %v13364_v45 = vrot.slane %v11041_v58, 4  ;;  %v2520_v7 = vor.u32 %v2519_v35, %v2516_v5  ;;  %v9564_v2 = vld [vmem:[#allocation2 + $0x90] sm:$0xff]   ;;  %v2181_v23 = vld [vmem:[#allocation2 + $0xa4] sm:$0x1] }
 0x300   : > { %v2530_v24 = vor.u32 %v2529_v48, %v2525_v21  ;;  %v2535_v41 = vrot.slane %v2533_v40, 5  ;;  %2179 = vst [vmem:[#allocation2 + $0x9c] sm:$0xf] %v2178_v33  ;;  %v2538_v10 = vshrl.u32 %v2228_v46, 16  ;;  %v2512_v58 = vsel %vm10745_vm8, %v2507_v54, %v2511_v27  ;;  %v2188_v57 = vld [vmem:[#allocation2 + $0xb0] sm:$0x1] }
 0x301   : > { %v2168_v29 = vsel %vm10598_vm4, %v13364_v45, %v2167_v53  ;;  %v2541_v15 = vshll.u32 %v2228_v46, 16  ;;  %v2547_v9 = vshll.u32 %v2229_v47, 16  ;;  %v2551_v51 = vshrl.u32 %v2229_v47, 16  ;;  %8778 = vmatpush3.bf16.msra.mxu0 %v9578_v37  ;;  %8896 = vmatmul.mubr.bf16.gmra.mrb[20].mxu1 %v9564_v2  ;;  %v2198_v53 = vld [vmem:[#allocation2 + $0xc0] sm:$0xf] }
 0x302   : > { %2169 = vst [vmem:[#allocation2 + $0x8c] sm:$0x1] %v2168_v29  ;;  %v7721_v60 = vcombine.low %v2502_v42, %v2512_v58  ;;  %v2521_v36 = vrot.slane %v2520_v7, 4  ;;  %v2531_v13 = vrot.slane %v2530_v24, 4  ;;  %v2540_v4 = vrot.slane %v2538_v10, 4  ;;  %8811 = vmatprep.subr.bf16.mxu0 %v11335_v44 }
 0x303   : > { %v2543_v38 = vrot.slane %v2541_v15, 5  ;;  %v2549_v28 = vrot.slane %v2547_v9, 5  ;;  %v2553_v3 = vrot.slane %v2551_v51, 4  ;;  %v2185_v27 = vsel %vm11089_vm12, %v11078_v30, %v2184_v6  ;;  %v2233_v46 = vld [vmem:[#allocation2 + $0xa0] sm:$0xf] }
 0x304   : > { %v2526_v19 = vsel %vm10745_vm8, %v2521_v36, %v2525_v21  ;;  %v2536_v8 = vsel %vm10745_vm8, %v2531_v13, %v2535_v41  ;;  %2186 = vst [vmem:[#allocation2 + $0xa8] sm:$0xf] %v2185_v27  ;;  %v13365_v37 = vrot.slane %v11054_v12, 4  ;;  %v2562_v0 = vshrl.u32 %v2230_v55, 16  ;;  %8748 = vmatmul.mubr.bf16.gmra.mrb[84].mxu0 %v7721_v60  ;;  %v11358_v40 = vld [vmem:[#allocation2 + $0xac] sm:$0xf] }
 0x305   : > { %v7722_v30 = vcombine.low %v2526_v19, %v2536_v8  ;;  %v2544_v56 = vor.u32 %v2543_v38, %v2540_v4  ;;  %v2554_v18 = vor.u32 %v2553_v3, %v2549_v28  ;;  %v2565_v5 = vshll.u32 %v2230_v55, 16  ;;  %v2195_v51 = vld [vmem:[#allocation2 + $0xbc] sm:$0x1] }
 0x306   : > { %v2175_v63 = vsel %vm10598_vm4, %v13365_v37, %v2174_v26  ;;  %v2564_v35 = vrot.slane %v2562_v0, 4  ;;  %v2571_v21 = vshll.u32 %v11342_v34, 16  ;;  %v2575_v48 = vshrl.u32 %v11342_v34, 16 }
 0x307   : > { %2176 = vst [vmem:[#allocation2 + $0x98] sm:$0x1] %v2175_v63  ;;  %v2192_v12 = vsel %vm11089_vm12, %v11102_v43, %v2191_v20  ;;  %8751 = vmatprep.mubr.bf16.mxu0 %v7722_v30  ;;  %v9565_v47 = vld [vmem:[#allocation2 + $0x9c] sm:$0xff]   ;;  %v2545_v54 = vrot.slane %v2544_v56, 4  ;;  %v13366_v33 = vrot.slane %v11066_v49, 4  ;;  %v2199_v29 = vsel %vm11089_vm12, %v11126_v25, %v2198_v53 }
 0x308   : > { %2193 = vst [vmem:[#allocation2 + $0xb4] sm:$0xf] %v2192_v12  ;;  %v13367_v7 = vrot.slane %v11080_v17, 4  ;;  %v2555_v24 = vrot.slane %v2554_v18, 4  ;;  %v2567_v10 = vrot.slane %v2565_v5, 5  ;;  %v2573_v6 = vrot.slane %v2571_v21, 5  ;;  %8899 = vmatprep.mubr.bf16.mxu1 %v9565_v47 }
 0x309   : > { %v2265_v42 = vld [vmem:[#allocation2 + $0x8c] sm:$0x1]  ;;  %v2182_v45 = vsel %vm10598_vm4, %v13366_v33, %v2181_v23  ;;  %v11371_v26 = vld [vmem:[#allocation2 + $0x9c] sm:$0xf]  ;;  %2200 = vst [vmem:[#allocation2 + $0xc0] sm:$0xf] %v2199_v29  ;;  %v2550_v49 = vsel %vm10745_vm8, %v2545_v54, %v2549_v28 }
 0x30a   : > { %v2189_v43 = vsel %vm10598_vm4, %v13367_v7, %v2188_v57  ;;  %v2557_v41 = vshll.u32 %v2265_v42, 16  ;;  %2183 = vst [vmem:[#allocation2 + $0xa4] sm:$0x1] %v2182_v45  ;;  %v2577_v32 = vrot.slane %v2575_v48, 4  ;;  %v2586_v25 = vshrl.u32 %v11371_v26, 16 }
 0x30b   : > { %2190 = vst [vmem:[#allocation2 + $0xb0] sm:$0x1] %v2189_v43  ;;  %v2589_v17 = vshll.u32 %v11371_v26, 16  ;;  %v2568_v2 = vor.u32 %v2567_v10, %v2564_v35  ;;  %v2595_v15 = vshll.u32 %v2233_v46, 16  ;;  %v2599_v9 = vshrl.u32 %v2233_v46, 16  ;;  %v9569_v55 = vld [vmem:[#allocation2 + $0xa8] sm:$0xff]  }
 0x30c   : > { %v2559_v58 = vrot.slane %v2557_v41, 5  ;;  %v2578_v20 = vor.u32 %v2577_v32, %v2573_v6  ;;  %v2588_v60 = vrot.slane %v2586_v25, 4  ;;  %v2619_v13 = vshll.u32 %v11358_v40, 16  ;;  %8900 = vmatmul.mubr.bf16.gmra.mrb[24].mxu1 %v9569_v55  ;;  %v11380_v63 = vld [vmem:[#allocation2 + $0xa8] sm:$0xf] }
 0x30d   : > { %v2591_v36 = vrot.slane %v2589_v17, 5  ;;  %v2569_v38 = vrot.slane %v2568_v2, 4  ;;  %v2597_v28 = vrot.slane %v2595_v15, 5  ;;  %v2601_v3 = vrot.slane %v2599_v9, 4  ;;  %v4123_v18 = vld [vmem:[#allocation2 + $0xc] sm:$0xf] }
 0x30e   : > { %v2560_v4 = vsel %vm10745_vm8, %v2555_v24, %v2559_v58  ;;  %v2266_v23 = vld [vmem:[#allocation2 + $0x98] sm:$0x1]  ;;  %v2579_v19 = vrot.slane %v2578_v20, 4  ;;  %v2610_v30 = vshrl.u32 %v11380_v63, 16  ;;  %v2613_v56 = vshll.u32 %v11380_v63, 16 }
 0x30f   : > { %v7723_v27 = vcombine.low %v2550_v49, %v2560_v4  ;;  %v2581_v8 = vshll.u32 %v2266_v23, 16  ;;  %v2592_v37 = vor.u32 %v2591_v36, %v2588_v60  ;;  %v2574_v0 = vsel %vm10745_vm8, %v2569_v38, %v2573_v6  ;;  %v9570_v53 = vld [vmem:[#allocation2 + $0xb4] sm:$0xff]   ;;  %v11386_v5 = vld [vmem:[#allocation2 + $0x10] sm:$0xf]  ;;  %v11392_v12 = vld [vmem:[#allocation2 + $0x4] sm:$0xf] }
 0x310   : > { %v2602_v57 = vor.u32 %v2601_v3, %v2597_v28  ;;  %v2196_v48 = vsel %vm10598_vm4, %v2024_v16, %v2195_v51  ;;  %v11394_v47 = vld [vmem:[#allocation2] sm:$0xf]  ;;  %8903 = vmatprep.mubr.bf16.mxu1 %v9570_v53  ;;  %v2612_v29 = vrot.slane %v2610_v30, 4  ;;  %v7737_v7 = vcombine.low %v11175_v11, %v11106_v62  ;;  %v11405_v17 = vld [vmem:[#allocation2 + $0x14] sm:$0x1]  ;;  %v11501_v62 = vld [vmem:[%s13224_s5 + $0x158] sm:$0xff]  }
 0x311   : > { %8752 = vmatmul.mubr.bf16.gmra.mrb[88].mxu0 %v7723_v27  ;;  %v2583_v46 = vrot.slane %v2581_v8, 5  ;;  %v2267_v35 = vld [vmem:[#allocation2 + $0xa4] sm:$0x1]  ;;  %v2593_v21 = vrot.slane %v2592_v37, 4  ;;  %v7736_v42 = vcombine.low %v11394_v47, %v11392_v12  ;;  %2197 = vst [vmem:[#allocation2 + $0xbc] sm:$0x1] %v2196_v48 }
 0x312   : > { %v2603_v54 = vrot.slane %v2602_v57, 4  ;;  %v2605_v33 = vshll.u32 %v2267_v35, 16  ;;  %v2268_v45 = vld [vmem:[#allocation2 + $0xb0] sm:$0x1]  ;;  %v2615_v43 = vrot.slane %v2613_v56, 5  ;;  %v2621_v24 = vrot.slane %v2619_v13, 5 }
 0x313   : > { %v2584_v50 = vsel %vm10745_vm8, %v2579_v19, %v2583_v46  ;;  %v2598_v16 = vsel %vm10745_vm8, %v2593_v21, %v2597_v28  ;;  %v2623_v6 = vshrl.u32 %v11358_v40, 16  ;;  %v2629_v49 = vshll.u32 %v2268_v45, 16  ;;  %v9574_v32 = vld [vmem:[#allocation2 + $0xc0] sm:$0xff]   ;;  %v11411_v60 = vld [vmem:[#allocation2 + $0xb4] sm:$0xf] }
 0x314   : > { %v7724_v41 = vcombine.low %v2574_v0, %v2584_v50  ;;  %v2607_v10 = vrot.slane %v2605_v33, 5  ;;  %v2616_v25 = vor.u32 %v2615_v43, %v2612_v29  ;;  %v4172_v58 = vshrl.u32 %v4123_v18, 16  ;;  %8904 = vmatmul.mubr.bf16.gmra.mrb[28].mxu1 %v9574_v32  ;;  %v11413_v23 = vld [vmem:[#allocation2 + $0xb8] sm:$0xf]  ;;  %v11463_v47 = vld [vmem:[#allocation2 + $0x40] sm:$0xf] }
 0x315   : > { %v4175_v2 = vshll.u32 %v4123_v18, 16  ;;  %v4181_v15 = vshll.u32 %v11386_v5, 16  ;;  %v2625_v51 = vrot.slane %v2623_v6, 4  ;;  %v2631_v55 = vrot.slane %v2629_v49, 5  ;;  %v11428_v6 = vld [vmem:[#allocation2 + $0x20] sm:$0x1] }
 0x316   : > { %8755 = vmatprep.mubr.bf16.mxu0 %v7724_v41  ;;  %v2608_v9 = vsel %vm10745_vm8, %v2603_v54, %v2607_v10  ;;  %v4185_v20 = vshrl.u32 %v11386_v5, 16  ;;  %v2617_v36 = vrot.slane %v2616_v25, 4  ;;  %v4174_v13 = vrot.slane %v4172_v58, 4  ;;  %v4126_v54 = vld [vmem:[#allocation2 + $0x18] sm:$0xf] }
 0x317   : > { %v7725_v40 = vcombine.low %v2598_v16, %v2608_v9  ;;  %v4177_v4 = vrot.slane %v4175_v2, 5  ;;  %v2626_v38 = vor.u32 %v2625_v51, %v2621_v24  ;;  %v4183_v28 = vrot.slane %v4181_v15, 5  ;;  %v11424_v16 = vld [vmem:[#allocation2 + $0x1c] sm:$0xf]  ;;  %v4129_v2 = vld [vmem:[#allocation2 + $0x24] sm:$0xf] }
 0x318   : > { %v4187_v3 = vrot.slane %v4185_v20, 4  ;;  %v4191_v27 = vshll.u32 %v11405_v17, 16  ;;  %v2622_v19 = vsel %vm10745_vm8, %v2617_v36, %v2621_v24  ;;  %v2269_v37 = vld [vmem:[#allocation2 + $0xbc] sm:$0x1]  ;;  %v2634_v0 = vshrl.u32 %v11411_v60, 16 }
 0x319   : > { %8756 = vmatmul.mubr.bf16.gmra.mrb[92].mxu0 %v7725_v40  ;;  %v4178_v8 = vor.u32 %v4177_v4, %v4174_v13  ;;  %v2637_v53 = vshll.u32 %v11411_v60, 16  ;;  %v2627_v57 = vrot.slane %v2626_v38, 4  ;;  %v2643_v18 = vshll.u32 %v11413_v23, 16  ;;  %v11435_v4 = vld [vmem:[#allocation2 + $0x28] sm:$0xf] }
 0x31a   : > { %v4188_v30 = vor.u32 %v4187_v3, %v4183_v28  ;;  %v4193_v56 = vrot.slane %v4191_v27, 5  ;;  %v2636_v35 = vrot.slane %v2634_v0, 4  ;;  %v2647_v48 = vshrl.u32 %v11413_v23, 16  ;;  %v11439_v27 = vld [vmem:[#allocation2 + $0x2c] sm:$0x1] }
 0x31b   : > { %v4179_v46 = vrot.slane %v4178_v8, 4  ;;  %v2639_v21 = vrot.slane %v2637_v53, 5  ;;  %v2632_v33 = vsel %vm10745_vm8, %v2627_v57, %v2631_v55  ;;  %v2645_v29 = vrot.slane %v2643_v18, 5  ;;  %v4132_v57 = vld [vmem:[#allocation2 + $0x30] sm:$0xf] }
 0x31c   : > { %v4189_v45 = vrot.slane %v4188_v30, 4  ;;  %v2653_v50 = vshll.u32 %v2269_v37, 16  ;;  %v7726_v43 = vcombine.low %v2622_v19, %v2632_v33  ;;  %v2649_v10 = vrot.slane %v2647_v48, 4  ;;  %v11445_v33 = vld [vmem:[#allocation2 + $0x34] sm:$0xf] }
 0x31d   : > { %v4184_v24 = vsel %vm10745_vm8, %v4179_v46, %v4183_v28  ;;  %v2640_v41 = vor.u32 %v2639_v21, %v2636_v35  ;;  %v4196_v25 = vshrl.u32 %v4126_v54, 16  ;;  %v4199_v58 = vshll.u32 %v4126_v54, 16 }
 0x31e   : > { %v4194_v49 = vsel %vm10745_vm8, %v4189_v45, %v4193_v56  ;;  %v2655_v32 = vrot.slane %v2653_v50, 5  ;;  %8759 = vmatprep.mubr.bf16.mxu0 %v7726_v43  ;;  %v2650_v51 = vor.u32 %v2649_v10, %v2645_v29  ;;  %v4205_v55 = vshll.u32 %v11424_v16, 16 }
 0x31f   : > { %v7872_v15 = vcombine.low %v4184_v24, %v4194_v49  ;;  %v2641_v9 = vrot.slane %v2640_v41, 4  ;;  %v4198_v20 = vrot.slane %v4196_v25, 4  ;;  %v4201_v40 = vrot.slane %v4199_v58, 5  ;;  %v11450_v49 = vld [vmem:[#allocation2 + $0x38] sm:$0x1] }
 0x320   : > { %v4209_v36 = vshrl.u32 %v11424_v16, 16  ;;  %v4215_v13 = vshll.u32 %v11428_v6, 16  ;;  %v2651_v28 = vrot.slane %v2650_v51, 4  ;;  %v4207_v3 = vrot.slane %v4205_v55, 5 }
 0x321   : > { %8923 = vmatprep.mubr.bf16.mxu1 %v7872_v15  ;;  %v2646_v38 = vsel %vm10745_vm8, %v2641_v9, %v2645_v29  ;;  %v4220_v19 = vshrl.u32 %v4129_v2, 16  ;;  %v4202_v8 = vor.u32 %v4201_v40, %v4198_v20  ;;  %v4223_v53 = vshll.u32 %v4129_v2, 16  ;;  %v4135_v40 = vld [vmem:[#allocation2 + $0x3c] sm:$0xf] }
 0x322   : > { %v4211_v37 = vrot.slane %v4209_v36, 4  ;;  %v4217_v0 = vrot.slane %v4215_v13, 5  ;;  %v2656_v30 = vsel %vm10745_vm8, %v2651_v28, %v2655_v32  ;;  %v4229_v18 = vshll.u32 %v11435_v4, 16 }
 0x323   : > { %v4222_v56 = vrot.slane %v4220_v19, 4  ;;  %v4233_v46 = vshrl.u32 %v11435_v4, 16  ;;  %v7727_v35 = vcombine.low %v2646_v38, %v2656_v30  ;;  %v4203_v21 = vrot.slane %v4202_v8, 4  ;;  %v9580_v38 = vld [vmem:[%s13224_s5 + $0x148] sm:$0xff]   ;;  %v11467_v8 = vld [vmem:[#allocation2 + $0x1c] sm:$0xf] }
 0x324   : > { %v4212_v48 = vor.u32 %v4211_v37, %v4207_v3  ;;  %v4225_v54 = vrot.slane %v4223_v53, 5  ;;  %v4231_v45 = vrot.slane %v4229_v18, 5  ;;  %v4239_v50 = vshll.u32 %v11439_v27, 16 }
 0x325   : > { %v4235_v29 = vrot.slane %v4233_v46, 4  ;;  %v4244_v43 = vshrl.u32 %v4132_v57, 16  ;;  %8760 = vmatmul.mubr.bf16.gmra.mrb[96].mxu0 %v7727_v35  ;;  %v4208_v24 = vsel %vm10745_vm8, %v4203_v21, %v4207_v3  ;;  %v4247_v32 = vshll.u32 %v4132_v57, 16 }
 0x326   : > { %v4213_v41 = vrot.slane %v4212_v48, 4  ;;  %v4226_v10 = vor.u32 %v4225_v54, %v4222_v56  ;;  %v4241_v58 = vrot.slane %v4239_v50, 5  ;;  %8779 = vmatprep.mubr.bf16.mxu0 %v7736_v42  ;;  %v4253_v15 = vshll.u32 %v11445_v33, 16  ;;  %v4138_v48 = vld [vmem:[#allocation2 + $0x48] sm:$0xf] }
 0x327   : > { %v4236_v25 = vor.u32 %v4235_v29, %v4231_v45  ;;  %v4246_v2 = vrot.slane %v4244_v43, 4  ;;  %v4249_v55 = vrot.slane %v4247_v32, 5  ;;  %v4257_v20 = vshrl.u32 %v11445_v33, 16  ;;  %v9596_v54 = vld [vmem:[%s13224_s5 + $0x88] sm:$0xff]  }
 0x328   : > { %v4218_v9 = vsel %vm10745_vm8, %v4213_v41, %v4217_v0  ;;  %v4227_v51 = vrot.slane %v4226_v10, 4  ;;  %v4255_v28 = vrot.slane %v4253_v15, 5  ;;  %v4263_v12 = vshll.u32 %v11450_v49, 16  ;;  %v11471_v0 = vld [vmem:[#allocation2 + $0x44] sm:$0x1] }
 0x329   : > { %v7873_v36 = vcombine.low %v4208_v24, %v4218_v9  ;;  %v4237_v13 = vrot.slane %v4236_v25, 4  ;;  %v4250_v3 = vor.u32 %v4249_v55, %v4246_v2  ;;  %v4259_v19 = vrot.slane %v4257_v20, 4  ;;  %v11485_v43 = vld [vmem:[#allocation2 + $0x4c] sm:$0xf]  ;;  %v11492_v32 = vld [vmem:[#allocation2 + $0x28] sm:$0xf] }
 0x32a   : > { %v4232_v42 = vsel %vm10745_vm8, %v4227_v51, %v4231_v45  ;;  %v7738_v37 = vcombine.low %v11201_v22, %v11467_v8  ;;  %v4265_v57 = vrot.slane %v4263_v12, 5  ;;  %v4268_v30 = vshrl.u32 %v4135_v40, 16  ;;  %v9583_v22 = vld [vmem:[%s13224_s5 + $0x150] sm:$0xff]  }
 0x32b   : > { %8924 = vmatmul.mubr.bf16.vlgmr.msra.gmra.mrb[0].mxu1 %v7873_v36  ;;  %v4242_v53 = vsel %vm10745_vm8, %v4237_v13, %v4241_v58  ;;  %v4271_v56 = vshll.u32 %v4135_v40, 16  ;;  %v4251_v46 = vrot.slane %v4250_v3, 4  ;;  %v4260_v35 = vor.u32 %v4259_v19, %v4255_v28  ;;  %v11496_v58 = vld [vmem:[#allocation2 + $0x50] sm:$0x1]  ;;  %v4141_v55 = vld [vmem:[#allocation2 + $0x54] sm:$0xf] }
 0x32c   : > { %8956 = vmatpush3.bf16.msra.mxu1 %v11306_v39  ;;  %v7874_v18 = vcombine.low %v4232_v42, %v4242_v53  ;;  %v4277_v21 = vshll.u32 %v11463_v47, 16  ;;  %v4270_v45 = vrot.slane %v4268_v30, 4  ;;  %v4281_v50 = vshrl.u32 %v11463_v47, 16  ;;  %v11508_v40 = vld [vmem:[#allocation2 + $0x58] sm:$0xf]  ;;  %v9599_v36 = vld [vmem:[%s13224_s5 + $0x90] sm:$0xff]  }
 0x32d   : > { %8957 = vmatprep.subr.bf16.mxu1 %v9580_v38  ;;  %v4273_v29 = vrot.slane %v4271_v56, 5  ;;  %v4287_v39 = vshll.u32 %v11471_v0, 16  ;;  %8780 = vmatmul.mubr.bf16.vlgmr.msra.gmra.mrb[68].mxu0 %v7737_v7  ;;  %v4256_v24 = vsel %vm10745_vm8, %v4251_v46, %v4255_v28  ;;  %v4261_v41 = vrot.slane %v4260_v35, 4  ;;  %v11518_v30 = vld [vmem:[#allocation2 + $0x34] sm:$0xf] }
 0x32e   : > { %8927 = vmatprep.mubr.bf16.mxu1 %v7874_v18  ;;  %v4279_v10 = vrot.slane %v4277_v21, 5  ;;  %v7739_v25 = vcombine.low %v11229_v59, %v11492_v32  ;;  %8783 = vmatprep.mubr.bf16.mxu0 %v7738_v37  ;;  %v4283_v15 = vrot.slane %v4281_v50, 4  ;;  %v4292_v51 = vshrl.u32 %v4138_v48, 16  ;;  %v11514_v37 = vld [vmem:[#allocation2 + $0x5c] sm:$0x1]  ;;  %v9589_v21 = vld [vmem:[%s13224_s5 + $0x160] sm:$0xff]  }
 0x32f   : > { %v4274_v2 = vor.u32 %v4273_v29, %v4270_v45  ;;  %v4289_v9 = vrot.slane %v4287_v39, 5  ;;  %8812 = vmatpush3.bf16.msra.mxu0 %v11335_v44  ;;  %v4266_v11 = vsel %vm10745_vm8, %v4261_v41, %v4265_v57  ;;  %v4295_v59 = vshll.u32 %v4138_v48, 16  ;;  %v9789_v56 = vld [vmem:[#allocation2 + $0x30] sm:$0xf]  ;;  %v4144_v35 = vld [vmem:[#allocation2 + $0x60] sm:$0xf] }
 0x330   : > { %8958 = vmatpush3.bf16.msra.mxu1 %v9580_v38  ;;  %v4301_v7 = vshll.u32 %v11485_v43, 16  ;;  %v4305_v20 = vshrl.u32 %v11485_v43, 16  ;;  %8813 = vmatprep.subr.bf16.mxu0 %v9596_v54  ;;  %v7875_v13 = vcombine.low %v4256_v24, %v4266_v11  ;;  %v4284_v12 = vor.u32 %v4283_v15, %v4279_v10  ;;  %v11534_v11 = vld [vmem:[#allocation2 + $0x68] sm:$0x1] }
 0x331   : > { %v4275_v28 = vrot.slane %v4274_v2, 4  ;;  %8959 = vmatprep.subr.bf16.mxu1 %v9583_v22  ;;  %v4294_v44 = vrot.slane %v4292_v51, 4  ;;  %v4297_v42 = vrot.slane %v4295_v59, 5  ;;  %v4311_v19 = vshll.u32 %v11496_v58, 16  ;;  %v11529_v2 = vld [vmem:[#allocation2 + $0x64] sm:$0xf] }
 0x332   : > { %v4303_v3 = vrot.slane %v4301_v7, 5  ;;  %v4307_v38 = vrot.slane %v4305_v20, 4  ;;  %v4285_v57 = vrot.slane %v4284_v12, 4  ;;  %v7740_v18 = vcombine.low %v9789_v56, %v11518_v30  ;;  %v11537_v20 = vld [vmem:[#allocation2 + $0x40] sm:$0xf] }
 0x333   : > { %8928 = vmatmul.mubr.bf16.gmra.mrb[4].mxu1 %v7875_v13  ;;  %v4280_v53 = vsel %vm10745_vm8, %v4275_v28, %v4279_v10  ;;  %v4316_v46 = vshrl.u32 %v4141_v55, 16  ;;  %8814 = vmatpush3.bf16.msra.mxu0 %v9596_v54  ;;  %v4298_v48 = vor.u32 %v4297_v42, %v4294_v44  ;;  %v4313_v29 = vrot.slane %v4311_v19, 5  ;;  %v9601_v54 = vld [vmem:[%s13224_s5 + $0x98] sm:$0xff]   ;;  %v4147_v12 = vld [vmem:[#allocation2 + $0x6c] sm:$0xf] }
 0x334   : > { %v4308_v45 = vor.u32 %v4307_v38, %v4303_v3  ;;  %8960 = vmatpush3.bf16.msra.mxu1 %v9583_v22  ;;  %v4319_v50 = vshll.u32 %v4141_v55, 16  ;;  %8815 = vmatprep.subr.bf16.mxu0 %v9599_v36  ;;  %v4290_v39 = vsel %vm10745_vm8, %v4285_v57, %v4289_v9  ;;  %v4325_v41 = vshll.u32 %v11508_v40, 16  ;;  %v9791_v13 = vld [vmem:[#allocation2 + $0x3c] sm:$0xf] }
 0x335   : > { %v4318_v24 = vrot.slane %v4316_v46, 4  ;;  %v4329_v10 = vshrl.u32 %v11508_v40, 16  ;;  %8961 = vmatprep.subr.bf16.mxu1 %v11501_v62  ;;  %v7876_v15 = vcombine.low %v4280_v53, %v4290_v39  ;;  %8784 = vmatmul.mubr.bf16.gmra.mrb[72].mxu0 %v7739_v25  ;;  %v4299_v22 = vrot.slane %v4298_v48, 4  ;;  %v9592_v25 = vld [vmem:[%s13224_s5 + $0x168] sm:$0xff]   ;;  %v9604_v53 = vld [vmem:[%s13224_s5 + $0xa0] sm:$0xff]  }
 0x336   : > { %v4309_v51 = vrot.slane %v4308_v45, 4  ;;  %v4321_v55 = vrot.slane %v4319_v50, 5  ;;  %8787 = vmatprep.mubr.bf16.mxu0 %v7740_v18  ;;  %v4327_v9 = vrot.slane %v4325_v41, 5  ;;  %v4335_v7 = vshll.u32 %v11514_v37, 16  ;;  %v11555_v50 = vld [vmem:[#allocation2 + $0x74] sm:$0x1] }
 0x337   : > { %v4331_v59 = vrot.slane %v4329_v10, 4  ;;  %v7741_v28 = vcombine.low %v9791_v13, %v11537_v20  ;;  %8816 = vmatpush3.bf16.msra.mxu0 %v9599_v36  ;;  %8931 = vmatprep.mubr.bf16.mxu1 %v7876_v15  ;;  %v4304_v44 = vsel %vm10745_vm8, %v4299_v22, %v4303_v3  ;;  %v4340_v19 = vshrl.u32 %v4144_v35, 16  ;;  %v11551_v36 = vld [vmem:[#allocation2 + $0x70] sm:$0xf]  ;;  %v9792_v41 = vld [vmem:[#allocation2 + $0x48] sm:$0xf] }
 0x338   : > { %v4314_v42 = vsel %vm10745_vm8, %v4309_v51, %v4313_v29  ;;  %v4322_v38 = vor.u32 %v4321_v55, %v4318_v24  ;;  %8962 = vmatpush3.bf16.msra.mxu1 %v11501_v62  ;;  %v4337_v18 = vrot.slane %v4335_v7, 5  ;;  %v4343_v46 = vshll.u32 %v4144_v35, 16  ;;  %8817 = vmatprep.subr.bf16.mxu0 %v9601_v54  ;;  %v11558_v10 = vld [vmem:[#allocation2 + $0x4c] sm:$0xf]  ;;  %v9597_v15 = vld [vmem:[%s13224_s5 + $0x170] sm:$0xff]  }
 0x339   : > { %v7877_v57 = vcombine.low %v4304_v44, %v4314_v42  ;;  %v4332_v56 = vor.u32 %v4331_v59, %v4327_v9  ;;  %8963 = vmatprep.subr.bf16.mxu1 %v9589_v21  ;;  %v4342_v48 = vrot.slane %v4340_v19, 4  ;;  %v4349_v45 = vshll.u32 %v11529_v2, 16  ;;  %v9606_v7 = vld [vmem:[%s13224_s5 + $0xa8] sm:$0xff]   ;;  %v4150_v19 = vld [vmem:[#allocation2 + $0x78] sm:$0xf] }
 0x33a   : > { %v4323_v3 = vrot.slane %v4322_v38, 4  ;;  %v4353_v29 = vshrl.u32 %v11529_v2, 16  ;;  %v4345_v39 = vrot.slane %v4343_v46, 5  ;;  %v4359_v24 = vshll.u32 %v11534_v11, 16 }
 0x33b   : > { %8932 = vmatmul.mubr.bf16.gmra.mrb[8].mxu1 %v7877_v57  ;;  %v4333_v62 = vrot.slane %v4332_v56, 4  ;;  %v7742_v35 = vcombine.low %v9792_v41, %v11558_v10  ;;  %8818 = vmatpush3.bf16.msra.mxu0 %v9601_v54  ;;  %v4351_v51 = vrot.slane %v4349_v45, 5  ;;  %v4364_v59 = vshrl.u32 %v4147_v12, 16 }
 0x33c   : > { %v4328_v22 = vsel %vm10745_vm8, %v4323_v3, %v4327_v9  ;;  %v4355_v55 = vrot.slane %v4353_v29, 4  ;;  %8964 = vmatpush3.bf16.msra.mxu1 %v9589_v21  ;;  %8819 = vmatprep.subr.bf16.mxu0 %v9604_v53  ;;  %v4346_v44 = vor.u32 %v4345_v39, %v4342_v48  ;;  %v4361_v42 = vrot.slane %v4359_v24, 5  ;;  %v11574_v29 = vld [vmem:[#allocation2 + $0x7c] sm:$0xf]  ;;  %v9794_v48 = vld [vmem:[#allocation2 + $0x54] sm:$0xf] }
 0x33d   : > { %v4338_v13 = vsel %vm10745_vm8, %v4333_v62, %v4337_v18  ;;  %v4367_v38 = vshll.u32 %v4147_v12, 16  ;;  %8965 = vmatprep.subr.bf16.mxu1 %v9592_v25  ;;  %8788 = vmatmul.mubr.bf16.gmra.mrb[76].mxu0 %v7741_v28  ;;  %v4366_v57 = vrot.slane %v4364_v59, 4  ;;  %v4373_v56 = vshll.u32 %v11551_v36, 16  ;;  %v11576_v62 = vld [vmem:[#allocation2 + $0x58] sm:$0xf]  ;;  %v9609_v24 = vld [vmem:[%s13224_s5 + $0xb0] sm:$0xff]  }
 0x33e   : > { %v7878_v54 = vcombine.low %v4328_v22, %v4338_v13  ;;  %v4356_v9 = vor.u32 %v4355_v55, %v4351_v51  ;;  %v4347_v21 = vrot.slane %v4346_v44, 4  ;;  %8791 = vmatprep.mubr.bf16.mxu0 %v7742_v35  ;;  %v4377_v3 = vshrl.u32 %v11551_v36, 16  ;;  %v11584_v55 = vld [vmem:[#allocation2 + $0x80] sm:$0x1]  ;;  %v9602_v59 = vld [vmem:[%s13224_s5 + $0x178] sm:$0xff]  }
 0x33f   : > { %v4369_v46 = vrot.slane %v4367_v38, 5  ;;  %v4383_v45 = vshll.u32 %v11555_v50, 16  ;;  %8820 = vmatpush3.bf16.msra.mxu0 %v9604_v53  ;;  %v4375_v18 = vrot.slane %v4373_v56, 5  ;;  %v7743_v28 = vcombine.low %v9794_v48, %v11576_v62  ;;  %13368 = vst [vmem:[#allocation36_spill] sm:$0xff] %v11584_v55  ;;  %v9796_v48 = vld [vmem:[#allocation2 + $0x60] sm:$0xf] }
 0x340   : > { %8935 = vmatprep.mubr.bf16.mxu1 %v7878_v54  ;;  %v4357_v12 = vrot.slane %v4356_v9, 4  ;;  %v4388_v39 = vshrl.u32 %v4150_v19, 16  ;;  %8966 = vmatpush3.bf16.msra.mxu1 %v9592_v25  ;;  %v4352_v41 = vsel %vm10745_vm8, %v4347_v21, %v4351_v51  ;;  %v4379_v22 = vrot.slane %v4377_v3, 4  ;;  %v4153_v54 = vld [vmem:[#allocation2 + $0x84] sm:$0xf] }
 0x341   : > { %v4370_v35 = vor.u32 %v4369_v46, %v4366_v57  ;;  %v4385_v53 = vrot.slane %v4383_v45, 5  ;;  %8967 = vmatprep.subr.bf16.mxu1 %v9597_v15  ;;  %8821 = vmatprep.subr.bf16.mxu0 %v9606_v7  ;;  %v4391_v44 = vshll.u32 %v4150_v19, 16  ;;  %v4397_v38 = vshll.u32 %v11574_v29, 16  ;;  %v11593_v21 = vld [vmem:[#allocation2 + $0x88] sm:$0xf]  ;;  %v9610_v19 = vld [vmem:[%s13224_s5 + $0xb8] sm:$0xff]  }
 0x342   : > { %v4362_v25 = vsel %vm10745_vm8, %v4357_v12, %v4361_v42  ;;  %v4390_v13 = vrot.slane %v4388_v39, 4  ;;  %v4380_v57 = vor.u32 %v4379_v22, %v4375_v18  ;;  %v4401_v56 = vshrl.u32 %v11574_v29, 16 }
 0x343   : > { %v7879_v51 = vcombine.low %v4352_v41, %v4362_v25  ;;  %v4371_v9 = vrot.slane %v4370_v35, 4  ;;  %8822 = vmatpush3.bf16.msra.mxu0 %v9606_v7  ;;  %v4393_v46 = vrot.slane %v4391_v44, 5  ;;  %v4399_v3 = vrot.slane %v4397_v38, 5  ;;  %v11607_v35 = vld [vmem:[%s13224_s5 + $0x180] sm:$0xff]   ;;  %v11609_v25 = vld [vmem:[#allocation2 + $0x8c] sm:$0x1] }
 0x344   : > { %v4407_v45 = vshll.u32 %v11584_v55, 16  ;;  %v7744_v42 = vcombine.low %v9796_v48, %v11596_v31  ;;  %8968 = vmatpush3.bf16.msra.mxu1 %v9597_v15  ;;  %8823 = vmatprep.subr.bf16.mxu0 %v9609_v24  ;;  %v4381_v7 = vrot.slane %v4380_v57, 4  ;;  %v4403_v39 = vrot.slane %v4401_v56, 4  ;;  %13370 = vst [vmem:[#allocation38_spill] sm:$0xff] %v11609_v25  ;;  %v4156_v56 = vld [vmem:[#allocation2 + $0x90] sm:$0xf] }
 0x345   : > { %8936 = vmatmul.mubr.bf16.gmra.mrb[12].mxu1 %v7879_v51  ;;  %v4376_v12 = vsel %vm10745_vm8, %v4371_v9, %v4375_v18  ;;  %v4412_v41 = vshrl.u32 %v4153_v54, 16  ;;  %8969 = vmatprep.subr.bf16.mxu1 %v9602_v59  ;;  %v4394_v15 = vor.u32 %v4393_v46, %v4390_v13  ;;  %v4415_v44 = vshll.u32 %v4153_v54, 16  ;;  %v11615_v46 = vld [vmem:[#allocation2 + $0x94] sm:$0xf] }
 0x346   : > { %8792 = vmatmul.mubr.bf16.gmra.mrb[80].mxu0 %v7743_v28  ;;  %v4409_v22 = vrot.slane %v4407_v45, 5  ;;  %v4421_v38 = vshll.u32 %v11593_v21, 16  ;;  %v4386_v18 = vsel %vm10745_vm8, %v4381_v7, %v4385_v53  ;;  %v4404_v51 = vor.u32 %v4403_v39, %v4399_v3  ;;  %13371 = vst [vmem:[#allocation39_spill] sm:$0xff] %v11615_v46  ;;  %v9798_v53 = vld [vmem:[#allocation2 + $0x6c] sm:$0xf] }
 0x347   : > { %8795 = vmatprep.mubr.bf16.mxu0 %v7744_v42  ;;  %v4414_v9 = vrot.slane %v4412_v41, 4  ;;  %v4425_v57 = vshrl.u32 %v11593_v21, 16  ;;  %8824 = vmatpush3.bf16.msra.mxu0 %v9609_v24  ;;  %v7880_v48 = vcombine.low %v4376_v12, %v4386_v18  ;;  %v4395_v55 = vrot.slane %v4394_v15, 4  ;;  %v11618_v7 = vld [vmem:[#allocation2 + $0x70] sm:$0xf] }
 0x348   : > { %v4417_v28 = vrot.slane %v4415_v44, 5  ;;  %v4423_v13 = vrot.slane %v4421_v38, 5  ;;  %8970 = vmatpush3.bf16.msra.mxu1 %v9602_v59  ;;  %8825 = vmatprep.subr.bf16.mxu0 %v9610_v19  ;;  %v4405_v54 = vrot.slane %v4404_v51, 4  ;;  %v4431_v31 = vshll.u32 %v11609_v25, 16  ;;  %13372 = vst [vmem:[#allocation40_spill] sm:$0xff] %v11618_v7 }
 0x349   : > { %v4427_v45 = vrot.slane %v4425_v57, 4  ;;  %v7745_v42 = vcombine.low %v9798_v53, %v11618_v7  ;;  %9003 = vmatprep.subr.bf16.mxu1 %v11607_v35  ;;  %8939 = vmatprep.mubr.bf16.mxu1 %v7880_v48  ;;  %v4400_v24 = vsel %vm10745_vm8, %v4395_v55, %v4399_v3  ;;  %v11624_v39 = vld [vmem:[#allocation2 + $0x98] sm:$0x1]  ;;  %v4436_v59 = vshrl.u32 %v4156_v56, 16  ;;  %v4159_v51 = vld [vmem:[#allocation2 + $0x9c] sm:$0xf] }
 0x34a   : > { %v4418_v12 = vor.u32 %v4417_v28, %v4414_v9  ;;  %13373 = vst [vmem:[#allocation41_spill] sm:$0xff] %v11624_v39  ;;  %v4439_v41 = vshll.u32 %v4156_v56, 16  ;;  %v4410_v15 = vsel %vm10745_vm8, %v4405_v54, %v4409_v22  ;;  %v4433_v38 = vrot.slane %v4431_v31, 5  ;;  %v11632_v28 = vld [vmem:[#allocation2 + $0xa0] sm:$0xf] }
 0x34b   : > { %v4428_v44 = vor.u32 %v4427_v45, %v4423_v13  ;;  %v4445_v18 = vshll.u32 %v11615_v46, 16  ;;  %8826 = vmatpush3.bf16.msra.mxu0 %v9610_v19  ;;  %v7881_v57 = vcombine.low %v4400_v24, %v4410_v15  ;;  %v4438_v48 = vrot.slane %v4436_v59, 4  ;;  %13375 = vst [vmem:[#allocation42_spill] sm:$0xff] %v11632_v28  ;;  %v9800_v22 = vld [vmem:[#allocation2 + $0x78] sm:$0xf] }
 0x34c   : > { %v4419_v53 = vrot.slane %v4418_v12, 4  ;;  %v4441_v25 = vrot.slane %v4439_v41, 5  ;;  %v13374_v7 = vmov 0.0|0.0   ;;  %v4449_v9 = vshrl.u32 %v11615_v46, 16  ;;  %v11636_v54 = vld [vmem:[#allocation2 + $0x7c] sm:$0xf] }
 0x34d   : > { %9206 = vmatprep.subr.bf16.mxu0 %v13374_v7  ;;  %v4429_v55 = vrot.slane %v4428_v44, 4  ;;  %v4447_v3 = vrot.slane %v4445_v18, 5  ;;  %v4455_v56 = vshll.u32 %v11624_v39, 16  ;;  %8940 = vmatmul.mubr.bf16.gmra.mrb[16].mxu1 %v7881_v57  ;;  %13376 = vst [vmem:[#allocation43_spill] sm:$0xff] %v11636_v54  ;;  %v7746_v45 = vcombine.low %v9800_v22, %v11636_v54  ;;  %v11639_v24 = vld [vmem:[#allocation2 + $0xa4] sm:$0x1] }
 0x34e   : > { %v4424_v31 = vsel %vm10745_vm8, %v4419_v53, %v4423_v13  ;;  %8796 = vmatmul.mubr.bf16.gmra.mrb[84].mxu0 %v7745_v42  ;;  %v4442_v19 = vor.u32 %v4441_v25, %v4438_v48  ;;  %13377 = vst [vmem:[#allocation44_spill] sm:$0xff] %v11639_v24  ;;  %v4460_v12 = vshrl.u32 %v4159_v51, 16  ;;  %v4451_v41 = vrot.slane %v4449_v9, 4  ;;  %v4162_v18 = vld [vmem:[#allocation2 + $0xa8] sm:$0xf] }
 0x34f   : > { %v4434_v59 = vsel %vm10745_vm8, %v4429_v55, %v4433_v38  ;;  %v4457_v15 = vrot.slane %v4455_v56, 5  ;;  %v4463_v44 = vshll.u32 %v4159_v51, 16  ;;  %8799 = vmatprep.mubr.bf16.mxu0 %v7746_v45  ;;  %v4469_v25 = vshll.u32 %v11632_v28, 16  ;;  %v11646_v39 = vld [vmem:[#allocation2 + $0xac] sm:$0xf] }
 0x350   : > { %v7882_v57 = vcombine.low %v4424_v31, %v4434_v59  ;;  %v4443_v7 = vrot.slane %v4442_v19, 4  ;;  %v4462_v13 = vrot.slane %v4460_v12, 4  ;;  %v4452_v42 = vor.u32 %v4451_v41, %v4447_v3  ;;  %13378 = vst [vmem:[#allocation45_spill] sm:$0xff] %v11646_v39  ;;  %v9802_v55 = vld [vmem:[#allocation2 + $0x84] sm:$0xf] }
 0x351   : > { %v4465_v53 = vrot.slane %v4463_v44, 5  ;;  %v4473_v48 = vshrl.u32 %v11632_v28, 16  ;;  %v4479_v22 = vshll.u32 %v11639_v24, 16  ;;  %v4471_v51 = vrot.slane %v4469_v25, 5  ;;  %v11650_v9 = vld [vmem:[#allocation2 + $0x88] sm:$0xf] }
 0x352   : > { %8943 = vmatprep.mubr.bf16.mxu1 %v7882_v57  ;;  %v4448_v38 = vsel %vm10745_vm8, %v4443_v7, %v4447_v3  ;;  %13379 = vst [vmem:[#allocation46_spill] sm:$0xff] %v11650_v9  ;;  %v7747_v56 = vcombine.low %v9802_v55, %v11650_v9  ;;  %v11653_v31 = vld [vmem:[#allocation2 + $0xb0] sm:$0x1]  ;;  %v4484_v19 = vshrl.u32 %v4162_v18, 16  ;;  %v4453_v45 = vrot.slane %v4452_v42, 4 }
 0x353   : > { %13380 = vst [vmem:[#allocation47_spill] sm:$0xff] %v11653_v31  ;;  %v4466_v12 = vor.u32 %v4465_v53, %v4462_v13  ;;  %v4475_v59 = vrot.slane %v4473_v48, 4  ;;  %v4481_v41 = vrot.slane %v4479_v22, 5  ;;  %v4487_v24 = vshll.u32 %v4162_v18, 16  ;;  %v4165_v9 = vld [vmem:[#allocation2 + $0xb4] sm:$0xf] }
 0x354   : > { %v4486_v44 = vrot.slane %v4484_v19, 4  ;;  %v4493_v57 = vshll.u32 %v11646_v39, 16  ;;  %v4497_v28 = vshrl.u32 %v11646_v39, 16  ;;  %v4458_v7 = vsel %vm10745_vm8, %v4453_v45, %v4457_v15  ;;  %v11660_v54 = vld [vmem:[#allocation2 + $0xb8] sm:$0xf] }
 0x355   : > { %v4467_v3 = vrot.slane %v4466_v12, 4  ;;  %v4476_v25 = vor.u32 %v4475_v59, %v4471_v51  ;;  %v4503_v55 = vshll.u32 %v11653_v31, 16  ;;  %v7883_v42 = vcombine.low %v4448_v38, %v4458_v7  ;;  %v11662_v18 = vld [vmem:[#allocation2 + $0xbc] sm:$0x1]  ;;  %v9804_v15 = vld [vmem:[#allocation2 + $0x90] sm:$0xf] }
 0x356   : > { %8800 = vmatmul.mubr.bf16.gmra.mrb[88].mxu0 %v7747_v56  ;;  %v4489_v13 = vrot.slane %v4487_v24, 5  ;;  %v4495_v53 = vrot.slane %v4493_v57, 5  ;;  %v4499_v48 = vrot.slane %v4497_v28, 4  ;;  %v7748_v45 = vcombine.low %v9804_v15, %v11342_v34  ;;  %v1666_v56 = vld [vmem:[#allocation2 + $0xc8] sm:$0x1] }
 0x357   : > { %v4472_v22 = vsel %vm10745_vm8, %v4467_v3, %v4471_v51  ;;  %v4477_v19 = vrot.slane %v4476_v25, 4  ;;  %v4505_v39 = vrot.slane %v4503_v55, 5  ;;  %8944 = vmatmul.mubr.bf16.gmra.mrb[20].mxu1 %v7883_v42  ;;  %v4508_v31 = vshrl.u32 %v4165_v9, 16  ;;  %v4168_v25 = vld [vmem:[#allocation2 + $0xc0] sm:$0xf] }
 0x358   : > { %v4490_v12 = vor.u32 %v4489_v13, %v4486_v44  ;;  %v4500_v59 = vor.u32 %v4499_v48, %v4495_v53  ;;  %v4511_v46 = vshll.u32 %v4165_v9, 16  ;;  %8803 = vmatprep.mubr.bf16.mxu0 %v7748_v45  ;;  %v4517_v28 = vshll.u32 %v11660_v54, 16  ;;  %v11672_v13 = vld [vmem:[#allocation2 + $0xc4] sm:$0xf] }
 0x359   : > { %v4482_v24 = vsel %vm10745_vm8, %v4477_v19, %v4481_v41  ;;  %v4521_v38 = vshrl.u32 %v11660_v54, 16  ;;  %v4527_v51 = vshll.u32 %v11662_v18, 16  ;;  %v4510_v34 = vrot.slane %v4508_v31, 4  ;;  %v11678_v19 = vld [vmem:[#allocation2 + $0xa0] sm:$0xf] }
 0x35a   : > { %v7884_v57 = vcombine.low %v4472_v22, %v4482_v24  ;;  %v4491_v7 = vrot.slane %v4490_v12, 4  ;;  %v4501_v3 = vrot.slane %v4500_v59, 4  ;;  %v4513_v44 = vrot.slane %v4511_v46, 5 }
 0x35b   : > { %v4519_v55 = vrot.slane %v4517_v28, 5  ;;  %v4523_v42 = vrot.slane %v4521_v38, 4  ;;  %v4529_v9 = vrot.slane %v4527_v51, 5  ;;  %v7749_v22 = vcombine.low %v11371_v26, %v11678_v19  ;;  %v4877_v26 = vld [vmem:[#allocation2 + $0xc] sm:$0xe] }
 0x35c   : > { %8947 = vmatprep.mubr.bf16.mxu1 %v7884_v57  ;;  %v4496_v41 = vsel %vm10745_vm8, %v4491_v7, %v4495_v53  ;;  %v4506_v48 = vsel %vm10745_vm8, %v4501_v3, %v4505_v39  ;;  %v1667_v46 = vsel %vm10608_vm5, 0, %v1666_v56  ;;  %v4514_v15 = vor.u32 %v4513_v44, %v4510_v34  ;;  %v11686_v39 = vld [vmem:[#allocation2 + $0xac] sm:$0xf] }
 0x35d   : > { %v7885_v31 = vcombine.low %v4496_v41, %v4506_v48  ;;  %v4524_v45 = vor.u32 %v4523_v42, %v4519_v55  ;;  %1668 = vst [vmem:[#allocation2 + $0xc8] sm:$0x1] %v1667_v46  ;;  %v4532_v12 = vshrl.u32 %v4168_v25, 16  ;;  %v4535_v59 = vshll.u32 %v4168_v25, 16  ;;  %v4878_v41 = vld [vmem:[#allocation2 + $0x18] sm:$0xe] }
 0x35e   : > { %8804 = vmatmul.mubr.bf16.gmra.mrb[92].mxu0 %v7749_v22  ;;  %v4541_v53 = vshll.u32 %v11672_v13, 16  ;;  %v4545_v24 = vshrl.u32 %v11672_v13, 16  ;;  %v7750_v28 = vcombine.low %v11380_v63, %v11686_v39  ;;  %v4515_v38 = vrot.slane %v4514_v15, 4  ;;  %v9807_v48 = vld [vmem:[#allocation2 + $0x14] sm:$0x1] }
 0x35f   : > { %v4525_v51 = vrot.slane %v4524_v45, 4  ;;  %v4534_v56 = vrot.slane %v4532_v12, 4  ;;  %8948 = vmatmul.mubr.bf16.gmra.mrb[24].mxu1 %v7885_v31  ;;  %v4537_v57 = vrot.slane %v4535_v59, 5  ;;  %v7896_v44 = vrot.slane %v4877_v26, 9  ;;  %v4879_v12 = vld [vmem:[#allocation2 + $0x24] sm:$0xe] }
 0x360   : > { %v11690_v7 = vrot.slane %v4541_v53, 5  ;;  %v4547_v3 = vrot.slane %v4545_v24, 4  ;;  %8807 = vmatprep.mubr.bf16.mxu0 %v7750_v28  ;;  %v4520_v34 = vsel %vm10745_vm8, %v4515_v38, %v4519_v55  ;;  %v4943_v42 = vrot.slane %v11386_v5, 5  ;;  %v3252_v59 = vld [vmem:[#allocation2] sm:$0xe] }
 0x361   : > { %v4530_v25 = vsel %vm10745_vm8, %v4525_v51, %v4529_v9  ;;  %v3315_v22 = vrot.slane %v9807_v48, 5  ;;  %v4538_v31 = vor.u32 %v4537_v57, %v4534_v56  ;;  %v4946_v9 = vrot.slane %v11405_v17, 5 }
 0x362   : > { %v7886_v46 = vcombine.low %v4520_v34, %v4530_v25  ;;  %v4548_v15 = vor.u32 %v4547_v3, %v11690_v7  ;;  %v11704_v55 = vsel %vm11696_vm15, %v7896_v44, %v4943_v42  ;;  %v4945_v45 = vrot.slane %v4943_v42, 4  ;;  %v3253_v3 = vld [vmem:[#allocation2 + $0xc] sm:$0xe]  ;;  %v4880_v34 = vld [vmem:[#allocation2 + $0x30] sm:$0xe] }
 0x363   : > { %v11707_v24 = vrot.slane %v4538_v31, 4  ;;  %v7751_v5 = vcombine.low %v11411_v60, %v11413_v23  ;;  %v7897_v28 = vrot.slane %v4878_v41, 9  ;;  %v4950_v26 = vrot.slane %v11424_v16, 5 }
 0x364   : > { %8951 = vmatprep.mubr.bf16.mxu1 %v7886_v46  ;;  %v2202_v53 = vld [vmem:[#allocation2 + $0xc8] sm:$0x1]  ;;  %v13383_v38 = vrot.slane %v11108_v1, 4  ;;  %v11716_v56 = vrot.slane %v4548_v15, 4  ;;  %v11720_v17 = vsel %vm11696_vm15, %v4945_v45, %v4946_v9  ;;  %v4957_v57 = vrot.slane %v11435_v4, 5 }
 0x365   : > { %v4544_v60 = vsel %vm10745_vm8, %v11707_v24, %v11690_v7  ;;  %v4952_v1 = vrot.slane %v4950_v26, 4  ;;  %v4953_v23 = vrot.slane %v11428_v6, 5  ;;  %v7898_v16 = vrot.slane %v4879_v12, 9  ;;  %v9808_v46 = vld [vmem:[#allocation2 + $0x4] sm:$0xf] }
 0x366   : > { %v2203_v51 = vsel %vm10598_vm4, %v13383_v38, %v2202_v53  ;;  %8808 = vmatmul.mubr.bf16.gmra.mrb[96].mxu0 %v7751_v5  ;;  %v7928_v25 = vcombine.low %v11704_v55, %v11720_v17  ;;  %v4959_v44 = vrot.slane %v4957_v57, 4  ;;  %v4960_v42 = vrot.slane %v11439_v27, 5  ;;  %v9809_v6 = vld [vmem:[#allocation2 + $0x8] sm:$0x1]  ;;  %v3254_v45 = vld [vmem:[#allocation2 + $0x18] sm:$0xe] }
 0x367   : > { %2204 = vst [vmem:[#allocation2 + $0xc8] sm:$0x1] %v2203_v51  ;;  %v7760_v4 = vrot.slane %v3252_v59, 9  ;;  %v11733_v41 = vsel %vm11696_vm15, %v7897_v28, %v4950_v26  ;;  %v11737_v48 = vsel %vm11696_vm15, %v4952_v1, %v4953_v23  ;;  %v3305_v31 = vrot.slane %v9808_v46, 5  ;;  %v9810_v27 = vld [vmem:[#allocation2 + $0x10] sm:$0xf] }
 0x368   : > { %v3308_v15 = vrot.slane %v9809_v6, 5  ;;  %v11741_v9 = vsel %vm11696_vm15, %v4959_v44, %v4960_v42  ;;  %v7761_v12 = vrot.slane %v3253_v3, 9  ;;  %v3312_v59 = vrot.slane %v9810_v27, 5  ;;  %v4881_v44 = vld [vmem:[#allocation2 + $0x3c] sm:$0xe] }
 0x369   : > { %v7899_v53 = vrot.slane %v4880_v34, 9  ;;  %v11745_v5 = vsel %vm11696_vm15, %v7898_v16, %v4957_v57  ;;  %v3306_v28 = vsel %vm11696_vm15, %v7760_v4, %v3305_v31  ;;  %v3307_v26 = vrot.slane %v3305_v31, 4  ;;  %v3257_v7 = vld [vmem:[#allocation2 + $0x3c] sm:$0xe] }
 0x36a   : > { %v4964_v38 = vrot.slane %v11445_v33, 5  ;;  %v7929_v51 = vcombine.low %v11733_v41, %v11737_v48  ;;  %v7930_v1 = vcombine.low %v11745_v5, %v11741_v9  ;;  %v3314_v3 = vrot.slane %v3312_v59, 4 }
 0x36b   : > { %v7762_v23 = vrot.slane %v3254_v45, 9  ;;  %v3309_v34 = vsel %vm11696_vm15, %v3307_v26, %v3308_v15  ;;  %v4967_v16 = vrot.slane %v11450_v49, 5  ;;  %v3319_v42 = vrot.slane %v11467_v8, 5  ;;  %v3255_v45 = vld [vmem:[#allocation2 + $0x24] sm:$0xe] }
 0x36c   : > { %v4966_v57 = vrot.slane %v4964_v38, 4  ;;  %v7792_v33 = vcombine.low %v3306_v28, %v3309_v34  ;;  %v3313_v46 = vsel %vm11696_vm15, %v7761_v12, %v3312_v59  ;;  %v3316_v31 = vsel %vm11696_vm15, %v3314_v3, %v3315_v22  ;;  %v9811_v28 = vld [vmem:[#allocation2 + $0x20] sm:$0x1] }
 0x36d   : > { %v11766_v6 = vsel %vm11696_vm15, %v7899_v53, %v4964_v38  ;;  %v7793_v27 = vcombine.low %v3313_v46, %v3316_v31  ;;  %v7900_v8 = vrot.slane %v4881_v44, 9  ;;  %v3320_v12 = vsel %vm11696_vm15, %v7762_v23, %v3319_v42  ;;  %v3256_v46 = vld [vmem:[#allocation2 + $0x30] sm:$0xe] }
 0x36e   : > { %v11758_v4 = vld [vmem:[#allocation2 + $0xc8] sm:$0x1]  ;;  %v11771_v49 = vsel %vm11696_vm15, %v4966_v57, %v4967_v16  ;;  %8827 = vmatprep.mubr.bf16.mxu0 %v7792_v33  ;;  %v3321_v59 = vrot.slane %v3319_v42, 4  ;;  %v3322_v22 = vrot.slane %v9811_v28, 5  ;;  %v4971_v26 = vrot.slane %v11463_v47, 5 }
 0x36f   : > { %v4551_v15 = vshll.u32 %v11758_v4, 16  ;;  %8828 = vmatmul.mubr.bf16.vlgmr.msra.gmra.mrb[68].mxu0 %v7793_v27  ;;  %v7931_v38 = vcombine.low %v11766_v6, %v11771_v49  ;;  %v7763_v3 = vrot.slane %v3255_v45, 9  ;;  %v3326_v34 = vrot.slane %v11492_v32, 5  ;;  %v4882_v57 = vld [vmem:[#allocation2 + $0x48] sm:$0xe] }
 0x370   : > { %v3323_v44 = vsel %vm11696_vm15, %v3321_v59, %v3322_v22  ;;  %v4973_v16 = vrot.slane %v4971_v26, 4  ;;  %v4974_v23 = vrot.slane %v11471_v0, 5  ;;  %v9812_v42 = vld [vmem:[#allocation2 + $0x2c] sm:$0x1]  ;;  %v11787_v45 = vsel %vm11696_vm15, %v7900_v8, %v4971_v26 }
 0x371   : > { %v4553_v53 = vrot.slane %v4551_v15, 5  ;;  %v3329_v33 = vrot.slane %v9812_v42, 5  ;;  %v7794_v31 = vcombine.low %v3320_v12, %v3323_v44  ;;  %v3328_v32 = vrot.slane %v3326_v34, 4  ;;  %v4884_v42 = vld [vmem:[#allocation2 + $0x60] sm:$0xe] }
 0x372   : > { %v11796_v0 = vsel %vm11696_vm15, %v4973_v16, %v4974_v23  ;;  %v7901_v27 = vrot.slane %v4882_v57, 9  ;;  %v4978_v59 = vrot.slane %v11485_v43, 5  ;;  %v3327_v8 = vsel %vm11696_vm15, %v7763_v3, %v3326_v34  ;;  %v9813_v3 = vld [vmem:[#allocation2 + $0x38] sm:$0x1] }
 0x373   : > { %v4554_v47 = vsel %vm10745_vm8, %v11716_v56, %v4553_v53  ;;  %v4883_v56 = vld [vmem:[#allocation2 + $0x54] sm:$0xe]  ;;  %8831 = vmatprep.mubr.bf16.mxu0 %v7794_v31  ;;  %v3330_v12 = vsel %vm11696_vm15, %v3328_v32, %v3329_v33  ;;  %v7764_v28 = vrot.slane %v3256_v46, 9  ;;  %v3333_v22 = vrot.slane %v11518_v30, 5  ;;  %v3258_v33 = vld [vmem:[#allocation2 + $0x48] sm:$0xe] }
 0x374   : > { %v7887_v15 = vcombine.low %v4544_v60, %v4554_v47  ;;  %v7932_v24 = vcombine.low %v11787_v45, %v11796_v0  ;;  %v7795_v60 = vcombine.low %v3327_v8, %v3330_v12  ;;  %v4980_v26 = vrot.slane %v4978_v59, 4  ;;  %v9814_v32 = vld [vmem:[#allocation2 + $0x44] sm:$0x1]  ;;  %v4885_v8 = vld [vmem:[#allocation2 + $0x6c] sm:$0xe] }
 0x375   : > { %v4981_v43 = vrot.slane %v11496_v58, 5  ;;  %v3335_v53 = vrot.slane %v3333_v22, 4  ;;  %v3336_v34 = vrot.slane %v9813_v3, 5  ;;  %v7902_v57 = vrot.slane %v4883_v56, 9 }
 0x376   : > { %8952 = vmatmul.mubr.bf16.gmra.mrb[28].mxu1 %v7887_v15  ;;  %v4985_v44 = vrot.slane %v11508_v40, 5  ;;  %v11813_v30 = vsel %vm11696_vm15, %v7901_v27, %v4978_v59  ;;  %v7765_v23 = vrot.slane %v3257_v7, 9  ;;  %v3340_v58 = vrot.slane %v11537_v20, 5 }
 0x377   : > { %8971 = vmatprep.mubr.bf16.mxu1 %v7928_v25  ;;  %v11817_v16 = vsel %vm11696_vm15, %v4980_v26, %v4981_v43  ;;  %8832 = vmatmul.mubr.bf16.gmra.mrb[72].mxu0 %v7795_v60  ;;  %v3334_v55 = vsel %vm11696_vm15, %v7764_v28, %v3333_v22  ;;  %v3337_v17 = vsel %vm11696_vm15, %v3335_v53, %v3336_v34  ;;  %v4988_v25 = vrot.slane %v11514_v37, 5  ;;  %v9611_v37 = vld [vmem:[%s13224_s5 + $0x188] sm:$0xff]   ;;  %v3259_v60 = vld [vmem:[#allocation2 + $0x54] sm:$0xe]  ;;  %v9815_v34 = vld [vmem:[#allocation2 + $0x50] sm:$0x1] }
 0x378   : > { %v4987_v40 = vrot.slane %v4985_v44, 4  ;;  %v7933_v46 = vcombine.low %v11813_v30, %v11817_v16  ;;  %v7796_v47 = vcombine.low %v3334_v55, %v3337_v17  ;;  %v3342_v31 = vrot.slane %v3340_v58, 4  ;;  %v9816_v17 = vld [vmem:[#allocation2 + $0x5c] sm:$0x1]  ;;  %v3264_v30 = vld [vmem:[#allocation2 + $0x90] sm:$0xe] }
 0x379   : > { %v3343_v15 = vrot.slane %v9814_v32, 5  ;;  %v11829_v20 = vsel %vm11696_vm15, %v7902_v57, %v4985_v44  ;;  %v3341_v27 = vsel %vm11696_vm15, %v7765_v23, %v3340_v58  ;;  %v7903_v59 = vrot.slane %v4884_v42, 9  ;;  %v3260_v58 = vld [vmem:[#allocation2 + $0x60] sm:$0xe] }
 0x37a   : > { %v4992_v56 = vrot.slane %v11529_v2, 5  ;;  %8835 = vmatprep.mubr.bf16.mxu0 %v7796_v47  ;;  %v11839_v12 = vsel %vm11696_vm15, %v4987_v40, %v4988_v25  ;;  %v7766_v22 = vrot.slane %v3258_v33, 9  ;;  %v3347_v7 = vrot.slane %v11558_v10, 5 }
 0x37b   : > { %v3344_v28 = vsel %vm11696_vm15, %v3342_v31, %v3343_v15  ;;  %v4995_v53 = vrot.slane %v11534_v11, 5  ;;  %v3350_v57 = vrot.slane %v9815_v34, 5  ;;  %v7904_v44 = vrot.slane %v4885_v8, 9  ;;  %v4887_v31 = vld [vmem:[#allocation2 + $0x84] sm:$0xe] }
 0x37c   : > { %v7797_v26 = vcombine.low %v3341_v27, %v3344_v28  ;;  %v11846_v2 = vsel %vm11696_vm15, %v7903_v59, %v4992_v56  ;;  %v4994_v43 = vrot.slane %v4992_v56, 4  ;;  %v3349_v3 = vrot.slane %v3347_v7, 4  ;;  %v13384_v59 = vld [vmem:[#allocation37_spill] sm:$0xff]  ;;  %v9613_v28 = vld [vmem:[%s13224_s5 + $0x198] sm:$0xff]  }
 0x37d   : > { %v4999_v23 = vrot.slane %v11551_v36, 5  ;;  %v3348_v11 = vsel %vm11696_vm15, %v7766_v22, %v3347_v7  ;;  %v7767_v41 = vrot.slane %v3259_v60, 9  ;;  %v3354_v48 = vrot.slane %v11576_v62, 5  ;;  %v9612_v36 = vld [vmem:[%s13224_s5 + $0x190] sm:$0xff]   ;;  %v3261_v8 = vld [vmem:[#allocation2 + $0x6c] sm:$0xe] }
 0x37e   : > { %8972 = vmatmul.mubr.bf16.vlgmr.msra.gmra.mrb[0].mxu1 %v7929_v51  ;;  %v11859_v10 = vsel %vm11696_vm15, %v4994_v43, %v4995_v53  ;;  %v4886_v51 = vld [vmem:[#allocation2 + $0x78] sm:$0xe]  ;;  %v3351_v9 = vsel %vm11696_vm15, %v3349_v3, %v3350_v57  ;;  %v3357_v40 = vrot.slane %v9816_v17, 5  ;;  %v7768_v27 = vrot.slane %v3260_v58, 9  ;;  %v13385_v7 = vld [vmem:[#allocation36_spill] sm:$0xff] }
 0x37f   : > { %9004 = vmatpush3.bf16.msra.mxu1 %v11607_v35  ;;  %8975 = vmatprep.mubr.bf16.mxu1 %v7930_v1  ;;  %v7935_v35 = vcombine.low %v11846_v2, %v11859_v10  ;;  %v5001_v5 = vrot.slane %v4999_v23, 4  ;;  %v5002_v1 = vrot.slane %v11555_v50, 5  ;;  %v7798_v42 = vcombine.low %v3348_v11, %v3351_v9  ;;  %v9817_v43 = vld [vmem:[#allocation2 + $0x68] sm:$0x1]  ;;  %v13386_v11 = vld [vmem:[#allocation40_spill] sm:$0xff]  ;;  %v13388_v17 = vld [vmem:[#allocation39_spill] sm:$0xff] }
 0x380   : > { %9005 = vmatprep.subr.bf16.mxu1 %v9611_v37  ;;  %8836 = vmatmul.mubr.bf16.gmra.mrb[76].mxu0 %v7797_v26  ;;  %v11874_v62 = vsel %vm11696_vm15, %v7904_v44, %v4999_v23  ;;  %v3356_v55 = vrot.slane %v3354_v48, 4  ;;  %v3355_v33 = vsel %vm11696_vm15, %v7767_v41, %v3354_v48  ;;  %v7905_v47 = vrot.slane %v4886_v51, 9  ;;  %v4888_v48 = vld [vmem:[#allocation2 + $0x90] sm:$0xe]  ;;  %v3262_v9 = vld [vmem:[#allocation2 + $0x78] sm:$0xe] }
 0x381   : > { %v11878_v25 = vsel %vm11696_vm15, %v5001_v5, %v5002_v1  ;;  %v5006_v50 = vrot.slane %v11574_v29, 5  ;;  %8839 = vmatprep.mubr.bf16.mxu0 %v7798_v42  ;;  %v3361_v56 = vrot.slane %v13384_v59, 5  ;;  %v5009_v60 = vrot.slane %v13385_v7, 5  ;;  %v9614_v5 = vld [vmem:[%s13224_s5 + $0x1a0] sm:$0xff]   ;;  %v3266_v10 = vld [vmem:[#allocation2 + $0xa8] sm:$0xe] }
 0x382   : > { %v7936_v32 = vcombine.low %v11874_v62, %v11878_v25  ;;  %v3358_v15 = vsel %vm11696_vm15, %v3356_v55, %v3357_v40  ;;  %v3364_v53 = vrot.slane %v9817_v43, 5  ;;  %v7906_v3 = vrot.slane %v4887_v31, 9  ;;  %v9619_v62 = vld [vmem:[%s13224_s5 + $0x1c0] sm:$0xff]   ;;  %v1613_v25 = vld [vmem:[#allocation2 + $0xcc] sm:$0x1] }
 0x383   : > { %9006 = vmatpush3.bf16.msra.mxu1 %v9611_v37  ;;  %v7799_v22 = vcombine.low %v3355_v33, %v3358_v15  ;;  %v11893_v29 = vsel %vm11696_vm15, %v7905_v47, %v5006_v50  ;;  %v5008_v37 = vrot.slane %v5006_v50, 4  ;;  %v3363_v26 = vrot.slane %v3361_v56, 4  ;;  %v4889_v33 = vld [vmem:[#allocation2 + $0x9c] sm:$0xe] }
 0x384   : > { %9007 = vmatprep.subr.bf16.mxu1 %v9612_v36  ;;  %v5013_v34 = vrot.slane %v11593_v21, 5  ;;  %v3362_v44 = vsel %vm11696_vm15, %v7768_v27, %v3361_v56  ;;  %v7769_v23 = vrot.slane %v3261_v8, 9  ;;  %v3368_v41 = vrot.slane %v13386_v11, 5  ;;  %v13389_v15 = vld [vmem:[#allocation43_spill] sm:$0xff]  ;;  %v9615_v56 = vld [vmem:[%s13224_s5 + $0x1a8] sm:$0xff]  }
 0x385   : > { %v11902_v57 = vsel %vm11696_vm15, %v5008_v37, %v5009_v60  ;;  %v3365_v6 = vsel %vm11696_vm15, %v3363_v26, %v3364_v53  ;;  %v7907_v55 = vrot.slane %v4888_v48, 9  ;;  %v5020_v40 = vrot.slane %v13388_v17, 5  ;;  %v13390_v37 = vld [vmem:[#allocation41_spill] sm:$0xff]  ;;  %v9819_v26 = vld [vmem:[#allocation2 + $0x80] sm:$0x1] }
 0x386   : > { %8976 = vmatmul.mubr.bf16.gmra.mrb[4].mxu1 %v7931_v38  ;;  %v7937_v21 = vcombine.low %v11893_v29, %v11902_v57  ;;  %v5015_v49 = vrot.slane %v5013_v34, 4  ;;  %v13387_v38 = vld [vmem:[#allocation38_spill] sm:$0xff]  ;;  %v7800_v1 = vcombine.low %v3362_v44, %v3365_v6  ;;  %v11920_v45 = vsel %vm11696_vm15, %v7906_v3, %v5013_v34  ;;  %v3263_v44 = vld [vmem:[#allocation2 + $0x84] sm:$0xe] }
 0x387   : > { %8979 = vmatprep.mubr.bf16.mxu1 %v7932_v24  ;;  %9008 = vmatpush3.bf16.msra.mxu1 %v9612_v36  ;;  %v5016_v51 = vrot.slane %v13387_v38, 5  ;;  %v3370_v0 = vrot.slane %v3368_v41, 4  ;;  %v9818_v24 = vld [vmem:[#allocation2 + $0x74] sm:$0x1]  ;;  %v3369_v42 = vsel %vm11696_vm15, %v7769_v23, %v3368_v41  ;;  %v7770_v31 = vrot.slane %v3262_v9, 9  ;;  %v13393_v38 = vld [vmem:[#allocation44_spill] sm:$0xff] }
 0x388   : > { %9009 = vmatprep.subr.bf16.mxu1 %v9613_v28  ;;  %v3371_v36 = vrot.slane %v9818_v24, 5  ;;  %8840 = vmatmul.mubr.bf16.gmra.mrb[80].mxu0 %v7799_v22  ;;  %v3375_v27 = vrot.slane %v13389_v15, 5  ;;  %v7934_v59 = vcombine.low %v11829_v20, %v11839_v12  ;;  %v5022_v22 = vrot.slane %v5020_v40, 4  ;;  %v13391_v3 = vld [vmem:[#allocation42_spill] sm:$0xff]  ;;  %v4890_v41 = vld [vmem:[#allocation2 + $0xa8] sm:$0xe] }
 0x389   : > { %v11924_v58 = vsel %vm11696_vm15, %v5015_v49, %v5016_v51  ;;  %8843 = vmatprep.mubr.bf16.mxu0 %v7800_v1  ;;  %v5023_v7 = vrot.slane %v13390_v37, 5  ;;  %v3378_v43 = vrot.slane %v9819_v26, 5  ;;  %v7908_v53 = vrot.slane %v4889_v33, 9  ;;  %v13392_v23 = vld [vmem:[#allocation46_spill] sm:$0xff] }
 0x38a   : > { %v7938_v47 = vcombine.low %v11920_v45, %v11924_v58  ;;  %v3372_v50 = vsel %vm11696_vm15, %v3370_v0, %v3371_v36  ;;  %v3377_v60 = vrot.slane %v3375_v27, 4  ;;  %v5027_v34 = vrot.slane %v13391_v3, 5  ;;  %v9820_v36 = vld [vmem:[#allocation2 + $0x8c] sm:$0x1] }
 0x38b   : > { %9010 = vmatpush3.bf16.msra.mxu1 %v9613_v28  ;;  %v7801_v8 = vcombine.low %v3369_v42, %v3372_v50  ;;  %v11943_v20 = vsel %vm11696_vm15, %v7907_v55, %v5020_v40  ;;  %v11947_v12 = vsel %vm11696_vm15, %v5022_v22, %v5023_v7  ;;  %v3376_v28 = vsel %vm11696_vm15, %v7770_v31, %v3375_v27  ;;  %v13394_v55 = vld [vmem:[#allocation45_spill] sm:$0xff]  ;;  %v4891_v40 = vld [vmem:[#allocation2 + $0xb4] sm:$0xe] }
 0x38c   : > { %9011 = vmatprep.subr.bf16.mxu1 %v9614_v5  ;;  %v3382_v11 = vrot.slane %v13392_v23, 5  ;;  %v7939_v48 = vcombine.low %v11943_v20, %v11947_v12  ;;  %v3379_v6 = vsel %vm11696_vm15, %v3377_v60, %v3378_v43  ;;  %v5029_v49 = vrot.slane %v5027_v34, 4  ;;  %v9821_v50 = vld [vmem:[#allocation2 + $0x94] sm:$0xf]  ;;  %v9822_v60 = vld [vmem:[#allocation2 + $0x98] sm:$0x1] }
 0x38d   : > { %v5030_v51 = vrot.slane %v13393_v38, 5  ;;  %v7802_v9 = vcombine.low %v3376_v28, %v3379_v6  ;;  %v11962_v1 = vsel %vm11696_vm15, %v7908_v53, %v5027_v34  ;;  %v7771_v0 = vrot.slane %v3263_v44, 9  ;;  %v4892_v28 = vld [vmem:[#allocation2 + $0xc0] sm:$0xe]  ;;  %v9620_v20 = vld [vmem:[#allocation2 + $0x24] sm:$0xff]  }
 0x38e   : > { %8980 = vmatmul.mubr.bf16.gmra.mrb[8].mxu1 %v7933_v46  ;;  %v3384_v24 = vrot.slane %v3382_v11, 4  ;;  %v9616_v46 = vld [vmem:[%s13224_s5 + $0x1b0] sm:$0xff]   ;;  %v3385_v42 = vrot.slane %v9820_v36, 5  ;;  %v5034_v17 = vrot.slane %v13394_v55, 5  ;;  %v3389_v31 = vrot.slane %v9821_v50, 5  ;;  %v9622_v12 = vld [vmem:[%s13224_s5 + $0x1c8] sm:$0xff]  }
 0x38f   : > { %8983 = vmatprep.mubr.bf16.mxu1 %v7934_v59  ;;  %9012 = vmatpush3.bf16.msra.mxu1 %v9614_v5  ;;  %v11966_v16 = vsel %vm11696_vm15, %v5029_v49, %v5030_v51  ;;  %v7909_v5 = vrot.slane %v4890_v41, 9  ;;  %v13395_v59 = vld [vmem:[#allocation47_spill] sm:$0xff]  ;;  %v7772_v37 = vrot.slane %v3264_v30, 9  ;;  %v3392_v26 = vrot.slane %v9822_v60, 5  ;;  %v9823_v36 = vld [vmem:[#allocation2 + $0xa4] sm:$0x1] }
 0x390   : > { %9013 = vmatprep.subr.bf16.mxu1 %v9615_v56  ;;  %8844 = vmatmul.mubr.bf16.gmra.mrb[84].mxu0 %v7801_v8  ;;  %v7940_v33 = vcombine.low %v11962_v1, %v11966_v16  ;;  %v3386_v15 = vsel %vm11696_vm15, %v3384_v24, %v3385_v42  ;;  %v5036_v27 = vrot.slane %v5034_v17, 4  ;;  %v5037_v22 = vrot.slane %v13395_v59, 5  ;;  %v9625_v1 = vld [vmem:[%s13224_s5 + $0x1d0] sm:$0xff]   ;;  %v5762_v16 = vld [vmem:[#allocation2 + $0x18] sm:$0xf] }
 0x391   : > { %8847 = vmatprep.mubr.bf16.mxu0 %v7802_v9  ;;  %v3391_v7 = vrot.slane %v3389_v31, 4  ;;  %v7910_v43 = vrot.slane %v4891_v40, 9  ;;  %v5041_v8 = vrot.slane %v11660_v54, 5  ;;  %v3383_v53 = vsel %vm11696_vm15, %v7771_v0, %v3382_v11 }
 0x392   : > { %v11982_v3 = vsel %vm11696_vm15, %v7909_v5, %v5034_v17  ;;  %v11986_v34 = vsel %vm11696_vm15, %v5036_v27, %v5037_v22  ;;  %v3396_v44 = vrot.slane %v11678_v19, 5  ;;  %v5044_v41 = vrot.slane %v11662_v18, 5  ;;  %v3265_v18 = vld [vmem:[#allocation2 + $0x9c] sm:$0xe]  ;;  %v9824_v17 = vld [vmem:[#allocation2 + $0xb0] sm:$0x1] }
 0x393   : > { %9014 = vmatpush3.bf16.msra.mxu1 %v9615_v56  ;;  %v9617_v56 = vld [vmem:[%s13224_s5 + $0x1b8] sm:$0xff]   ;;  %v7941_v54 = vcombine.low %v11982_v3, %v11986_v34  ;;  %v3393_v23 = vsel %vm11696_vm15, %v3391_v7, %v3392_v26  ;;  %v5043_v11 = vrot.slane %v5041_v8, 4  ;;  %v7803_v6 = vcombine.low %v3383_v53, %v3386_v15  ;;  %v3267_v7 = vld [vmem:[#allocation2 + $0xb4] sm:$0xe]  ;;  %v9624_v34 = vld [vmem:[#allocation2 + $0x48] sm:$0xff]  }
 0x394   : > { %9015 = vmatprep.subr.bf16.mxu1 %v9616_v46  ;;  %v3390_v49 = vsel %vm11696_vm15, %v7772_v37, %v3389_v31  ;;  %v5042_v19 = vsel %vm11696_vm15, %v7910_v43, %v5041_v8  ;;  %v7911_v51 = vrot.slane %v4892_v28, 9  ;;  %v5048_v2 = vrot.slane %v11672_v13, 5  ;;  %v9825_v15 = vld [vmem:[#allocation2 + $0xb8] sm:$0xf]  ;;  %v9826_v8 = vld [vmem:[#allocation2 + $0xbc] sm:$0x1] }
 0x395   : > { %v5045_v38 = vsel %vm11696_vm15, %v5043_v11, %v5044_v41  ;;  %v3398_v0 = vrot.slane %v3396_v44, 4  ;;  %v3403_v24 = vrot.slane %v11686_v39, 5  ;;  %v5051_v30 = vrot.slane %v11758_v4, 5  ;;  %v9628_v53 = vld [vmem:[%s13224_s5 + $0x1d8] sm:$0xff]   ;;  %v9631_v11 = vld [vmem:[%s13224_s5 + $0x1e0] sm:$0xff]  }
 0x396   : > { %8984 = vmatmul.mubr.bf16.gmra.mrb[12].mxu1 %v7935_v35  ;;  %v7804_v35 = vcombine.low %v3390_v49, %v3393_v23  ;;  %v7942_v9 = vcombine.low %v5042_v19, %v5045_v38  ;;  %v3399_v13 = vrot.slane %v9823_v36, 5  ;;  %v7774_v42 = vrot.slane %v3266_v10, 9  ;;  %v12059_v3 = vld [vmem:[#allocation2 + $0x1c] sm:$0xf]  ;;  %v5765_v23 = vld [vmem:[#allocation2 + $0x24] sm:$0xf] }
 0x397   : > { %8987 = vmatprep.mubr.bf16.mxu1 %v7936_v32  ;;  %9016 = vmatpush3.bf16.msra.mxu1 %v9616_v46  ;;  %v5050_v32 = vrot.slane %v5048_v2, 4  ;;  %v7773_v46 = vrot.slane %v3265_v18, 9  ;;  %v3405_v5 = vrot.slane %v3403_v24, 4  ;;  %v5049_v55 = vsel %vm11696_vm15, %v7911_v51, %v5048_v2  ;;  %v12066_v41 = vld [vmem:[#allocation2 + $0x28] sm:$0xf] }
 0x398   : > { %9017 = vmatprep.subr.bf16.mxu1 %v9617_v56  ;;  %8848 = vmatmul.mubr.bf16.gmra.mrb[88].mxu0 %v7803_v6  ;;  %v3406_v40 = vrot.slane %v9824_v17, 5  ;;  %v1614_v50 = vsel %vm10598_vm4, 0, %v1613_v25  ;;  %v3400_v4 = vsel %vm11696_vm15, %v3398_v0, %v3399_v13  ;;  %v3410_v27 = vrot.slane %v9825_v15, 5  ;;  %13397 = vst [vmem:[#allocation37_spill] sm:$0xff] %v12066_v41  ;;  %v5768_v6 = vld [vmem:[#allocation2 + $0x30] sm:$0xf] }
 0x399   : > { %8851 = vmatprep.mubr.bf16.mxu0 %v7804_v35  ;;  %v5052_v39 = vsel %vm11696_vm15, %v5050_v32, %v5051_v30  ;;  %1615 = vst [vmem:[#allocation2 + $0xcc] sm:$0x1] %v1614_v50  ;;  %v3397_v22 = vsel %vm11696_vm15, %v7773_v46, %v3396_v44  ;;  %v3404_v37 = vsel %vm11696_vm15, %v7774_v42, %v3403_v24  ;;  %v7775_v43 = vrot.slane %v3267_v7, 9  ;;  %v12068_v38 = vld [vmem:[#allocation2 + $0x34] sm:$0xf]  ;;  %v9627_v32 = vld [vmem:[#allocation2 + $0x60] sm:$0xff]  }
 0x39a   : > { %v7943_v31 = vcombine.low %v5049_v55, %v5052_v39  ;;  %v3407_v59 = vsel %vm11696_vm15, %v3405_v5, %v3406_v40  ;;  %v7805_v14 = vcombine.low %v3397_v22, %v3400_v4  ;;  %v3412_v26 = vrot.slane %v3410_v27, 4  ;;  %v9626_v35 = vld [vmem:[#allocation2 + $0x54] sm:$0xff]   ;;  %v12079_v36 = vld [vmem:[#allocation2 + $0x20] sm:$0x1]  ;;  %v12081_v13 = vld [vmem:[#allocation2 + $0x2c] sm:$0x1] }
 0x39b   : > { %9018 = vmatpush3.bf16.msra.mxu1 %v9617_v56  ;;  %v7806_v60 = vcombine.low %v3404_v37, %v3407_v59  ;;  %v3413_v29 = vrot.slane %v9826_v8, 5  ;;  %v13396_v58 = vmov 0.0   ;;  %v5811_v56 = vshrl.u32 %v5762_v16, 16  ;;  %13398 = vst [vmem:[#allocation36_spill] sm:$0xff] %v12081_v13  ;;  %v5771_v42 = vld [vmem:[#allocation2 + $0x3c] sm:$0xf] }
 0x39c   : > { %9051 = vmatprep.subr.bf16.mxu1 %v9619_v62  ;;  %v5814_v44 = vshll.u32 %v5762_v16, 16  ;;  %v5820_v28 = vshll.u32 %v12059_v3, 16  ;;  %v5835_v19 = vshrl.u32 %v5765_v23, 16  ;;  %v5838_v10 = vshll.u32 %v5765_v23, 16  ;;  %v12083_v5 = vld [vmem:[#allocation2 + $0x40] sm:$0xf] }
 0x39d   : > { %v3414_v57 = vsel %vm11696_vm15, %v3412_v26, %v3413_v29  ;;  %v5813_v49 = vrot.slane %v5811_v56, 4  ;;  %v5844_v0 = vshll.u32 %v12066_v41, 16  ;;  %v5848_v24 = vshrl.u32 %v12066_v41, 16  ;;  %v5774_v50 = vld [vmem:[#allocation2 + $0x48] sm:$0xf] }
 0x39e   : > { %8988 = vmatmul.mubr.bf16.gmra.mrb[16].mxu1 %v7937_v21  ;;  %v3411_v21 = vsel %vm11696_vm15, %v7775_v43, %v3410_v27  ;;  %v5816_v18 = vrot.slane %v5814_v44, 5  ;;  %v12070_v51 = vrot.slane %v5820_v28, 5  ;;  %v5862_v25 = vshll.u32 %v5768_v6, 16  ;;  %v12086_v4 = vld [vmem:[#allocation2 + $0x4c] sm:$0xf] }
 0x39f   : > { %8991 = vmatprep.mubr.bf16.mxu1 %v7938_v47  ;;  %v7807_v45 = vcombine.low %v3411_v21, %v3414_v57  ;;  %v9618_v47 = vld [vmem:[#allocation2 + $0x18] sm:$0xff]   ;;  %v5868_v30 = vshll.u32 %v12068_v38, 16  ;;  %v5872_v46 = vshrl.u32 %v12068_v38, 16  ;;  %v5837_v17 = vrot.slane %v5835_v19, 4 }
 0x3a0   : > { %8852 = vmatmul.mubr.bf16.gmra.mrb[92].mxu0 %v7805_v14  ;;  %v5817_v55 = vor.u32 %v5816_v18, %v5813_v49  ;;  %v5840_v40 = vrot.slane %v5838_v10, 5  ;;  %v12091_v15 = vrot.slane %v5844_v0, 5  ;;  %v5850_v27 = vrot.slane %v5848_v24, 4  ;;  %v12105_v16 = vld [vmem:[#allocation2 + $0x38] sm:$0x1] }
 0x3a1   : > { %8855 = vmatprep.mubr.bf16.mxu0 %v7806_v60  ;;  %v5864_v22 = vrot.slane %v5862_v25, 5  ;;  %v12093_v14 = vrot.slane %v5868_v30, 5  ;;  %v5874_v37 = vrot.slane %v5872_v46, 4  ;;  %v5883_v7 = vshrl.u32 %v5771_v42, 16  ;;  %v1669_v10 = vld [vmem:[#allocation2 + $0xd4] sm:$0x1] }
 0x3a2   : > { %v5886_v60 = vshll.u32 %v5771_v42, 16  ;;  %v5892_v26 = vshll.u32 %v12083_v5, 16  ;;  %v5896_v43 = vshrl.u32 %v12083_v5, 16  ;;  %v5907_v8 = vshrl.u32 %v5774_v50, 16  ;;  %v12123_v42 = vld [vmem:[#allocation2 + $0x44] sm:$0x1] }
 0x3a3   : > { %v5910_v29 = vshll.u32 %v5774_v50, 16  ;;  %v5830_v57 = vshll.u32 %v12079_v36, 16  ;;  %v5854_v21 = vshll.u32 %v12081_v13, 16  ;;  %v5875_v56 = vor.u32 %v5874_v37, %v12093_v14  ;;  %v12128_v50 = vld [vmem:[#allocation2 + $0x58] sm:$0xf]  ;;  %v9632_v37 = vld [vmem:[#allocation2 + $0x84] sm:$0xff]  }
 0x3a4   : > { %v5885_v44 = vrot.slane %v5883_v7, 4  ;;  %v5888_v28 = vrot.slane %v5886_v60, 5  ;;  %v5898_v23 = vrot.slane %v5896_v43, 4  ;;  %v5878_v19 = vshll.u32 %v12105_v16, 16  ;;  %v5780_v43 = vld [vmem:[#allocation2 + $0x60] sm:$0xf] }
 0x3a5   : > { %v5832_v49 = vrot.slane %v5830_v57, 5  ;;  %v5856_v30 = vrot.slane %v5854_v21, 5  ;;  %v5876_v46 = vrot.slane %v5875_v56, 4  ;;  %v5940_v21 = vshll.u32 %v12128_v50, 16  ;;  %v13432_v52 = vld [vmem:[#allocation36_spill] sm:$0xff] }
 0x3a6   : > { %8992 = vmatmul.mubr.bf16.gmra.mrb[20].mxu1 %v7939_v48  ;;  %v9621_v48 = vld [vmem:[#allocation2 + $0x30] sm:$0xff]  }
 0x3a7   : > { %8995 = vmatprep.mubr.bf16.mxu1 %v7940_v33  ;;  %v9623_v33 = vld [vmem:[#allocation2 + $0x3c] sm:$0xff]  }
 0x3a8   : > { %8856 = vmatmul.mubr.bf16.gmra.mrb[96].mxu0 %v7807_v45  ;;  %v5916_v45 = vshll.u32 %v12086_v4, 16 }
 0x3a9   : > { %9179 = vmatprep.mubr.msk.f32.mxu0 %vm9836_vm0, %v13396_v58  ;;  %v5920_v58 = vshrl.u32 %v12086_v4, 16 }
 0x3aa   : > { %v12111_v18 = vrot.slane %v5916_v45, 5 }
 0x3ae   : > { %8996 = vmatmul.mubr.bf16.gmra.mrb[24].mxu1 %v7941_v54  ;;  %v5824_v54 = vshrl.u32 %v12059_v3, 16 }
 0x3af   : > { %8999 = vmatprep.mubr.bf16.mxu1 %v7942_v9  ;;  %v9634_v9 = vld [vmem:[%s13224_s5 + $0x1e8] sm:$0xff]  }
 0x3b0   : > { %v5826_v2 = vrot.slane %v5824_v54, 4  ;;  %v12108_v54 = vrot.slane %v5892_v26, 5  ;;  %v5902_v26 = vshll.u32 %v12123_v42, 16 }
 0x3b2   : > { %v5827_v39 = vor.u32 %v5826_v2, %v12070_v51  ;;  %v5922_v2 = vrot.slane %v5920_v58, 4 }
 0x3b6   : > { %9000 = vmatmul.mubr.bf16.gmra.mrb[28].mxu1 %v7943_v31  ;;  %v9637_v31 = vld [vmem:[%s13224_s5 + $0x1f0] sm:$0xff]  }
 0x3b7   : > { %9019 = vmatprep.mubr.bf16.mxu1 %v9618_v47  ;;  %v9629_v47 = vld [vmem:[#allocation2 + $0x6c] sm:$0xff]  }
 0x3be   : > { %9020 = vmatmul.mubr.bf16.vlgmr.msra.gmra.mrb[0].mxu1 %v9620_v20  ;;  %v9640_v20 = vld [vmem:[%s13224_s5 + $0x1f8] sm:$0xff]  }
 0x3bf   : > { %9052 = vmatpush3.bf16.msra.mxu1 %v9619_v62  ;;  %9023 = vmatprep.mubr.bf16.mxu1 %v9621_v48  ;;  %v5859_v62 = vshrl.u32 %v5768_v6, 16  ;;  %v5841_v48 = vor.u32 %v5840_v40, %v5837_v17  ;;  %v5912_v6 = vrot.slane %v5910_v29, 5  ;;  %v12126_v17 = vld [vmem:[#allocation2 + $0x50] sm:$0x1] }
 0x3c0   : > { %9053 = vmatprep.subr.bf16.mxu1 %v9622_v12  ;;  %v5926_v57 = vshll.u32 %v12126_v17, 16 }
 0x3c1   : > { %v5861_v59 = vrot.slane %v5859_v62, 4  ;;  %v5777_v62 = vld [vmem:[#allocation2 + $0x54] sm:$0xf] }
 0x3c3   : > { %9054 = vmatpush3.bf16.msra.mxu1 %v9622_v12  ;;  %v5818_v12 = vrot.slane %v5817_v55, 4  ;;  %v5889_v55 = vor.u32 %v5888_v28, %v5885_v44  ;;  %v12170_v44 = vrot.slane %v5902_v26, 5  ;;  %v5958_v28 = vshll.u32 %v5780_v43, 16 }
 0x3c4   : > { %9055 = vmatprep.subr.bf16.mxu1 %v9625_v1  ;;  %v6599_v26 = vrot.slane %v12105_v16, 5 }
 0x3c5   : > { %v5823_v25 = vsel %vm10745_vm8, %v5818_v12, %v12070_v51  ;;  %v5880_v51 = vrot.slane %v5878_v19, 5  ;;  %v12150_v58 = vrot.slane %v5889_v55, 4  ;;  %v6520_v55 = vld [vmem:[#allocation2 + $0x48] sm:$0xe] }
 0x3c6   : > { %9024 = vmatmul.mubr.bf16.gmra.mrb[4].mxu1 %v9623_v33  ;;  %v5865_v33 = vor.u32 %v5864_v22, %v5861_v59  ;;  %v5931_v59 = vshrl.u32 %v5777_v62, 16  ;;  %v5934_v22 = vshll.u32 %v5777_v62, 16  ;;  %v12192_v62 = vld [vmem:[#allocation2 + $0x6c] sm:$0xf] }
 0x3c7   : > { %9027 = vmatprep.mubr.bf16.mxu1 %v9624_v34  ;;  %9056 = vmatpush3.bf16.msra.mxu1 %v9625_v1  ;;  %v5851_v1 = vor.u32 %v5850_v27, %v12091_v15  ;;  %v5828_v34 = vrot.slane %v5827_v39, 4  ;;  %v5899_v39 = vor.u32 %v5898_v23, %v12108_v54  ;;  %v5923_v27 = vor.u32 %v5922_v2, %v12111_v18  ;;  %v6518_v23 = vld [vmem:[#allocation2 + $0x30] sm:$0xe]  ;;  %v6519_v2 = vld [vmem:[#allocation2 + $0x3c] sm:$0xe] }
 0x3c8   : > { %9057 = vmatprep.subr.bf16.mxu1 %v9628_v53  ;;  %v5866_v24 = vrot.slane %v5865_v33, 4  ;;  %v5881_v29 = vsel %vm10745_vm8, %v5876_v46, %v5880_v51  ;;  %v12164_v33 = vrot.slane %v5934_v22, 5  ;;  %v6596_v51 = vrot.slane %v12068_v38, 5 }
 0x3c9   : > { %v5852_v0 = vrot.slane %v5851_v1, 4  ;;  %v12158_v12 = vrot.slane %v5923_v27, 4  ;;  %v12162_v1 = vrot.slane %v5931_v59, 4  ;;  %v8035_v27 = vrot.slane %v6519_v2, 9  ;;  %v9636_v59 = vld [vmem:[#allocation2 + $0xa8] sm:$0xff]  }
 0x3ca   : > { %v5871_v61 = vsel %vm10745_vm8, %v5866_v24, %v12093_v14  ;;  %v12232_v2 = vld [vmem:[#allocation2 + $0x70] sm:$0xf]  ;;  %v12258_v24 = vld [vmem:[#allocation2 + $0x80] sm:$0x1] }
 0x3cb   : > { %9058 = vmatpush3.bf16.msra.mxu1 %v9628_v53  ;;  %v9630_v53 = vld [vmem:[#allocation2 + $0x78] sm:$0xff]   ;;  %v5857_v60 = vsel %vm10745_vm8, %v5852_v0, %v5856_v30  ;;  %v12168_v56 = vcombine.low %v5871_v61, %v5881_v29  ;;  %v6598_v61 = vrot.slane %v6596_v51, 4  ;;  %v6521_v29 = vld [vmem:[#allocation2 + $0x54] sm:$0xe]  ;;  %v12264_v0 = vld [vmem:[#allocation2 + $0x88] sm:$0xf] }
 0x3cc   : > { %9059 = vmatprep.subr.bf16.mxu1 %v9631_v11 }
 0x3cd   : > { %v12224_v16 = vsel %vm11696_vm15, %v6598_v61, %v6599_v26  ;;  %v6524_v61 = vld [vmem:[#allocation2 + $0x78] sm:$0xe] }
 0x3ce   : > { %9028 = vmatmul.mubr.bf16.gmra.mrb[8].mxu1 %v9626_v35  ;;  %v12116_v35 = vld [vmem:[%s13224_s5 + $0x200] sm:$0xff]   ;;  %13400 = vst [vmem:[#allocation38_spill] sm:$0xff] %v12224_v16  ;;  %v9638_v26 = vld [vmem:[#allocation2 + $0xb4] sm:$0xff]   ;;  %v6531_v16 = vld [vmem:[#allocation2 + $0xcc] sm:$0xe] }
 0x3cf   : > { %9031 = vmatprep.mubr.bf16.mxu1 %v9627_v32  ;;  %9060 = vmatpush3.bf16.msra.mxu1 %v9631_v11  ;;  %v5909_v11 = vrot.slane %v5907_v8, 4  ;;  %v5833_v32 = vsel %vm10745_vm8, %v5828_v34, %v5832_v49  ;;  %v9633_v8 = vld [vmem:[#allocation2 + $0x90] sm:$0xff]  }
 0x3d0   : > { %9061 = vmatprep.subr.bf16.mxu1 %v9634_v9  ;;  %v12148_v45 = vcombine.low %v5823_v25, %v5833_v32  ;;  %v6525_v25 = vld [vmem:[#allocation2 + $0x84] sm:$0xe] }
 0x3d1   : > { %v5913_v40 = vor.u32 %v5912_v6, %v5909_v11  ;;  %v12172_v11 = vrot.slane %v5926_v57, 5  ;;  %v12174_v6 = vrot.slane %v5940_v21, 5  ;;  %v12295_v57 = vld [vmem:[#allocation2 + $0x98] sm:$0x1] }
 0x3d3   : > { %9062 = vmatpush3.bf16.msra.mxu1 %v9634_v9  ;;  %v5842_v9 = vrot.slane %v5841_v48, 4  ;;  %v12154_v14 = vrot.slane %v5913_v40, 4  ;;  %v12160_v48 = vld [vmem:[#allocation2 + $0x5c] sm:$0x1]  ;;  %v12203_v40 = vrot.slane %v5958_v28, 5 }
 0x3d4   : > { %9063 = vmatprep.subr.bf16.mxu1 %v9637_v31 }
 0x3d5   : > { %v5847_v7 = vsel %vm10745_vm8, %v5842_v9, %v12091_v15  ;;  %v5944_v15 = vshrl.u32 %v12128_v50, 16 }
 0x3d6   : > { %9032 = vmatmul.mubr.bf16.gmra.mrb[12].mxu1 %v9629_v47  ;;  %v12152_v47 = vrot.slane %v5899_v39, 4  ;;  %v12166_v34 = vcombine.low %v5847_v7, %v5857_v60  ;;  %v9635_v39 = vld [vmem:[#allocation2 + $0x9c] sm:$0xff]   ;;  %v6603_v60 = vrot.slane %v12083_v5, 5 }
 0x3d7   : > { %9035 = vmatprep.mubr.bf16.mxu1 %v9630_v53  ;;  %9064 = vmatpush3.bf16.msra.mxu1 %v9637_v31  ;;  %v1670_v31 = vsel %vm10608_vm5, 0, %v1669_v10  ;;  %v5955_v53 = vshrl.u32 %v5780_v43, 16  ;;  %v12176_v49 = vrot.slane %v5944_v15, 4  ;;  %v8036_v43 = vrot.slane %v6520_v55, 9  ;;  %v12276_v10 = vld [vmem:[#allocation2 + $0x94] sm:$0xf] }
 0x3d8   : > { %9065 = vmatprep.subr.bf16.mxu1 %v9640_v20  ;;  %1671 = vst [vmem:[#allocation2 + $0xd4] sm:$0x1] %v1670_v31  ;;  %v8034_v31 = vrot.slane %v6518_v23, 9  ;;  %v6605_v21 = vrot.slane %v6603_v60, 4  ;;  %v6606_v15 = vrot.slane %v12123_v42, 5  ;;  %v6613_v55 = vrot.slane %v12126_v17, 5 }
 0x3d9   : > { %v12200_v30 = vrot.slane %v5955_v53, 4  ;;  %v6522_v53 = vld [vmem:[#allocation2 + $0x60] sm:$0xe]  ;;  %v6523_v23 = vld [vmem:[#allocation2 + $0x6c] sm:$0xe] }
 0x3da   : > { %v12220_v5 = vsel %vm11696_vm15, %v8034_v31, %v6596_v51  ;;  %v12241_v31 = vld [vmem:[#allocation2 + $0x74] sm:$0x1]  ;;  %v12250_v42 = vld [vmem:[#allocation2 + $0x7c] sm:$0xf]  ;;  %v9639_v51 = vld [vmem:[#allocation2 + $0xc0] sm:$0xff]  }
 0x3db   : > { %9066 = vmatpush3.bf16.msra.mxu1 %v9640_v20  ;;  %v12156_v20 = vld [vmem:[#allocation2 + $0x64] sm:$0xf]  ;;  %13399 = vst [vmem:[#allocation40_spill] sm:$0xff] %v12220_v5  ;;  %v12297_v7 = vld [vmem:[#allocation2 + $0xa0] sm:$0xf]  ;;  %v13421_v5 = vor.u32 %v12164_v33, %v12162_v1 }
 0x3dc   : > { %9099 = vmatprep.subr.bf16.mxu1 %v12116_v35  ;;  %v5964_v19 = vshll.u32 %v12156_v20, 16  ;;  %v5968_v46 = vshrl.u32 %v12156_v20, 16  ;;  %v5786_v33 = vld [vmem:[#allocation2 + $0x78] sm:$0xf] }
 0x3dd   : > { %v12410_v13 = vrot.slane %v13421_v5, 4 }
 0x3de   : > { %9036 = vmatmul.mubr.bf16.gmra.mrb[16].mxu1 %v9632_v37  ;;  %v12208_v37 = vrot.slane %v5964_v19, 5  ;;  %v12214_v38 = vrot.slane %v5968_v46, 4  ;;  %v12230_v19 = vld [vmem:[#allocation2 + $0x68] sm:$0x1]  ;;  %v12238_v46 = vsel %vm11696_vm15, %v6605_v21, %v6606_v15  ;;  %v6624_v21 = vrot.slane %v12156_v20, 5 }
 0x3df   : > { %9039 = vmatprep.mubr.bf16.mxu1 %v9633_v8  ;;  %v6610_v8 = vrot.slane %v12086_v4, 5  ;;  %v12228_v4 = vsel %vm11696_vm15, %v8035_v27, %v6603_v60  ;;  %13402 = vst [vmem:[#allocation43_spill] sm:$0xff] %v12238_v46  ;;  %v8038_v60 = vrot.slane %v6522_v53, 9  ;;  %v8039_v15 = vrot.slane %v6523_v23, 9  ;;  %v6529_v46 = vld [vmem:[#allocation2 + $0xb4] sm:$0xe] }
 0x3e0   : > { %13401 = vst [vmem:[#allocation39_spill] sm:$0xff] %v12228_v4  ;;  %v6631_v53 = vrot.slane %v12232_v2, 5  ;;  %v6626_v23 = vrot.slane %v6624_v21, 4  ;;  %v12341_v4 = vld [vmem:[#allocation2 + $0xc4] sm:$0xf] }
 0x3e1   : > { %v6612_v28 = vrot.slane %v6610_v8, 4  ;;  %v12247_v27 = vsel %vm11696_vm15, %v8036_v43, %v6610_v8  ;;  %v6627_v8 = vrot.slane %v12230_v19, 5  ;;  %v12272_v20 = vsel %vm11696_vm15, %v8038_v60, %v6624_v21  ;;  %v6526_v21 = vld [vmem:[#allocation2 + $0x90] sm:$0xe] }
 0x3e2   : > { %13403 = vst [vmem:[#allocation41_spill] sm:$0xff] %v12247_v27  ;;  %13406 = vst [vmem:[#allocation44_spill] sm:$0xff] %v12272_v20  ;;  %v6633_v22 = vrot.slane %v6631_v53, 4  ;;  %v12315_v20 = vld [vmem:[#allocation2 + $0xac] sm:$0xf] }
 0x3e3   : > { %v12254_v17 = vsel %vm11696_vm15, %v6612_v28, %v6613_v55  ;;  %v8040_v55 = vrot.slane %v6524_v61, 9  ;;  %v12288_v61 = vsel %vm11696_vm15, %v6626_v23, %v6627_v8  ;;  %v8041_v23 = vrot.slane %v6525_v25, 9 }
 0x3e4   : > { %13404 = vst [vmem:[#allocation42_spill] sm:$0xff] %v12254_v17  ;;  %13408 = vst [vmem:[#allocation47_spill] sm:$0xff] %v12288_v61  ;;  %v9641_v61 = vld [vmem:[#allocation2 + $0xcc] sm:$0xff]  }
 0x3e5   : > { %v12322_v17 = vld [vmem:[#allocation2 + $0xb0] sm:$0x1] }
 0x3e6   : > { %9040 = vmatmul.mubr.bf16.gmra.mrb[20].mxu1 %v9635_v39  ;;  %v8037_v39 = vrot.slane %v6521_v29, 9  ;;  %v6620_v29 = vrot.slane %v12160_v48, 5 }
 0x3e7   : > { %9043 = vmatprep.mubr.bf16.mxu1 %v9636_v59  ;;  %v6617_v59 = vrot.slane %v12128_v50, 5  ;;  %v12274_v50 = vld [vmem:[#allocation2 + $0x8c] sm:$0x1] }
 0x3e8   : > { %v6648_v32 = vrot.slane %v12274_v50, 5 }
 0x3e9   : > { %v6619_v43 = vrot.slane %v6617_v59, 4  ;;  %v12268_v28 = vsel %vm11696_vm15, %v8037_v39, %v6617_v59  ;;  %v6634_v39 = vrot.slane %v12241_v31, 5  ;;  %v6638_v59 = vrot.slane %v12250_v42, 5 }
 0x3ea   : > { %13405 = vst [vmem:[#allocation46_spill] sm:$0xff] %v12268_v28  ;;  %v6645_v28 = vrot.slane %v12264_v0, 5 }
 0x3eb   : > { %v12280_v9 = vsel %vm11696_vm15, %v6619_v43, %v6620_v29  ;;  %v6641_v29 = vrot.slane %v12258_v24, 5  ;;  %v6527_v43 = vld [vmem:[#allocation2 + $0x9c] sm:$0xe]  ;;  %v12303_v60 = vsel %vm11696_vm15, %v6633_v22, %v6634_v39  ;;  %v6640_v8 = vrot.slane %v6638_v59, 4 }
 0x3ec   : > { %13407 = vst [vmem:[#allocation45_spill] sm:$0xff] %v12280_v9  ;;  %13410 = vst [vmem:[#allocation49_spill] sm:$0xff] %v12303_v60  ;;  %v12312_v9 = vsel %vm11696_vm15, %v8040_v55, %v6638_v59  ;;  %v8042_v22 = vrot.slane %v6526_v21, 9  ;;  %v6652_v39 = vrot.slane %v12276_v10, 5  ;;  %v6647_v59 = vrot.slane %v6645_v28, 4 }
 0x3ed   : > { %13411 = vst [vmem:[#allocation50_spill] sm:$0xff] %v12312_v9  ;;  %v12319_v25 = vsel %vm11696_vm15, %v6640_v8, %v6641_v29  ;;  %v6659_v60 = vrot.slane %v12297_v7, 5  ;;  %v12332_v29 = vsel %vm11696_vm15, %v8041_v23, %v6645_v28  ;;  %v6655_v8 = vrot.slane %v12295_v57, 5  ;;  %v12376_v28 = vld [vmem:[#allocation2 + $0xd0] sm:$0xf] }
 0x3ee   : > { %9044 = vmatmul.mubr.bf16.gmra.mrb[24].mxu1 %v9638_v26  ;;  %v12292_v26 = vsel %vm11696_vm15, %v8039_v15, %v6631_v53  ;;  %v12306_v53 = vld [vmem:[#allocation2 + $0xa4] sm:$0x1]  ;;  %13412 = vst [vmem:[#allocation51_spill] sm:$0xff] %v12319_v25  ;;  %v8043_v15 = vrot.slane %v6527_v43, 9  ;;  %13413 = vst [vmem:[#allocation52_spill] sm:$0xff] %v12332_v29  ;;  %v6654_v21 = vrot.slane %v6652_v39, 4  ;;  %v12337_v27 = vsel %vm11696_vm15, %v6647_v59, %v6648_v32 }
 0x3ef   : > { %9047 = vmatprep.mubr.bf16.mxu1 %v9639_v51  ;;  %13409 = vst [vmem:[#allocation48_spill] sm:$0xff] %v12292_v26  ;;  %v6528_v51 = vld [vmem:[#allocation2 + $0xa8] sm:$0xe]  ;;  %v12328_v26 = vld [vmem:[#allocation2 + $0xb8] sm:$0xf]  ;;  %13414 = vst [vmem:[#allocation53_spill] sm:$0xff] %v12337_v27  ;;  %v12347_v23 = vsel %vm11696_vm15, %v8042_v22, %v6652_v39 }
 0x3f0   : > { %v8044_v43 = vrot.slane %v6528_v51, 9  ;;  %v6661_v55 = vrot.slane %v6659_v60, 4  ;;  %v6662_v25 = vrot.slane %v12306_v53, 5  ;;  %v6666_v9 = vrot.slane %v12315_v20, 5  ;;  %13415 = vst [vmem:[#allocation54_spill] sm:$0xff] %v12347_v23 }
 0x3f1   : > { %v12351_v32 = vsel %vm11696_vm15, %v6654_v21, %v6655_v8  ;;  %v12355_v51 = vsel %vm11696_vm15, %v8043_v15, %v6659_v60  ;;  %v6530_v59 = vld [vmem:[#allocation2 + $0xc0] sm:$0xe]  ;;  %v6669_v21 = vrot.slane %v12322_v17, 5  ;;  %v12367_v8 = vld [vmem:[#allocation2 + $0xc8] sm:$0x1]  ;;  %v8045_v15 = vrot.slane %v6529_v46, 9 }
 0x3f2   : > { %13416 = vst [vmem:[#allocation55_spill] sm:$0xff] %v12351_v32  ;;  %13417 = vst [vmem:[#allocation56_spill] sm:$0xff] %v12355_v51  ;;  %v12364_v22 = vsel %vm11696_vm15, %v6661_v55, %v6662_v25  ;;  %v6668_v39 = vrot.slane %v6666_v9, 4  ;;  %v6673_v27 = vrot.slane %v12328_v26, 5  ;;  %v8046_v55 = vrot.slane %v6530_v59, 9 }
 0x3f3   : > { %13418 = vst [vmem:[#allocation57_spill] sm:$0xff] %v12364_v22  ;;  %v6680_v32 = vrot.slane %v12341_v4, 5  ;;  %v8047_v23 = vrot.slane %v6531_v16, 9  ;;  %v12383_v29 = vld [vmem:[#allocation2 + $0xd4] sm:$0x1]  ;;  %v5992_v22 = vshrl.u32 %v12232_v2, 16 }
 0x3f4   : > { %v12380_v25 = vsel %vm11696_vm15, %v6668_v39, %v6669_v21  ;;  %v6683_v39 = vrot.slane %v12367_v8, 5  ;;  %v6690_v59 = vrot.slane %v12383_v29, 5  ;;  %v9643_v16 = vld [vmem:[%s13224_s5 + $0x208] sm:$0xff]   ;;  %v12397_v21 = vsel %vm11696_vm15, %v8045_v15, %v6673_v27 }
 0x3f5   : > { %13420 = vst [vmem:[#allocation59_spill] sm:$0xff] %v12380_v25  ;;  %v6682_v51 = vrot.slane %v6680_v32, 4 }
 0x3f6   : > { %9048 = vmatmul.mubr.bf16.gmra.mrb[28].mxu1 %v9641_v61  ;;  %v12358_v61 = vld [vmem:[#allocation2 + $0xbc] sm:$0x1] }
 0x3f7   : > { %9067 = vmatprep.mubr.bf16.mxu1 %v12148_v45  ;;  %v12373_v45 = vsel %vm11696_vm15, %v8044_v43, %v6666_v9  ;;  %v6675_v9 = vrot.slane %v6673_v27, 4  ;;  %v6676_v46 = vrot.slane %v12358_v61, 5  ;;  %v6687_v43 = vrot.slane %v12376_v28, 5 }
 0x3f8   : > { %13419 = vst [vmem:[#allocation58_spill] sm:$0xff] %v12373_v45  ;;  %v12416_v27 = vsel %vm11696_vm15, %v8046_v55, %v6680_v32  ;;  %v12420_v15 = vsel %vm11696_vm15, %v6682_v51, %v6683_v39  ;;  %v13423_v32 = vshll.u32 %v12192_v62, 16  ;;  %v5994_v55 = vrot.slane %v5992_v22, 4 }
 0x3f9   : > { %v12401_v60 = vsel %vm11696_vm15, %v6675_v9, %v6676_v46  ;;  %v12405_v25 = vsel %vm11696_vm15, %v8047_v23, %v6687_v43  ;;  %v6689_v45 = vrot.slane %v6687_v43, 4  ;;  %v5974_v23 = vshll.u32 %v12230_v19, 16 }
 0x3fa   : > { %v8077_v41 = vcombine.low %v12397_v21, %v12401_v60  ;;  %v13422_v9 = vshrl.u32 %v12192_v62, 16  ;;  %v8078_v5 = vcombine.low %v12416_v27, %v12420_v15  ;;  %v13424_v19 = vshll.u32 %v12232_v2, 16 }
 0x3fb   : > { %v12430_v46 = vsel %vm11696_vm15, %v6689_v45, %v6690_v59  ;;  %v9644_v45 = vld [vmem:[%s13224_s5 + $0x210] sm:$0xff]   ;;  %v5961_v62 = vor.u32 %v12203_v40, %v12200_v30  ;;  %v5971_v2 = vor.u32 %v12214_v38, %v12208_v37  ;;  %v6003_v39 = vshrl.u32 %v5786_v33, 16 }
 0x3fc   : > { %v5981_v1 = vrot.slane %v13422_v9, 4  ;;  %v12438_v51 = vrot.slane %v13424_v19, 5  ;;  %v8079_v43 = vcombine.low %v12405_v25, %v12430_v46  ;;  %v6006_v22 = vshll.u32 %v5786_v33, 16  ;;  %v7162_v25 = vld [vmem:[%s13230_s11 + $0x8] sm:$0xff] }
 0x3fd   : > { %v6012_v59 = vshll.u32 %v12250_v42, 16  ;;  %v6016_v9 = vshrl.u32 %v12250_v42, 16  ;;  %v13428_v40 = vsel %vm10745_vm8, %v12158_v12, %v12172_v11  ;;  %v13429_v38 = vsel %vm10745_vm8, %v12154_v14, %v12111_v18  ;;  %v5789_v12 = vld [vmem:[#allocation2 + $0x84] sm:$0xf] }
 0x3fe   : > { %9068 = vmatmul.mubr.bf16.vlgmr.msra.gmra.mrb[0].mxu1 %v12166_v34  ;;  %v5984_v34 = vrot.slane %v13423_v32, 5  ;;  %v13426_v32 = vsel %vm10745_vm8, %v12152_v47, %v12170_v44  ;;  %v8012_v42 = vcombine.low %v13429_v38, %v13428_v40  ;;  %v13430_v33 = vshll.u32 %v12160_v48, 16  ;;  %v9645_v48 = vld [vmem:[%s13224_s5 + $0x218] sm:$0xff]  }
 0x3ff   : > { %9100 = vmatpush3.bf16.msra.mxu1 %v12116_v35  ;;  %9071 = vmatprep.mubr.bf16.mxu1 %v12168_v56  ;;  %v13425_v35 = vor.u32 %v12176_v49, %v12174_v6  ;;  %v13427_v49 = vsel %vm10745_vm8, %v12150_v58, %v12108_v54  ;;  %v5943_v54 = vsel %vm10745_vm8, %v12410_v13, %v12174_v6  ;;  %v5976_v58 = vrot.slane %v5974_v23, 5 }
 0x400   : > { %9101 = vmatprep.subr.bf16.mxu1 %v9643_v16  ;;  %v8011_v30 = vcombine.low %v13427_v49, %v13426_v32  ;;  %v5952_v47 = vrot.slane %v13430_v33, 5  ;;  %v5985_v44 = vor.u32 %v5984_v34, %v5981_v1  ;;  %v5995_v19 = vor.u32 %v5994_v55, %v12438_v51 }
 0x401   : > { %v5948_v56 = vrot.slane %v13425_v35, 4  ;;  %v5962_v18 = vrot.slane %v5961_v62, 4  ;;  %v5972_v14 = vrot.slane %v5971_v2, 4  ;;  %v5792_v35 = vld [vmem:[#allocation2 + $0x90] sm:$0xf]  ;;  %v6005_v32 = vrot.slane %v6003_v39, 4 }
 0x402   : > { %v6008_v13 = vrot.slane %v6006_v22, 5  ;;  %v12487_v6 = vrot.slane %v6012_v59, 5  ;;  %v6018_v23 = vrot.slane %v6016_v9, 4  ;;  %v6027_v1 = vshrl.u32 %v5789_v12, 16  ;;  %v9646_v22 = vld [vmem:[%s13224_s5 + $0x220] sm:$0xff]  }
 0x403   : > { %9102 = vmatpush3.bf16.msra.mxu1 %v9643_v16  ;;  %v5953_v11 = vsel %vm10745_vm8, %v5948_v56, %v5952_v47  ;;  %v5998_v16 = vshll.u32 %v12241_v31, 16  ;;  %v6030_v34 = vshll.u32 %v5789_v12, 16  ;;  %v6036_v55 = vshll.u32 %v12264_v0, 16 }
 0x404   : > { %9103 = vmatprep.subr.bf16.mxu1 %v9644_v45  ;;  %v6040_v56 = vshrl.u32 %v12264_v0, 16  ;;  %v5986_v62 = vrot.slane %v5985_v44, 4  ;;  %v5996_v2 = vrot.slane %v5995_v19, 4  ;;  %v6051_v49 = vshrl.u32 %v5792_v35, 16 }
 0x405   : > { %v6054_v40 = vshll.u32 %v5792_v35, 16  ;;  %v5967_v31 = vsel %vm10745_vm8, %v5962_v18, %v12208_v37  ;;  %v6000_v39 = vrot.slane %v5998_v16, 5  ;;  %v6060_v59 = vshll.u32 %v12276_v10, 16  ;;  %v5795_v16 = vld [vmem:[#allocation2 + $0x9c] sm:$0xf] }
 0x406   : > { %9072 = vmatmul.mubr.bf16.gmra.mrb[4].mxu1 %v8011_v30  ;;  %v6064_v0 = vshrl.u32 %v12276_v10, 16  ;;  %v6009_v9 = vor.u32 %v6008_v13, %v6005_v32  ;;  %v6019_v30 = vor.u32 %v6018_v23, %v12487_v6  ;;  %v6022_v38 = vshll.u32 %v12258_v24, 16 }
 0x407   : > { %9075 = vmatprep.mubr.bf16.mxu1 %v8012_v42  ;;  %9104 = vmatpush3.bf16.msra.mxu1 %v9644_v45  ;;  %v5977_v45 = vsel %vm10745_vm8, %v5972_v14, %v5976_v58  ;;  %v6029_v42 = vrot.slane %v6027_v1, 4  ;;  %v6032_v37 = vrot.slane %v6030_v34, 5  ;;  %v12503_v33 = vrot.slane %v6036_v55, 5  ;;  %v9647_v14 = vld [vmem:[%s13224_s5 + $0x228] sm:$0xff]  }
 0x408   : > { %9105 = vmatprep.subr.bf16.mxu1 %v9645_v48  ;;  %v6042_v47 = vrot.slane %v6040_v56, 4  ;;  %v5991_v44 = vsel %vm10745_vm8, %v5986_v62, %v12438_v51  ;;  %v6001_v10 = vsel %vm10745_vm8, %v5996_v2, %v6000_v39  ;;  %v6053_v19 = vrot.slane %v6051_v49, 4  ;;  %v5798_v51 = vld [vmem:[#allocation2 + $0xa8] sm:$0xf] }
 0x409   : > { %v6056_v58 = vrot.slane %v6054_v40, 5  ;;  %v8013_v12 = vcombine.low %v5943_v54, %v5953_v11  ;;  %v12510_v18 = vrot.slane %v6060_v59, 5  ;;  %v6066_v24 = vrot.slane %v6064_v0, 4 }
 0x40a   : > { %v8014_v35 = vcombine.low %v5967_v31, %v5977_v45  ;;  %v6010_v32 = vrot.slane %v6009_v9, 4  ;;  %v6024_v13 = vrot.slane %v6022_v38, 5  ;;  %v8015_v23 = vcombine.low %v5991_v44, %v6001_v10  ;;  %v9648_v31 = vld [vmem:[%s13224_s5 + $0x230] sm:$0xff]  }
 0x40b   : > { %9106 = vmatpush3.bf16.msra.mxu1 %v9645_v48  ;;  %v6020_v1 = vrot.slane %v6019_v30, 4  ;;  %v6033_v48 = vor.u32 %v6032_v37, %v6029_v42  ;;  %v6043_v34 = vor.u32 %v6042_v47, %v12503_v33  ;;  %v6057_v54 = vor.u32 %v6056_v58, %v6053_v19 }
 0x40c   : > { %9107 = vmatprep.subr.bf16.mxu1 %v9646_v22  ;;  %v6075_v11 = vshrl.u32 %v5795_v16, 16  ;;  %v6078_v55 = vshll.u32 %v5795_v16, 16  ;;  %v6084_v56 = vshll.u32 %v12297_v7, 16  ;;  %v6067_v62 = vor.u32 %v6066_v24, %v12510_v18  ;;  %v5801_v24 = vld [vmem:[#allocation2 + $0xb4] sm:$0xf] }
 0x40d   : > { %v6088_v2 = vshrl.u32 %v12297_v7, 16  ;;  %v6099_v49 = vshrl.u32 %v5798_v51, 16  ;;  %v6102_v40 = vshll.u32 %v5798_v51, 16  ;;  %v6015_v39 = vsel %vm10745_vm8, %v6010_v32, %v12487_v6 }
 0x40e   : > { %9076 = vmatmul.mubr.bf16.gmra.mrb[8].mxu1 %v8013_v12  ;;  %v6108_v59 = vshll.u32 %v12315_v20, 16  ;;  %v6112_v0 = vshrl.u32 %v12315_v20, 16  ;;  %v6025_v45 = vsel %vm10745_vm8, %v6020_v1, %v6024_v13  ;;  %v6034_v7 = vrot.slane %v6033_v48, 4  ;;  %v9649_v20 = vld [vmem:[%s13224_s5 + $0x238] sm:$0xff]   ;;  %v5804_v1 = vld [vmem:[#allocation2 + $0xc0] sm:$0xf] }
 0x40f   : > { %9079 = vmatprep.mubr.bf16.mxu1 %v8014_v35  ;;  %9108 = vmatpush3.bf16.msra.mxu1 %v9646_v22  ;;  %v6046_v22 = vshll.u32 %v12274_v50, 16  ;;  %v6044_v9 = vrot.slane %v6043_v34, 4  ;;  %v6070_v30 = vshll.u32 %v12295_v57, 16  ;;  %v6058_v38 = vrot.slane %v6057_v54, 4 }
 0x410   : > { %9109 = vmatprep.subr.bf16.mxu1 %v9647_v14  ;;  %v6077_v42 = vrot.slane %v6075_v11, 4  ;;  %v6080_v37 = vrot.slane %v6078_v55, 5  ;;  %v12531_v47 = vrot.slane %v6084_v56, 5  ;;  %v6068_v6 = vrot.slane %v6067_v62, 4 }
 0x411   : > { %v6090_v44 = vrot.slane %v6088_v2, 4  ;;  %v6101_v50 = vrot.slane %v6099_v49, 4  ;;  %v6104_v10 = vrot.slane %v6102_v40, 5  ;;  %v8016_v19 = vcombine.low %v6015_v39, %v6025_v45 }
 0x412   : > { %v6048_v58 = vrot.slane %v6046_v22, 5  ;;  %v12536_v12 = vrot.slane %v6108_v59, 5  ;;  %v6114_v57 = vrot.slane %v6112_v0, 4  ;;  %v6072_v16 = vrot.slane %v6070_v30, 5 }
 0x413   : > { %9110 = vmatpush3.bf16.msra.mxu1 %v9647_v14  ;;  %v6039_v14 = vsel %vm10745_vm8, %v6034_v7, %v12503_v33  ;;  %v6063_v32 = vsel %vm10745_vm8, %v6058_v38, %v12510_v18  ;;  %v6081_v13 = vor.u32 %v6080_v37, %v6077_v42  ;;  %v6094_v51 = vshll.u32 %v12306_v53, 16  ;;  %v5807_v7 = vld [vmem:[#allocation2 + $0xcc] sm:$0xf] }
 0x414   : > { %9111 = vmatprep.subr.bf16.mxu1 %v9648_v31  ;;  %v6049_v35 = vsel %vm10745_vm8, %v6044_v9, %v6048_v58  ;;  %v6091_v48 = vor.u32 %v6090_v44, %v12531_v47  ;;  %v6105_v33 = vor.u32 %v6104_v10, %v6101_v50  ;;  %v6123_v34 = vshrl.u32 %v5801_v24, 16 }
 0x415   : > { %v6115_v54 = vor.u32 %v6114_v57, %v12536_v12  ;;  %v6126_v11 = vshll.u32 %v5801_v24, 16  ;;  %v6132_v55 = vshll.u32 %v12328_v26, 16  ;;  %v6136_v18 = vshrl.u32 %v12328_v26, 16 }
 0x416   : > { %9080 = vmatmul.mubr.bf16.gmra.mrb[12].mxu1 %v8015_v23  ;;  %v6073_v23 = vsel %vm10745_vm8, %v6068_v6, %v6072_v16  ;;  %v6147_v56 = vshrl.u32 %v5804_v1, 16  ;;  %v6150_v62 = vshll.u32 %v5804_v1, 16  ;;  %v6156_v53 = vshll.u32 %v12341_v4, 16 }
 0x417   : > { %9083 = vmatprep.mubr.bf16.mxu1 %v8016_v19  ;;  %9112 = vmatpush3.bf16.msra.mxu1 %v9648_v31  ;;  %v6160_v2 = vshrl.u32 %v12341_v4, 16  ;;  %v8017_v49 = vcombine.low %v6039_v14, %v6049_v35  ;;  %v8018_v40 = vcombine.low %v6063_v32, %v6073_v23  ;;  %v6082_v31 = vrot.slane %v6081_v13, 4 }
 0x418   : > { %9113 = vmatprep.subr.bf16.mxu1 %v9649_v20  ;;  %v6096_v39 = vrot.slane %v6094_v51, 5  ;;  %v6092_v22 = vrot.slane %v6091_v48, 4  ;;  %v6106_v59 = vrot.slane %v6105_v33, 4  ;;  %v6118_v0 = vshll.u32 %v12322_v17, 16 }
 0x419   : > { %v6125_v45 = vrot.slane %v6123_v34, 4  ;;  %v6116_v9 = vrot.slane %v6115_v54, 4  ;;  %v6128_v30 = vrot.slane %v6126_v11, 5  ;;  %v6134_v26 = vrot.slane %v6132_v55, 5 }
 0x41a   : > { %v6138_v38 = vrot.slane %v6136_v18, 4  ;;  %v6149_v42 = vrot.slane %v6147_v56, 4  ;;  %v6152_v37 = vrot.slane %v6150_v62, 5  ;;  %v6158_v6 = vrot.slane %v6156_v53, 5 }
 0x41b   : > { %9114 = vmatpush3.bf16.msra.mxu1 %v9649_v20  ;;  %v6162_v4 = vrot.slane %v6160_v2, 4  ;;  %v6171_v44 = vshrl.u32 %v5807_v7, 16  ;;  %v6174_v50 = vshll.u32 %v5807_v7, 16  ;;  %v6180_v10 = vshll.u32 %v12376_v28, 16 }
 0x41c   : > { %v6184_v20 = vshrl.u32 %v12376_v28, 16  ;;  %v6087_v17 = vsel %vm10745_vm8, %v6082_v31, %v12531_v47  ;;  %v6120_v19 = vrot.slane %v6118_v0, 5  ;;  %v6097_v58 = vsel %vm10745_vm8, %v6092_v22, %v6096_v39  ;;  %v6516_v0 = vld [vmem:[#allocation2 + $0x18] sm:$0xe] }
 0x41d   : > { %v6129_v57 = vor.u32 %v6128_v30, %v6125_v45  ;;  %v6139_v24 = vor.u32 %v6138_v38, %v6134_v26  ;;  %v6142_v14 = vshll.u32 %v12358_v61, 16  ;;  %v6111_v16 = vsel %vm10745_vm8, %v6106_v59, %v12536_v12  ;;  %v13431_v38 = vld [vmem:[#allocation37_spill] sm:$0xff] }
 0x41e   : > { %9084 = vmatmul.mubr.bf16.gmra.mrb[16].mxu1 %v8017_v49  ;;  %v6121_v35 = vsel %vm10745_vm8, %v6116_v9, %v6120_v19  ;;  %v6153_v28 = vor.u32 %v6152_v37, %v6149_v42  ;;  %v6163_v32 = vor.u32 %v6162_v4, %v6158_v6  ;;  %v6173_v13 = vrot.slane %v6171_v44, 4  ;;  %v6517_v4 = vld [vmem:[#allocation2 + $0x24] sm:$0xe] }
 0x41f   : > { %9087 = vmatprep.mubr.bf16.mxu1 %v8018_v40  ;;  %v6176_v51 = vrot.slane %v6174_v50, 5  ;;  %v6182_v47 = vrot.slane %v6180_v10, 5  ;;  %v6186_v1 = vrot.slane %v6184_v20, 4  ;;  %v8019_v23 = vcombine.low %v6087_v17, %v6097_v58  ;;  %v13433_v58 = vld [vmem:[#allocation40_spill] sm:$0xff] }
 0x420   : > { %v6166_v48 = vshll.u32 %v12367_v8, 16  ;;  %v8020_v33 = vcombine.low %v6111_v16, %v6121_v35  ;;  %v6130_v34 = vrot.slane %v6129_v57, 4  ;;  %v6140_v54 = vrot.slane %v6139_v24, 4  ;;  %v13434_v57 = vld [vmem:[#allocation38_spill] sm:$0xff]  ;;  %v13436_v35 = vld [vmem:[#allocation39_spill] sm:$0xff] }
 0x421   : > { %v6154_v61 = vrot.slane %v6153_v28, 4  ;;  %v6164_v11 = vrot.slane %v6163_v32, 4  ;;  %v6144_v12 = vrot.slane %v6142_v14, 5  ;;  %v6177_v55 = vor.u32 %v6176_v51, %v6173_v13  ;;  %v13437_v28 = vld [vmem:[#allocation43_spill] sm:$0xff]  ;;  %v13439_v51 = vld [vmem:[#allocation41_spill] sm:$0xff] }
 0x422   : > { %v6187_v18 = vor.u32 %v6186_v1, %v6182_v47  ;;  %v6190_v56 = vshll.u32 %v12383_v29, 16  ;;  %v6168_v62 = vrot.slane %v6166_v48, 5  ;;  %v6135_v53 = vsel %vm10745_vm8, %v6130_v34, %v6134_v26  ;;  %v13443_v34 = vld [vmem:[#allocation45_spill] sm:$0xff] }
 0x423   : > { %v6145_v2 = vsel %vm10745_vm8, %v6140_v54, %v6144_v12  ;;  %v6159_v8 = vsel %vm10745_vm8, %v6154_v61, %v6158_v6  ;;  %v6582_v40 = vrot.slane %v12059_v3, 5  ;;  %v6178_v31 = vrot.slane %v6177_v55, 4  ;;  %v13446_v12 = vld [vmem:[#allocation47_spill] sm:$0xff] }
 0x424   : > { %v6169_v49 = vsel %vm10745_vm8, %v6164_v11, %v6168_v62  ;;  %v6188_v39 = vrot.slane %v6187_v18, 4  ;;  %v6192_v22 = vrot.slane %v6190_v56, 5  ;;  %v8021_v59 = vcombine.low %v6135_v53, %v6145_v2  ;;  %v13445_v11 = vld [vmem:[#allocation44_spill] sm:$0xff]  ;;  %v13449_v2 = vld [vmem:[#allocation49_spill] sm:$0xff] }
 0x425   : > { %v8022_v29 = vcombine.low %v6159_v8, %v6169_v49  ;;  %v6584_v45 = vrot.slane %v6582_v40, 4  ;;  %v6183_v7 = vsel %vm10745_vm8, %v6178_v31, %v6182_v47  ;;  %v8032_v30 = vrot.slane %v6516_v0, 9  ;;  %v13440_v47 = vld [vmem:[#allocation42_spill] sm:$0xff]  ;;  %v13448_v53 = vld [vmem:[#allocation48_spill] sm:$0xff]  ;;  %v13452_v31 = vld [vmem:[#allocation51_spill] sm:$0xff] }
 0x426   : > { %9088 = vmatmul.mubr.bf16.gmra.mrb[20].mxu1 %v8019_v23  ;;  %v6193_v9 = vsel %vm10745_vm8, %v6188_v39, %v6192_v22  ;;  %v6585_v26 = vrot.slane %v12079_v36, 5  ;;  %v6589_v3 = vrot.slane %v13431_v38, 5  ;;  %v8033_v10 = vrot.slane %v6517_v4, 9  ;;  %v13454_v0 = vld [vmem:[#allocation52_spill] sm:$0xff]  ;;  %v13461_v4 = vld [vmem:[#allocation57_spill] sm:$0xff] }
 0x427   : > { %9091 = vmatprep.mubr.bf16.mxu1 %v8020_v33  ;;  %v8023_v42 = vcombine.low %v6183_v7, %v6193_v9  ;;  %v6583_v6 = vsel %vm11696_vm15, %v8032_v30, %v6582_v40  ;;  %v6592_v20 = vrot.slane %v13432_v52, 5  ;;  %v13435_v24 = vcombine.low %v13433_v58, %v13434_v57  ;;  %v13442_v33 = vld [vmem:[#allocation46_spill] sm:$0xff]  ;;  %v13464_v52 = vld [vmem:[#allocation59_spill] sm:$0xff] }
 0x428   : > { %v6586_v37 = vsel %vm11696_vm15, %v6584_v45, %v6585_v26  ;;  %v6591_v50 = vrot.slane %v6589_v3, 4  ;;  %v6590_v17 = vsel %vm11696_vm15, %v8033_v10, %v6589_v3  ;;  %v13438_v32 = vcombine.low %v13436_v35, %v13437_v28  ;;  %v13451_v40 = vld [vmem:[#allocation50_spill] sm:$0xff]  ;;  %v13455_v45 = vld [vmem:[#allocation53_spill] sm:$0xff]  ;;  %v13458_v26 = vld [vmem:[#allocation55_spill] sm:$0xff] }
 0x429   : > { %v8064_v44 = vcombine.low %v6583_v6, %v6586_v37  ;;  %v13441_v63 = vcombine.low %v13439_v51, %v13440_v47  ;;  %v13444_v54 = vcombine.low %v13442_v33, %v13443_v34  ;;  %v13447_v55 = vcombine.low %v13445_v11, %v13446_v12  ;;  %v13457_v30 = vld [vmem:[#allocation54_spill] sm:$0xff]  ;;  %v13460_v6 = vld [vmem:[#allocation56_spill] sm:$0xff]  ;;  %v7164_v51 = vld [vmem:[%s13230_s11 + $0x18] sm:$0xff] }
 0x42a   : > { %v6593_v36 = vsel %vm11696_vm15, %v6591_v50, %v6592_v20  ;;  %v13450_v8 = vcombine.low %v13448_v53, %v13449_v2  ;;  %v13453_v39 = vcombine.low %v13451_v40, %v13452_v31  ;;  %v13456_v7 = vcombine.low %v13454_v0, %v13455_v45  ;;  %v13463_v10 = vld [vmem:[#allocation58_spill] sm:$0xff]  ;;  %v7166_v33 = vld [vmem:[%s13230_s11 + $0x28] sm:$0xff]  ;;  %v7168_v11 = vld [vmem:[%s13230_s11 + $0x38] sm:$0xff] }
 0x42b   : > { %v8065_v19 = vcombine.low %v6590_v17, %v6593_v36  ;;  %v13459_v38 = vcombine.low %v13457_v30, %v13458_v26  ;;  %v13465_v20 = vcombine.low %v13463_v10, %v13464_v52  ;;  %v7170_v53 = vld [vmem:[%s13230_s11 + $0x48] sm:$0xff]  ;;  %v7172_v40 = vld [vmem:[%s13230_s11 + $0x58] sm:$0xff]  ;;  %v7173_v31 = vld [vmem:[%s13230_s11 + $0x60] sm:$0xff] }
 0x42c   : > { %v7174_v0 = vld [vmem:[%s13230_s11 + $0x68] sm:$0xff]  ;;  %v7176_v30 = vld [vmem:[%s13230_s11 + $0x78] sm:$0xff] }
 0x42d   : > { %v9225_v45 = vpack.c.bf16 %v7174_v0, %v7173_v31 }
 0x42e   : > { %9092 = vmatmul.mubr.bf16.gmra.mrb[24].mxu1 %v8021_v59 }
 0x42f   : > { %9095 = vmatprep.mubr.bf16.mxu1 %v8022_v29 }
 0x436   : > { %9096 = vmatmul.mubr.bf16.gmra.mrb[28].mxu1 %v8023_v42 }
 0x437   : > { %9115 = vmatprep.mubr.bf16.mxu1 %v8064_v44  ;;  %v13462_v44 = vcombine.low %v13460_v6, %v13461_v4  ;;  %v12759_v6 = vld [vmem:[%s13225_s6] ss:$0 sm:$0xff] }
 0x43e   : > { %9116 = vmatmul.mubr.bf16.vlgmr.msra.gmra.mrb[0].mxu1 %v8065_v19 }
 0x43f   : > { %9119 = vmatprep.mubr.bf16.mxu1 %v13435_v24 }
 0x442   : > { %v12598_v14 = vpop.f32.mrb[68].mxu0 }
 0x443   : > { %v12600_v16 = vpop.f32.mrb[69].mxu0 }
 0x444   : > { %v12605_v13 = vpop.f32.mrb[70].mxu0 }
 0x445   : > { %v12610_v1 = vpop.f32.mrb[71].mxu0 }
 0x446   : > { %9120 = vmatmul.mubr.bf16.gmra.mrb[4].mxu1 %v13438_v32  ;;  %v7163_v32 = vld [vmem:[%s13230_s11 + $0x10] sm:$0xff] }
 0x447   : > { %9123 = vmatprep.mubr.bf16.mxu1 %v13441_v63  ;;  %v9210_v47 = vpack.c.bf16 %v7164_v51, %v7163_v32  ;;  %v7165_v63 = vld [vmem:[%s13230_s11 + $0x20] sm:$0xff] }
 0x448   : > { %v9213_v34 = vpack.c.bf16 %v7166_v33, %v7165_v63 }
 0x44a   : > { %v12612_v23 = vpop.f32.mrb[72].mxu0 }
 0x44b   : > { %v12614_v48 = vpop.f32.mrb[73].mxu0 }
 0x44c   : > { %v12619_v61 = vpop.f32.mrb[74].mxu0 }
 0x44d   : > { %v12624_v18 = vpop.f32.mrb[75].mxu0 }
 0x44e   : > { %9124 = vmatmul.mubr.bf16.gmra.mrb[8].mxu1 %v13444_v54  ;;  %v7167_v54 = vld [vmem:[%s13230_s11 + $0x30] sm:$0xff] }
 0x44f   : > { %9127 = vmatprep.mubr.bf16.mxu1 %v13447_v55  ;;  %v9216_v12 = vpack.c.bf16 %v7168_v11, %v7167_v54  ;;  %v7169_v55 = vld [vmem:[%s13230_s11 + $0x40] sm:$0xff] }
 0x450   : > { %v9219_v2 = vpack.c.bf16 %v7170_v53, %v7169_v55 }
 0x453   : > { %v12626_v56 = vpop.f32.mrb[76].mxu0 }
 0x454   : > { %v12628_v62 = vpop.f32.mrb[77].mxu0 }
 0x455   : > { %v12633_v49 = vpop.f32.mrb[78].mxu0 }
 0x456   : > { %9128 = vmatmul.mubr.bf16.gmra.mrb[12].mxu1 %v13450_v8  ;;  %v12638_v22 = vpop.f32.mrb[79].mxu0  ;;  %v7171_v8 = vld [vmem:[%s13230_s11 + $0x50] sm:$0xff] }
 0x457   : > { %9131 = vmatprep.mubr.bf16.mxu1 %v13453_v39  ;;  %v9222_v39 = vpack.c.bf16 %v7172_v40, %v7171_v8 }
 0x45b   : > { %v12640_v59 = vpop.f32.mrb[80].mxu0 }
 0x45c   : > { %v12642_v29 = vpop.f32.mrb[81].mxu0 }
 0x45d   : > { %v12647_v9 = vpop.f32.mrb[82].mxu0 }
 0x45e   : > { %9132 = vmatmul.mubr.bf16.gmra.mrb[16].mxu1 %v13456_v7  ;;  %v12652_v3 = vpop.f32.mrb[83].mxu0  ;;  %v7175_v7 = vld [vmem:[%s13230_s11 + $0x70] sm:$0xff] }
 0x45f   : > { %9135 = vmatprep.mubr.bf16.mxu1 %v13459_v38  ;;  %v9228_v26 = vpack.c.bf16 %v7176_v30, %v7175_v7 }
 0x463   : > { %v12654_v42 = vpop.f32.mrb[84].mxu0 }
 0x464   : > { %v12656_v37 = vpop.f32.mrb[85].mxu0 }
 0x465   : > { %v12661_v50 = vpop.f32.mrb[86].mxu0 }
 0x466   : > { %9136 = vmatmul.mubr.bf16.gmra.mrb[20].mxu1 %v13462_v44  ;;  %v12666_v36 = vpop.f32.mrb[87].mxu0 }
 0x467   : > { %9139 = vmatprep.mubr.bf16.mxu1 %v13465_v20 }
 0x46b   : > { %v12668_v17 = vpop.f32.mrb[88].mxu0 }
 0x46c   : > { %v12670_v19 = vpop.f32.mrb[89].mxu0 }
 0x46d   : > { %v12675_v58 = vpop.f32.mrb[90].mxu0 }
 0x46e   : > { %9140 = vmatmul.mubr.bf16.gmra.mrb[24].mxu1 %v8077_v41  ;;  %v12680_v57 = vpop.f32.mrb[91].mxu0 }
 0x46f   : > { %9143 = vmatprep.mubr.bf16.mxu1 %v8078_v5  ;;  %v7161_v5 = vld [vmem:[%s13230_s11] sm:$0xff] }
 0x470   : > { %v9207_v46 = vpack.c.bf16 %v7162_v25, %v7161_v5 }
 0x472   : > { %9208 = vmatpush3.bf16.msra.mxu0 %v9207_v46 }
 0x473   : > { %v12682_v24 = vpop.f32.mrb[92].mxu0 }
 0x474   : > { %v12684_v35 = vpop.f32.mrb[93].mxu0 }
 0x475   : > { %v12689_v28 = vpop.f32.mrb[94].mxu0 }
 0x476   : > { %9144 = vmatmul.mubr.bf16.gmra.mrb[28].mxu1 %v8079_v43  ;;  %v12691_v60 = vpop.f32.mrb[95].mxu0  ;;  %v13466_v43 = vmov 0.0|0.0  }
 0x477   : > { %9209 = vmatprep.subr.bf16.mxu0 %v13466_v43 }
 0x478   : > { %9211 = vmatpush3.bf16.msra.mxu0 %v9210_v47 }
 0x479   : > { %9212 = vmatprep.subr.bf16.mxu0 %v13466_v43 }
 0x47b   : > { %v12693_v41 = vpop.f32.mrb[96].mxu0 }
 0x47c   : > { %v12695_v21 = vpop.f32.mrb[97].mxu0  ;;  %9214 = vmatpush3.bf16.msra.mxu0 %v9213_v34 }
 0x47d   : > { %v12697_v27 = vpop.f32.mrb[98].mxu0  ;;  %9215 = vmatprep.subr.bf16.mxu0 %v13466_v43 }
 0x47e   : > { %v12699_v15 = vpop.f32.mrb[99].mxu0 }
 0x480   : > { %9217 = vmatpush3.bf16.msra.mxu0 %v9216_v12 }
 0x481   : > { %9218 = vmatprep.subr.bf16.mxu0 %v13466_v43 }
 0x484   : > { %9220 = vmatpush3.bf16.msra.mxu0 %v9219_v2 }
 0x485   : > { %9221 = vmatprep.subr.bf16.mxu0 %v13466_v43 }
 0x488   : > { %9223 = vmatpush3.bf16.msra.mxu0 %v9222_v39 }
 0x489   : > { %9224 = vmatprep.subr.bf16.mxu0 %v13466_v43 }
 0x48c   : > { %9226 = vmatpush3.bf16.msra.mxu0 %v9225_v45 }
 0x48d   : > { %9227 = vmatprep.subr.bf16.mxu0 %v13466_v43 }
 0x490   : > { %9229 = vmatpush3.bf16.msra.mxu0 %v9228_v26 }
 0x511   : > { %v9117_v38 = vpop.f32.mrb[0].mxu1 }
 0x512   : > { %v9230_v4 = vadd.f32 %v9117_v38, %v12598_v14  ;;  %v6855_v44 = vpop.f32.mrb[1].mxu1 }
 0x513   : > { %v9231_v10 = vadd.f32 %v6855_v44, %v12600_v16  ;;  %v9118_v52 = vpop.f32.mrb[2].mxu1 }
 0x514   : > { %v9232_v20 = vadd.f32 %v9118_v52, %v12605_v13  ;;  %v6858_v5 = vpop.f32.mrb[3].mxu1  ;;  %v12769_v43 = vadd.f32 %v9230_v4, %v12759_v6 }
 0x515   : > { %v12765_v25 = vadd.f32 %v9231_v10, %v12759_v6  ;;  %v9233_v46 = vadd.f32 %v6858_v5, %v12610_v1 }
 0x516   : > { %v12775_v14 = vadd.f32 %v9232_v20, %v12759_v6  ;;  %v7093_v33 = vmul.f32 %v12769_v43, %v12769_v43 }
 0x517   : > { %v12772_v32 = vadd.f32 %v9233_v46, %v12759_v6  ;;  %v7091_v16 = vmul.f32 %v12765_v25, %v12765_v25 }
 0x518   : > { %v7094_v55 = vmul.f32 %v12775_v14, %v12775_v14 }
 0x519   : > { %v7054_v13 = vadd.f32 %v12772_v32, %v12765_v25  ;;  %v7092_v51 = vmul.f32 %v12772_v32, %v12772_v32  ;;  %v9121_v47 = vpop.f32.mrb[4].mxu1 }
 0x51a   : > { %v9234_v1 = vadd.f32 %v9121_v47, %v12612_v23  ;;  %v6871_v63 = vpop.f32.mrb[5].mxu1 }
 0x51b   : > { %v7055_v34 = vadd.f32 %v7054_v13, %v12769_v43  ;;  %v7123_v54 = vadd.f32 %v7092_v51, %v7091_v16  ;;  %v9235_v11 = vadd.f32 %v6871_v63, %v12614_v48  ;;  %v9122_v12 = vpop.f32.mrb[6].mxu1 }
 0x51c   : > { %v9236_v53 = vadd.f32 %v9122_v12, %v12619_v61  ;;  %v6874_v2 = vpop.f32.mrb[7].mxu1  ;;  %v12797_v39 = vadd.f32 %v9234_v1, %v12759_v6 }
 0x51d   : > { %v7124_v8 = vadd.f32 %v7123_v54, %v7093_v33  ;;  %v12792_v40 = vadd.f32 %v9235_v11, %v12759_v6  ;;  %v7056_v23 = vadd.f32 %v7055_v34, %v12775_v14  ;;  %v9237_v31 = vadd.f32 %v6874_v2, %v12624_v18 }
 0x51e   : > { %v12806_v7 = vadd.f32 %v9236_v53, %v12759_v6  ;;  %v7097_v10 = vmul.f32 %v12797_v39, %v12797_v39 }
 0x51f   : > { %v7057_v48 = vadd.f32 %v7056_v23, %v12792_v40  ;;  %v7095_v0 = vmul.f32 %v12792_v40, %v12792_v40  ;;  %v7125_v45 = vadd.f32 %v7124_v8, %v7094_v55  ;;  %v12803_v61 = vadd.f32 %v9237_v31, %v12759_v6 }
 0x520   : > { %v7098_v16 = vmul.f32 %v12806_v7, %v12806_v7 }
 0x521   : > { %v7126_v30 = vadd.f32 %v7125_v45, %v7095_v0  ;;  %v7058_v26 = vadd.f32 %v7057_v48, %v12803_v61  ;;  %v7096_v18 = vmul.f32 %v12803_v61, %v12803_v61  ;;  %v9125_v38 = vpop.f32.mrb[8].mxu1 }
 0x522   : > { %v9238_v4 = vadd.f32 %v9125_v38, %v12626_v56  ;;  %v6887_v44 = vpop.f32.mrb[9].mxu1 }
 0x523   : > { %v7059_v52 = vadd.f32 %v7058_v26, %v12797_v39  ;;  %v7127_v20 = vadd.f32 %v7126_v30, %v7096_v18  ;;  %v9239_v5 = vadd.f32 %v6887_v44, %v12628_v62  ;;  %v9126_v46 = vpop.f32.mrb[10].mxu1 }
 0x524   : > { %v9240_v13 = vadd.f32 %v9126_v46, %v12633_v49  ;;  %v6890_v51 = vpop.f32.mrb[11].mxu1  ;;  %v12825_v33 = vadd.f32 %v9238_v4, %v12759_v6 }
 0x525   : > { %v7128_v47 = vadd.f32 %v7127_v20, %v7097_v10  ;;  %v12820_v1 = vadd.f32 %v9239_v5, %v12759_v6  ;;  %v7060_v56 = vadd.f32 %v7059_v52, %v12806_v7  ;;  %v9241_v63 = vadd.f32 %v6890_v51, %v12638_v22 }
 0x526   : > { %v12834_v11 = vadd.f32 %v9240_v13, %v12759_v6  ;;  %v7101_v23 = vmul.f32 %v12825_v33, %v12825_v33 }
 0x527   : > { %v7061_v62 = vadd.f32 %v7060_v56, %v12820_v1  ;;  %v7099_v34 = vmul.f32 %v12820_v1, %v12820_v1  ;;  %v7129_v54 = vadd.f32 %v7128_v47, %v7098_v16  ;;  %v12831_v49 = vadd.f32 %v9241_v63, %v12759_v6 }
 0x528   : > { %v7102_v30 = vmul.f32 %v12834_v11, %v12834_v11 }
 0x529   : > { %v7130_v12 = vadd.f32 %v7129_v54, %v7099_v34  ;;  %v7062_v55 = vadd.f32 %v7061_v62, %v12831_v49  ;;  %v7100_v22 = vmul.f32 %v12831_v49, %v12831_v49  ;;  %v9129_v53 = vpop.f32.mrb[12].mxu1 }
 0x52a   : > { %v9242_v2 = vadd.f32 %v9129_v53, %v12640_v59  ;;  %v6903_v8 = vpop.f32.mrb[13].mxu1 }
 0x52b   : > { %v7063_v31 = vadd.f32 %v7062_v55, %v12825_v33  ;;  %v7131_v48 = vadd.f32 %v7130_v12, %v7100_v22  ;;  %v9243_v0 = vadd.f32 %v6903_v8, %v12642_v29  ;;  %v9130_v45 = vpop.f32.mrb[14].mxu1 }
 0x52c   : > { %v9244_v26 = vadd.f32 %v9130_v45, %v12647_v9  ;;  %v6906_v18 = vpop.f32.mrb[15].mxu1  ;;  %v12853_v10 = vadd.f32 %v9242_v2, %v12759_v6 }
 0x52d   : > { %v7132_v38 = vadd.f32 %v7131_v48, %v7101_v23  ;;  %v12848_v4 = vadd.f32 %v9243_v0, %v12759_v6  ;;  %v7064_v59 = vadd.f32 %v7063_v31, %v12834_v11  ;;  %v9245_v44 = vadd.f32 %v6906_v18, %v12652_v3 }
 0x52e   : > { %v12862_v5 = vadd.f32 %v9244_v26, %v12759_v6  ;;  %v7105_v56 = vmul.f32 %v12853_v10, %v12853_v10 }
 0x52f   : > { %v7065_v29 = vadd.f32 %v7064_v59, %v12848_v4  ;;  %v7103_v52 = vmul.f32 %v12848_v4, %v12848_v4  ;;  %v7133_v20 = vadd.f32 %v7132_v38, %v7102_v30  ;;  %v12859_v9 = vadd.f32 %v9245_v44, %v12759_v6 }
 0x530   : > { %v7106_v12 = vmul.f32 %v12862_v5, %v12862_v5 }
 0x531   : > { %v7134_v46 = vadd.f32 %v7133_v20, %v7103_v52  ;;  %v7066_v16 = vadd.f32 %v7065_v29, %v12859_v9  ;;  %v7104_v3 = vmul.f32 %v12859_v9, %v12859_v9  ;;  %v9133_v13 = vpop.f32.mrb[16].mxu1 }
 0x532   : > { %v9246_v51 = vadd.f32 %v9133_v13, %v12654_v42  ;;  %v6919_v47 = vpop.f32.mrb[17].mxu1 }
 0x533   : > { %v7067_v63 = vadd.f32 %v7066_v16, %v12853_v10  ;;  %v7135_v62 = vadd.f32 %v7134_v46, %v7104_v3  ;;  %v9247_v34 = vadd.f32 %v6919_v47, %v12656_v37  ;;  %v9134_v54 = vpop.f32.mrb[18].mxu1 }
 0x534   : > { %v9248_v55 = vadd.f32 %v9134_v54, %v12661_v50  ;;  %v6922_v22 = vpop.f32.mrb[19].mxu1  ;;  %v12881_v23 = vadd.f32 %v9246_v51, %v12759_v6 }
 0x535   : > { %v7136_v53 = vadd.f32 %v7135_v62, %v7105_v56  ;;  %v12876_v2 = vadd.f32 %v9247_v34, %v12759_v6  ;;  %v7068_v42 = vadd.f32 %v7067_v63, %v12862_v5  ;;  %v9249_v8 = vadd.f32 %v6922_v22, %v12666_v36 }
 0x536   : > { %v12890_v0 = vadd.f32 %v9248_v55, %v12759_v6  ;;  %v7109_v59 = vmul.f32 %v12881_v23, %v12881_v23 }
 0x537   : > { %v7069_v37 = vadd.f32 %v7068_v42, %v12876_v2  ;;  %v7107_v31 = vmul.f32 %v12876_v2, %v12876_v2  ;;  %v7137_v48 = vadd.f32 %v7136_v53, %v7106_v12  ;;  %v12887_v50 = vadd.f32 %v9249_v8, %v12759_v6 }
 0x538   : > { %v7110_v46 = vmul.f32 %v12890_v0, %v12890_v0 }
 0x539   : > { %v7138_v45 = vadd.f32 %v7137_v48, %v7107_v31  ;;  %v7070_v30 = vadd.f32 %v7069_v37, %v12887_v50  ;;  %v7108_v36 = vmul.f32 %v12887_v50, %v12887_v50  ;;  %v9137_v26 = vpop.f32.mrb[20].mxu1 }
 0x53a   : > { %v9250_v18 = vadd.f32 %v9137_v26, %v12668_v17  ;;  %v6935_v38 = vpop.f32.mrb[21].mxu1 }
 0x53b   : > { %v7071_v44 = vadd.f32 %v7070_v30, %v12881_v23  ;;  %v7139_v29 = vadd.f32 %v7138_v45, %v7108_v36  ;;  %v9251_v52 = vadd.f32 %v6935_v38, %v12670_v19  ;;  %v9138_v20 = vpop.f32.mrb[22].mxu1 }
 0x53c   : > { %v9252_v16 = vadd.f32 %v9138_v20, %v12675_v58  ;;  %v6938_v3 = vpop.f32.mrb[23].mxu1  ;;  %v12909_v56 = vadd.f32 %v9250_v18, %v12759_v6 }
 0x53d   : > { %v7140_v13 = vadd.f32 %v7139_v29, %v7109_v59  ;;  %v12904_v51 = vadd.f32 %v9251_v52, %v12759_v6  ;;  %v7072_v17 = vadd.f32 %v7071_v44, %v12890_v0  ;;  %v9253_v47 = vadd.f32 %v6938_v3, %v12680_v57 }
 0x53e   : > { %v12918_v34 = vadd.f32 %v9252_v16, %v12759_v6  ;;  %v7113_v42 = vmul.f32 %v12909_v56, %v12909_v56 }
 0x53f   : > { %v7073_v19 = vadd.f32 %v7072_v17, %v12904_v51  ;;  %v7111_v63 = vmul.f32 %v12904_v51, %v12904_v51  ;;  %v7141_v62 = vadd.f32 %v7140_v13, %v7110_v46  ;;  %v12915_v58 = vadd.f32 %v9253_v47, %v12759_v6 }
 0x540   : > { %v7114_v45 = vmul.f32 %v12918_v34, %v12918_v34 }
 0x541   : > { %v7142_v54 = vadd.f32 %v7141_v62, %v7111_v63  ;;  %v7074_v12 = vadd.f32 %v7073_v19, %v12915_v58  ;;  %v7112_v57 = vmul.f32 %v12915_v58, %v12915_v58  ;;  %v9141_v55 = vpop.f32.mrb[24].mxu1 }
 0x542   : > { %v9254_v22 = vadd.f32 %v9141_v55, %v12682_v24  ;;  %v6951_v53 = vpop.f32.mrb[25].mxu1 }
 0x543   : > { %v7075_v8 = vadd.f32 %v7074_v12, %v12909_v56  ;;  %v7143_v37 = vadd.f32 %v7142_v54, %v7112_v57  ;;  %v9255_v31 = vadd.f32 %v6951_v53, %v12684_v35  ;;  %v9142_v48 = vpop.f32.mrb[26].mxu1 }
 0x544   : > { %v9256_v30 = vadd.f32 %v9142_v48, %v12689_v28  ;;  %v6954_v36 = vpop.f32.mrb[27].mxu1  ;;  %v12937_v59 = vadd.f32 %v9254_v22, %v12759_v6 }
 0x545   : > { %v7144_v26 = vadd.f32 %v7143_v37, %v7113_v42  ;;  %v12932_v18 = vadd.f32 %v9255_v31, %v12759_v6  ;;  %v7076_v24 = vadd.f32 %v7075_v8, %v12918_v34  ;;  %v9257_v38 = vadd.f32 %v6954_v36, %v12691_v60 }
 0x546   : > { %v12946_v52 = vadd.f32 %v9256_v30, %v12759_v6  ;;  %v7117_v17 = vmul.f32 %v12937_v59, %v12937_v59 }
 0x547   : > { %v7077_v35 = vadd.f32 %v7076_v24, %v12932_v18  ;;  %v7115_v44 = vmul.f32 %v12932_v18, %v12932_v18  ;;  %v7145_v29 = vadd.f32 %v7144_v26, %v7114_v45  ;;  %v12943_v28 = vadd.f32 %v9257_v38, %v12759_v6 }
 0x548   : > { %v7118_v54 = vmul.f32 %v12946_v52, %v12946_v52 }
 0x549   : > { %v7146_v20 = vadd.f32 %v7145_v29, %v7115_v44  ;;  %v7078_v46 = vadd.f32 %v7077_v35, %v12943_v28  ;;  %v7116_v60 = vmul.f32 %v12943_v28, %v12943_v28  ;;  %v9145_v16 = vpop.f32.mrb[28].mxu1 }
 0x54a   : > { %v9258_v3 = vadd.f32 %v9145_v16, %v12693_v41  ;;  %v6967_v13 = vpop.f32.mrb[29].mxu1 }
 0x54b   : > { %v7079_v47 = vadd.f32 %v7078_v46, %v12937_v59  ;;  %v7147_v19 = vadd.f32 %v7146_v20, %v7116_v60  ;;  %v9259_v63 = vadd.f32 %v6967_v13, %v12695_v21  ;;  %v9146_v62 = vpop.f32.mrb[30].mxu1 }
 0x54c   : > { %v9260_v12 = vadd.f32 %v9146_v62, %v12697_v27  ;;  %v6970_v57 = vpop.f32.mrb[31].mxu1  ;;  %v12965_v42 = vadd.f32 %v9258_v3, %v12759_v6 }
 0x54d   : > { %v7148_v55 = vadd.f32 %v7147_v19, %v7117_v17  ;;  %v12960_v22 = vadd.f32 %v9259_v63, %v12759_v6  ;;  %v7080_v41 = vadd.f32 %v7079_v47, %v12946_v52  ;;  %v9261_v53 = vadd.f32 %v6970_v57, %v12699_v15 }
 0x54e   : > { %v12974_v48 = vadd.f32 %v9260_v12, %v12759_v6  ;;  %v7121_v30 = vmul.f32 %v12965_v42, %v12965_v42 }
 0x54f   : > { %v7081_v21 = vadd.f32 %v7080_v41, %v12960_v22  ;;  %v7119_v8 = vmul.f32 %v12960_v22, %v12960_v22  ;;  %v7149_v37 = vadd.f32 %v7148_v55, %v7118_v54  ;;  %v12971_v27 = vadd.f32 %v9261_v53, %v12759_v6  ;;  %v7653_v41 = vld [vmem:[%s13229_s10] ss:$0 sm:$0xff] }
 0x550   : > { %v7122_v24 = vmul.f32 %v12974_v48, %v12974_v48 }
 0x551   : > { %v7150_v31 = vadd.f32 %v7149_v37, %v7119_v8  ;;  %v7082_v45 = vadd.f32 %v7081_v21, %v12971_v27  ;;  %v7120_v15 = vmul.f32 %v12971_v27, %v12971_v27  ;;  %v13467_v8 = vld [vmem:[#allocation3_spill] sm:$0xff] }
 0x552   : > { %v12990_v37 = vadd.f32 %v13467_v8, %v7653_v41 }
 0x553   : > { %v7083_v36 = vadd.f32 %v7082_v45, %v12965_v42  ;;  %v7151_v26 = vadd.f32 %v7150_v31, %v7120_v15  ;;  %v13468_v31 = vld [vmem:[#allocation4_spill] sm:$0xff]  ;;  %v13469_v15 = vld [vmem:[#allocation5_spill] sm:$0xff] }
 0x554   : > { %v12993_v45 = vadd.f32 %v7653_v41, %v13468_v31  ;;  %v13487_v31 = vld [vmem:[#allocation18_spill] sm:$0xff] }
 0x555   : > { %v7084_v38 = vadd.f32 %v7083_v36, %v12974_v48  ;;  %v7152_v35 = vadd.f32 %v7151_v26, %v7121_v30  ;;  %v12996_v30 = vadd.f32 %v13469_v15, %v7653_v41  ;;  %v13470_v36 = vld [vmem:[#allocation6_spill] sm:$0xff]  ;;  %v13035_v15 = vadd.f32 %v7653_v41, %v13487_v31  ;;  %v13501_v31 = vld [vmem:[#allocation24_spill] sm:$0xff] }
 0x556   : > { %v12999_v26 = vadd.f32 %v7653_v41, %v13470_v36  ;;  %v13489_v36 = vld [vmem:[#allocation19_spill] sm:$0xff] }
 0x557   : > { %v7085_v44 = vrot.slane %v7084_v38, 4  ;;  %v7153_v6 = vadd.f32 %v7152_v35, %v7122_v24  ;;  %13488 = vst [vmem:[#allocation43_spill] sm:$0xff] %v13035_v15 }
 0x559   : > { %v7086_v29 = vadd.f32 %v7085_v44, %v7084_v38  ;;  %v7154_v20 = vrot.slane %v7153_v6, 4  ;;  %v13471_v38 = vld [vmem:[#allocation7_spill] sm:$0xff]  ;;  %v13472_v44 = vld [vmem:[#allocation8_spill] sm:$0xff] }
 0x55a   : > { %v13002_v35 = vadd.f32 %v13471_v38, %v7653_v41  ;;  %v13038_v38 = vadd.f32 %v13489_v36, %v7653_v41  ;;  %v13503_v36 = vld [vmem:[#allocation25_spill] sm:$0xff] }
 0x55b   : > { %v7087_v46 = vrot.slane %v7086_v29, 2  ;;  %v7155_v60 = vadd.f32 %v7154_v20, %v7153_v6  ;;  %v13005_v6 = vadd.f32 %v7653_v41, %v13472_v44  ;;  %v13491_v44 = vld [vmem:[#allocation20_spill] sm:$0xff] }
 0x55c   : > { %13490 = vst [vmem:[#allocation41_spill] sm:$0xff] %v13038_v38  ;;  %v13060_v38 = vadd.f32 %v13503_v36, %v7653_v41  ;;  %v13517_v36 = vld [vmem:[#allocation32_spill] sm:$0xff] }
 0x55d   : > { %v7088_v16 = vadd.f32 %v7087_v46, %v7086_v29  ;;  %v7156_v3 = vrot.slane %v7155_v60, 2  ;;  %v13473_v29 = vld [vmem:[#allocation9_spill] sm:$0xff]  ;;  %v13474_v46 = vld [vmem:[#allocation10_spill] sm:$0xff] }
 0x55e   : > { %v13008_v20 = vadd.f32 %v13473_v29, %v7653_v41  ;;  %v13493_v29 = vld [vmem:[#allocation35_spill] sm:$0xff]  ;;  %13504 = vst [vmem:[#allocation48_spill] sm:$0xff] %v13060_v38  ;;  %v13081_v38 = vadd.f32 %v7653_v41, %v13517_v36 }
 0x55f   : > { %v7089_v13 = vrot.slane %v7088_v16, 1  ;;  %v7157_v17 = vadd.f32 %v7156_v3, %v7155_v60  ;;  %v13011_v60 = vadd.f32 %v7653_v41, %v13474_v46  ;;  %v13494_v46 = vsub.s32 0, %v13493_v29 }
 0x560   : > { %13518 = vst [vmem:[#allocation55_spill] sm:$0xff] %v13081_v38 }
 0x561   : > { %v7158_v47 = vrot.slane %v7157_v17, 1  ;;  %v7090_v19 = vadd.f32 %v7089_v13, %v7088_v16  ;;  %v13475_v16 = vld [vmem:[#allocation11_spill] sm:$0xff]  ;;  %v13477_v13 = vld [vmem:[#allocation12_spill] sm:$0xff] }
 0x562   : > { %v13014_v3 = vadd.f32 %v13475_v16, %v7653_v41 }
 0x563   : > { %v7159_v63 = vadd.f32 %v7158_v47, %v7157_v17  ;;  %v13017_v17 = vadd.f32 %v7653_v41, %v13477_v13  ;;  %v13478_v47 = vld [vmem:[#allocation13_spill] sm:$0xff] }
 0x564   : > { %13476 = vst [vmem:[#allocation37_spill] sm:$0xff] %v13014_v3  ;;  %v13495_v13 = vld [vmem:[#allocation21_spill] sm:$0xff] }
 0x565   : > { %v7160_v62 = vsel %vm1115_vm1, %v7090_v19, %v7159_v63  ;;  %v13020_v19 = vadd.f32 %v13478_v47, %v7653_v41  ;;  %v13480_v63 = vld [vmem:[#allocation14_spill] sm:$0xff]  ;;  %v13048_v47 = vadd.f32 %v13495_v13, %v7653_v41  ;;  %v13509_v13 = vld [vmem:[#allocation28_spill] sm:$0xff] }
 0x566   : > { %9180 = vmatmul.mubr.f32.vlgmr.msra.gmra.mrb[66].mxu0 %v7160_v62  ;;  %v13023_v62 = vadd.f32 %v7653_v41, %v13480_v63  ;;  %v13497_v63 = vld [vmem:[#allocation22_spill] sm:$0xff] }
 0x567   : > { %13479 = vst [vmem:[#allocation36_spill] sm:$0xff] %v13020_v19  ;;  %13496 = vst [vmem:[#allocation46_spill] sm:$0xff] %v13048_v47  ;;  %v13069_v47 = vadd.f32 %v7653_v41, %v13509_v13 }
 0x569   : > { %13510 = vst [vmem:[#allocation51_spill] sm:$0xff] %v13069_v47 }
 0x639   : > { %v7243_v54 = vpop.f32.mrb[66].mxu0 }
 0x63a   : > { %v7247_v12 = vmul.f32 %v7243_v54, %v7243_v54  ;;  %v9181_v57 = vpop.f32.mrb[67].mxu0  ;;  %v13045_v16 = vrot.slane %v7243_v54, %v13494_v46 }
 0x63c   : > { %v7249_v55 = vrot.slane %v7247_v12, 7  ;;  %v13481_v12 = vld [vmem:[#allocation15_spill] sm:$0xff]  ;;  %v7259_v13 = vsub.f32 %v12765_v25, %v13045_v16  ;;  %v7263_v36 = vsub.f32 %v12792_v40, %v13045_v16  ;;  %v7265_v25 = vsub.f32 %v12797_v39, %v13045_v16 }
 0x63d   : > { %v13026_v57 = vadd.f32 %v13481_v12, %v7653_v41  ;;  %v13051_v12 = vadd.f32 %v7653_v41, %v13497_v63  ;;  %v13511_v63 = vld [vmem:[#allocation29_spill] sm:$0xff]  ;;  %v7269_v40 = vsub.f32 %v12825_v33, %v13045_v16  ;;  %v7272_v39 = vsub.f32 %v12859_v9, %v13045_v16 }
 0x63e   : > { %v7251_v53 = vsub.f32 %v7243_v54, %v7249_v55  ;;  %v13483_v55 = vld [vmem:[#allocation16_spill] sm:$0xff]  ;;  %v13507_v54 = vld [vmem:[#allocation27_spill] sm:$0xff]  ;;  %v7276_v33 = vsub.f32 %v12887_v50, %v13045_v16  ;;  %v7279_v9 = vsub.f32 %v12904_v51, %v13045_v16  ;;  %v7283_v50 = vsub.f32 %v12932_v18, %v13045_v16 }
 0x63f   : > { %13482 = vst [vmem:[#allocation40_spill] sm:$0xff] %v13026_v57  ;;  %13498 = vst [vmem:[#allocation45_spill] sm:$0xff] %v13051_v12  ;;  %v13066_v46 = vadd.f32 %v13507_v54, %v7653_v41  ;;  %v13072_v12 = vadd.f32 %v13511_v63, %v7653_v41  ;;  %v13521_v54 = vld [vmem:[#allocation34_spill] sm:$0xff]  ;;  %v7260_v63 = vsub.f32 %v12772_v32, %v13045_v16 }
 0x640   : > { %v7252_v21 = vmax.f32 %v7251_v53, 0.0  ;;  %v13029_v53 = vadd.f32 %v7653_v41, %v13483_v55  ;;  %v13499_v55 = vld [vmem:[#allocation23_spill] sm:$0xff]  ;;  %v7266_v32 = vsub.f32 %v12806_v7, %v13045_v16  ;;  %v7273_v7 = vsub.f32 %v12853_v10, %v13045_v16 }
 0x641   : > { %13508 = vst [vmem:[#allocation50_spill] sm:$0xff] %v13066_v46  ;;  %13512 = vst [vmem:[#allocation52_spill] sm:$0xff] %v13072_v12  ;;  %v13087_v46 = vadd.f32 %v7653_v41, %v13521_v54  ;;  %v7271_v54 = vsub.f32 %v12848_v4, %v13045_v16  ;;  %v7278_v4 = vsub.f32 %v12890_v0, %v13045_v16 }
 0x642   : > { %v7253_v24 = vadd.f32 1e-05, %v7252_v21  ;;  %13484 = vst [vmem:[#allocation38_spill] sm:$0xff] %v13029_v53  ;;  %v13485_v21 = vld [vmem:[#allocation17_spill] sm:$0xff]  ;;  %v7280_v10 = vsub.f32 %v12915_v58, %v13045_v16  ;;  %v7285_v0 = vsub.f32 %v12937_v59, %v13045_v16  ;;  %v7286_v51 = vsub.f32 %v12946_v52, %v13045_v16 }
 0x643   : > { %v13032_v8 = vadd.f32 %v13485_v21, %v7653_v41  ;;  %v13054_v21 = vadd.f32 %v13499_v55, %v7653_v41  ;;  %v13513_v55 = vld [vmem:[#allocation30_spill] sm:$0xff]  ;;  %13522 = vst [vmem:[#allocation57_spill] sm:$0xff] %v13087_v46  ;;  %v13523_v58 = vsub.s32 1, %v13493_v29  ;;  %v7289_v18 = vsub.f32 %v12965_v42, %v13045_v16 }
 0x644   : > { %9780 = vrsqrt.f32 %v7253_v24  ;;  %v13041_v24 = vadd.f32 %v7653_v41, %v13491_v44  ;;  %v13505_v44 = vld [vmem:[#allocation26_spill] sm:$0xff] }
 0x645   : > { %13486 = vst [vmem:[#allocation39_spill] sm:$0xff] %v13032_v8  ;;  %13500 = vst [vmem:[#allocation44_spill] sm:$0xff] %v13054_v21  ;;  %v13057_v8 = vadd.f32 %v7653_v41, %v13501_v31  ;;  %v13075_v21 = vadd.f32 %v7653_v41, %v13513_v55  ;;  %v13515_v31 = vld [vmem:[#allocation31_spill] sm:$0xff]  ;;  %v7261_v55 = vsub.f32 %v12769_v43, %v13045_v16 }
 0x646   : > { %13492 = vst [vmem:[#allocation42_spill] sm:$0xff] %v13041_v24  ;;  %v13063_v24 = vadd.f32 %v7653_v41, %v13505_v44  ;;  %v13519_v44 = vld [vmem:[#allocation33_spill] sm:$0xff]  ;;  %v7267_v43 = vsub.f32 %v12820_v1, %v13045_v16  ;;  %v7274_v1 = vsub.f32 %v12862_v5, %v13045_v16  ;;  %v7281_v5 = vsub.f32 %v12909_v56, %v13045_v16 }
 0x647   : > { %13502 = vst [vmem:[#allocation47_spill] sm:$0xff] %v13057_v8  ;;  %13514 = vst [vmem:[#allocation53_spill] sm:$0xff] %v13075_v21  ;;  %v13078_v8 = vadd.f32 %v13515_v31, %v7653_v41  ;;  %v7262_v31 = vsub.f32 %v12775_v14, %v13045_v16  ;;  %v7268_v14 = vsub.f32 %v12831_v49, %v13045_v16 }
 0x648   : > { %13506 = vst [vmem:[#allocation49_spill] sm:$0xff] %v13063_v24  ;;  %v13084_v24 = vadd.f32 %v13519_v44, %v7653_v41  ;;  %v7264_v44 = vsub.f32 %v12803_v61, %v13045_v16  ;;  %v8089_v41 = vld [vmem:[%s13226_s7] ss:$0 sm:$0xff]  ;;  %v7270_v61 = vsub.f32 %v12834_v11, %v13045_v16  ;;  %v7275_v49 = vsub.f32 %v12876_v2, %v13045_v16 }
 0x649   : > { %13516 = vst [vmem:[#allocation54_spill] sm:$0xff] %v13078_v8  ;;  %v7277_v11 = vsub.f32 %v12881_v23, %v13045_v16  ;;  %v7282_v2 = vsub.f32 %v12918_v34, %v13045_v16  ;;  %v7284_v23 = vsub.f32 %v12943_v28, %v13045_v16  ;;  %v7287_v56 = vsub.f32 %v12960_v22, %v13045_v16 }
 0x64a   : > { %13520 = vst [vmem:[#allocation56_spill] sm:$0xff] %v13084_v24  ;;  %v7288_v34 = vsub.f32 %v12971_v27, %v13045_v16  ;;  %v7290_v28 = vsub.f32 %v12974_v48, %v13045_v16  ;;  %v8090_v16 = vld [vmem:[%s13227_s8] ss:$0 sm:$0xff] }
 0x64e   : > { %v9781_v24 = vpop.eup %9780 }
 0x64f   : > { %v7297_v8 = vmul.f32 %v9781_v24, %v8089_v41 }
 0x651   : > { %v7301_v24 = vrot.slane %v7297_v8, %v13523_v58 }
 0x653   : > { %v7302_v41 = vmul.f32 %v7301_v24, %v7259_v13  ;;  %v7303_v59 = vmul.f32 %v7301_v24, %v7260_v63  ;;  %v7304_v46 = vmul.f32 %v7301_v24, %v7261_v55  ;;  %v7305_v38 = vmul.f32 %v7301_v24, %v7262_v31 }
 0x654   : > { %v7306_v52 = vmul.f32 %v7301_v24, %v7263_v36  ;;  %v7307_v12 = vmul.f32 %v7301_v24, %v7264_v44  ;;  %v7308_v29 = vmul.f32 %v7301_v24, %v7265_v25  ;;  %v7309_v8 = vmul.f32 %v7301_v24, %v7266_v32 }
 0x655   : > { %v7310_v58 = vmul.f32 %v7301_v24, %v7267_v43  ;;  %v7311_v21 = vmul.f32 %v7301_v24, %v7268_v14  ;;  %v7312_v22 = vmul.f32 %v7301_v24, %v7269_v40  ;;  %v7313_v47 = vmul.f32 %v7301_v24, %v7270_v61 }
 0x656   : > { %v7314_v57 = vmul.f32 %v7301_v24, %v7271_v54  ;;  %v7315_v27 = vmul.f32 %v7301_v24, %v7272_v39  ;;  %v7316_v15 = vmul.f32 %v7301_v24, %v7273_v7  ;;  %v7317_v53 = vmul.f32 %v7301_v24, %v7274_v1 }
 0x657   : > { %v7318_v42 = vmul.f32 %v7301_v24, %v7275_v49  ;;  %v7319_v19 = vmul.f32 %v7301_v24, %v7276_v33  ;;  %v7320_v3 = vmul.f32 %v7301_v24, %v7277_v11  ;;  %v7321_v48 = vmul.f32 %v7301_v24, %v7278_v4 }
 0x658   : > { %v7322_v13 = vmul.f32 %v7301_v24, %v7279_v9  ;;  %v7323_v63 = vmul.f32 %v7301_v24, %v7280_v10  ;;  %v7324_v55 = vmul.f32 %v7301_v24, %v7281_v5  ;;  %v7325_v31 = vmul.f32 %v7301_v24, %v7282_v2 }
 0x659   : > { %v7326_v36 = vmul.f32 %v7301_v24, %v7283_v50  ;;  %v7327_v44 = vmul.f32 %v7301_v24, %v7284_v23  ;;  %v7328_v25 = vmul.f32 %v7301_v24, %v7285_v0  ;;  %v7329_v32 = vmul.f32 %v7301_v24, %v7286_v51 }
 0x65a   : > { %v7330_v43 = vmul.f32 %v7301_v24, %v7287_v56  ;;  %v7331_v14 = vmul.f32 %v7301_v24, %v7288_v34  ;;  %v7332_v40 = vmul.f32 %v7301_v24, %v7289_v18  ;;  %v7333_v61 = vmul.f32 %v7301_v24, %v7290_v28 }
 0x65b   : > { %v7340_v54 = vadd.f32 %v8090_v16, %v7302_v41  ;;  %v7341_v39 = vadd.f32 %v8090_v16, %v7303_v59  ;;  %v7342_v7 = vadd.f32 %v8090_v16, %v7304_v46  ;;  %v7343_v1 = vadd.f32 %v8090_v16, %v7305_v38 }
 0x65c   : > { %v7344_v49 = vadd.f32 %v8090_v16, %v7306_v52  ;;  %v7345_v33 = vadd.f32 %v8090_v16, %v7307_v12  ;;  %v7346_v11 = vadd.f32 %v8090_v16, %v7308_v29  ;;  %v7347_v4 = vadd.f32 %v8090_v16, %v7309_v8 }
 0x65d   : > { %v7348_v9 = vadd.f32 %v8090_v16, %v7310_v58  ;;  %v7349_v10 = vadd.f32 %v8090_v16, %v7311_v21  ;;  %v7350_v5 = vadd.f32 %v8090_v16, %v7312_v22  ;;  %v7351_v2 = vadd.f32 %v8090_v16, %v7313_v47 }
 0x65e   : > { %v7352_v50 = vadd.f32 %v8090_v16, %v7314_v57  ;;  %v7353_v23 = vadd.f32 %v8090_v16, %v7315_v27  ;;  %v7354_v0 = vadd.f32 %v8090_v16, %v7316_v15  ;;  %v7355_v51 = vadd.f32 %v8090_v16, %v7317_v53 }
 0x65f   : > { %v7356_v56 = vadd.f32 %v8090_v16, %v7318_v42  ;;  %v7357_v34 = vadd.f32 %v8090_v16, %v7319_v19  ;;  %v7358_v18 = vadd.f32 %v8090_v16, %v7320_v3  ;;  %v7359_v24 = vadd.f32 %v8090_v16, %v7321_v48 }
 0x660   : > { %v7360_v28 = vadd.f32 %v8090_v16, %v7322_v13  ;;  %v7361_v41 = vadd.f32 %v8090_v16, %v7323_v63  ;;  %v7362_v46 = vadd.f32 %v8090_v16, %v7324_v55  ;;  %v7363_v38 = vadd.f32 %v8090_v16, %v7325_v31  ;;  %v13524_v13 = vld [vmem:[#allocation37_spill] sm:$0xff]  ;;  %v13525_v63 = vld [vmem:[#allocation36_spill] sm:$0xff]  ;;  %v13526_v55 = vld [vmem:[#allocation38_spill] sm:$0xff] }
 0x661   : > { %v7364_v59 = vadd.f32 %v8090_v16, %v7326_v36  ;;  %v7365_v12 = vadd.f32 %v8090_v16, %v7327_v44  ;;  %v7366_v52 = vadd.f32 %v8090_v16, %v7328_v25  ;;  %v7367_v29 = vadd.f32 %v8090_v16, %v7329_v32  ;;  %v13527_v31 = vld [vmem:[#allocation43_spill] sm:$0xff] }
 0x662   : > { %v7368_v8 = vadd.f32 %v8090_v16, %v7330_v43  ;;  %v7369_v21 = vadd.f32 %v8090_v16, %v7331_v14  ;;  %v7370_v58 = vadd.f32 %v8090_v16, %v7332_v40  ;;  %v7371_v47 = vadd.f32 %v8090_v16, %v7333_v61  ;;  %v13534_v40 = vld [vmem:[#allocation47_spill] sm:$0xff] }
 0x663   : > { %v7372_v57 = vadd.f32 %v7340_v54, %v12993_v45  ;;  %v7373_v53 = vadd.f32 %v7341_v39, %v12999_v26  ;;  %v7374_v19 = vadd.f32 %v7342_v7, %v12990_v37  ;;  %v7375_v3 = vadd.f32 %v7343_v1, %v12996_v30  ;;  %v13535_v54 = vld [vmem:[#allocation49_spill] sm:$0xff]  ;;  %v13536_v7 = vld [vmem:[#allocation44_spill] sm:$0xff] }
 0x664   : > { %v7376_v15 = vadd.f32 %v7344_v49, %v13005_v6  ;;  %v7377_v22 = vadd.f32 %v7345_v33, %v13011_v60  ;;  %v7378_v27 = vadd.f32 %v7346_v11, %v13002_v35  ;;  %v7379_v42 = vadd.f32 %v7347_v4, %v13008_v20  ;;  %v13528_v6 = vld [vmem:[#allocation40_spill] sm:$0xff]  ;;  %v13529_v60 = vld [vmem:[#allocation39_spill] sm:$0xff]  ;;  %v13530_v35 = vld [vmem:[#allocation42_spill] sm:$0xff] }
 0x665   : > { %v7380_v48 = vadd.f32 %v7348_v9, %v13017_v17  ;;  %v7381_v16 = vadd.f32 %v7349_v10, %v13023_v62  ;;  %v7382_v45 = vadd.f32 %v7350_v5, %v13524_v13  ;;  %v7383_v26 = vadd.f32 %v7351_v2, %v13525_v63  ;;  %v13531_v20 = vld [vmem:[#allocation45_spill] sm:$0xff]  ;;  %v13533_v62 = vld [vmem:[#allocation46_spill] sm:$0xff]  ;;  %v13537_v49 = vld [vmem:[#allocation48_spill] sm:$0xff] }
 0x666   : > { %v7384_v37 = vadd.f32 %v7352_v50, %v13526_v55  ;;  %v7385_v30 = vadd.f32 %v7353_v23, %v13527_v31  ;;  %v7386_v36 = vadd.f32 %v7354_v0, %v13528_v6  ;;  %v7387_v44 = vadd.f32 %v7355_v51, %v13529_v60  ;;  %v13532_v17 = vld [vmem:[#allocation41_spill] sm:$0xff]  ;;  %v13538_v11 = vld [vmem:[#allocation51_spill] sm:$0xff]  ;;  %v13540_v5 = vld [vmem:[#allocation50_spill] sm:$0xff] }
 0x667   : > { %v7388_v25 = vadd.f32 %v7356_v56, %v13530_v35  ;;  %v7389_v32 = vadd.f32 %v7357_v34, %v13531_v20  ;;  %v7390_v43 = vadd.f32 %v7358_v18, %v13532_v17  ;;  %v7391_v14 = vadd.f32 %v7359_v24, %v13533_v62  ;;  %v13539_v9 = vld [vmem:[#allocation53_spill] sm:$0xff]  ;;  %v13541_v50 = vld [vmem:[#allocation52_spill] sm:$0xff]  ;;  %v13542_v0 = vld [vmem:[#allocation55_spill] sm:$0xff] }
 0x668   : > { %v7392_v61 = vadd.f32 %v7360_v28, %v13534_v40  ;;  %v7393_v39 = vadd.f32 %v7361_v41, %v13535_v54  ;;  %v7394_v1 = vadd.f32 %v7362_v46, %v13536_v7  ;;  %v7395_v33 = vadd.f32 %v7363_v38, %v13537_v49  ;;  %v13543_v56 = vld [vmem:[#allocation57_spill] sm:$0xff]  ;;  %v13544_v18 = vld [vmem:[#allocation54_spill] sm:$0xff]  ;;  %v13545_v28 = vld [vmem:[#allocation56_spill] sm:$0xff] }
 0x669   : > { %v7396_v4 = vadd.f32 %v7364_v59, %v13538_v11  ;;  %v7397_v10 = vadd.f32 %v7365_v12, %v13539_v9  ;;  %v7398_v2 = vadd.f32 %v7366_v52, %v13540_v5  ;;  %v7399_v23 = vadd.f32 %v7367_v29, %v13541_v50 }
 0x66a   : > { %v7400_v51 = vadd.f32 %v7368_v8, %v13542_v0  ;;  %v7401_v34 = vadd.f32 %v7369_v21, %v13543_v56  ;;  %v7402_v24 = vadd.f32 %v7370_v58, %v13544_v18  ;;  %v7403_v41 = vadd.f32 %v7371_v47, %v13545_v28 }
 0x66b   : > { %v8194_v46 = vpack.c.bf16 %v7373_v53, %v7372_v57  ;;  %v8199_v38 = vpack.c.bf16 %v7375_v3, %v7374_v19  ;;  %v8204_v59 = vpack.c.bf16 %v7377_v22, %v7376_v15  ;;  %v8209_v12 = vpack.c.bf16 %v7379_v42, %v7378_v27 }
 0x66c   : > { %v8214_v52 = vpack.c.bf16 %v7381_v16, %v7380_v48  ;;  %v8219_v29 = vpack.c.bf16 %v7383_v26, %v7382_v45  ;;  %v8224_v13 = vpack.c.bf16 %v7385_v30, %v7384_v37  ;;  %v8229_v63 = vpack.c.bf16 %v7387_v44, %v7386_v36 }
 0x66d   : > { %8195 = vst [vmem:[%s13194_s15] sm:$0xff] %v8194_v46   ;;  %8271 = vst [vmem:[%s13194_s15 + $0x8] sm:$0xff] %v8199_v38   ;;  %v8234_v8 = vpack.c.bf16 %v7389_v32, %v7388_v25  ;;  %v8239_v21 = vpack.c.bf16 %v7391_v14, %v7390_v43  ;;  %v8244_v58 = vpack.c.bf16 %v7393_v39, %v7392_v61 }
 0x66e   : > { %8272 = vst [vmem:[%s13194_s15 + $0x10] sm:$0xff] %v8204_v59   ;;  %8273 = vst [vmem:[%s13194_s15 + $0x18] sm:$0xff] %v8209_v12   ;;  %v8249_v47 = vpack.c.bf16 %v7395_v33, %v7394_v1  ;;  %v8254_v57 = vpack.c.bf16 %v7397_v10, %v7396_v4  ;;  %v8259_v53 = vpack.c.bf16 %v7399_v23, %v7398_v2 }
 0x66f   : > { %8274 = vst [vmem:[%s13194_s15 + $0x20] sm:$0xff] %v8214_v52   ;;  %8275 = vst [vmem:[%s13194_s15 + $0x28] sm:$0xff] %v8219_v29   ;;  %v8264_v19 = vpack.c.bf16 %v7401_v34, %v7400_v51  ;;  %v8269_v3 = vpack.c.bf16 %v7403_v41, %v7402_v24 }
 0x670   : > { %8276 = vst [vmem:[%s13194_s15 + $0x30] sm:$0xff] %v8224_v13   ;;  %8277 = vst [vmem:[%s13194_s15 + $0x38] sm:$0xff] %v8229_v63  }
 0x671   : > { %8278 = vst [vmem:[%s13194_s15 + $0x40] sm:$0xff] %v8234_v8   ;;  %8279 = vst [vmem:[%s13194_s15 + $0x48] sm:$0xff] %v8239_v21  }
 0x672   : > { %8280 = vst [vmem:[%s13194_s15 + $0x50] sm:$0xff] %v8244_v58   ;;  %8281 = vst [vmem:[%s13194_s15 + $0x58] sm:$0xff] %v8249_v47  }
 0x673   : > { %8282 = vst [vmem:[%s13194_s15 + $0x60] sm:$0xff] %v8254_v57   ;;  %8283 = vst [vmem:[%s13194_s15 + $0x68] sm:$0xff] %v8259_v53  }
 0x674   : > { %8284 = vst [vmem:[%s13194_s15 + $0x70] sm:$0xff] %v8264_v19   ;;  %8285 = vst [vmem:[%s13194_s15 + $0x78] sm:$0xff] %v8269_v3  }
 0x675 PF: > { %s22_s21 = sadd.s32 1, %s9833_s21  }
 0x676   : > { %p19_p4 = scmp.ge.s32.totalorder %s22_s21, 4  }
 0x678   :  { %21 = sbr.rel (!%p19_p4) target bundleno = 1 (0x1), region = 109 }

</bundles_post_ra>
